<compile_context>
chip_gen: v7x
topology: tpu7x:2x2x1
jax: 0.10.0
libtpu: 0.0.40
codegen_flags: <defaults>
</compile_context>

<pallas_src>
import jax
import jax.numpy as jnp
from jax import lax
from jax.experimental import pallas as pl
from jax.experimental.pallas import tpu as pltpu

EMBEDDING_DIM = 6
HIDDEN = 128
OUTPUT_SIZE = 3          # len(tag_to_ix)
OUT_PAD = 128            # lane-dense padded output width
VOCAB_SIZE = 8           # reference has word_to_ix = {}; use a small synthetic vocab
NUM_LAYERS = 2
NEG_BIG = -1e30


def lstm_kernel(xg_ref, whh0_ref, w1_ref, b1_ref, wout_ref, bout_ref,
                out_ref, hs_ref):
    seq = xg_ref.shape[0]
    H = HIDDEN

    # Weights loaded once into vregs (single invocation, no double-buffering).
    whh0 = whh0_ref[...]
    w1 = w1_ref[...]
    b1 = b1_ref[...]

    h0 = jnp.zeros((1, H), jnp.float32)
    c0 = jnp.zeros((1, H), jnp.float32)
    h1 = jnp.zeros((1, H), jnp.float32)
    c1 = jnp.zeros((1, H), jnp.float32)

    def gates_to_hc(gates, c_prev):
        # PyTorch LSTM gate order: i, f, g, o
        i_g = jax.nn.sigmoid(gates[:, 0 * H:1 * H])
        f_g = jax.nn.sigmoid(gates[:, 1 * H:2 * H])
        g_g = jnp.tanh(gates[:, 2 * H:3 * H])
        o_g = jax.nn.sigmoid(gates[:, 3 * H:4 * H])
        c_new = f_g * c_prev + i_g * g_g
        h_new = o_g * jnp.tanh(c_new)
        return h_new, c_new

    # Fully-unrolled time recurrence: state stays in vregs, only the
    # unavoidable K=128 / K=256 recurrent matmuls remain per step.
    for t in range(seq):
        # layer 0: x-gates precomputed outside the loop (embedding folded in)
        gates0 = xg_ref[t:t + 1, :] + jnp.dot(
            h0, whh0, preferred_element_type=jnp.float32)
        h0, c0 = gates_to_hc(gates0, c0)

        # layer 1: fused [h0_t, h1_{t-1}] @ [W_ih1; W_hh1]  (K = 256)
        hin = jnp.concatenate([h0, h1], axis=-1)                  # (1, 2H)
        gates1 = jnp.dot(hin, w1, preferred_element_type=jnp.float32) + b1
        h1, c1 = gates_to_hc(gates1, c1)

        hs_ref[t:t + 1, :] = h1

    # Output projection + log_softmax once over all timesteps (M = seq),
    # lane-dense 128-wide output (padded lanes carry -1e30 bias -> exp == 0).
    logits = jnp.dot(hs_ref[...], wout_ref[...],
                     preferred_element_type=jnp.float32) + bout_ref[...]
    m = jnp.max(logits, axis=-1, keepdims=True)
    z = logits - m
    logp = z - jnp.log(jnp.sum(jnp.exp(z), axis=-1, keepdims=True))
    out_ref[...] = logp


def custom_lstm_forward(tokens, params):
    seq = tokens.shape[0]

    # Fold embedding + layer-0 input projection + bias into a per-token gate
    # table, then gather (plain-JAX glue; data-dependent indexing).
    xg_table = params["embedding"].astype(jnp.float32) @ params["wih0"] + params["b0"]
    xg = xg_table[tokens]                                            # (seq, 4H)

    # Fuse layer-1's input/recurrent weights.
    w1 = jnp.concatenate([params["wih1"], params["whh1"]], axis=0)   # (2H, 4H)

    # Lane-dense output projection: zero-pad columns, -1e30 bias on pad lanes.
    wout_pad = jnp.zeros((HIDDEN, OUT_PAD), jnp.float32)
    wout_pad = wout_pad.at[:, :OUTPUT_SIZE].set(params["wout"])
    bout_pad = jnp.full((1, OUT_PAD), NEG_BIG, jnp.float32)
    bout_pad = bout_pad.at[:, :OUTPUT_SIZE].set(params["bout"])

    out_pad = pl.pallas_call(
        lstm_kernel,
        out_shape=jax.ShapeDtypeStruct((seq, OUT_PAD), jnp.float32),
        # no grid: single invocation, full arrays resident in VMEM
        scratch_shapes=[pltpu.VMEM((seq, HIDDEN), jnp.float32)],     # h1 history
    )(xg, params["whh0"], w1, params["b1"], wout_pad, bout_pad)

    return out_pad[:, :OUTPUT_SIZE]


def reference_forward(tokens, params):
    """Pure-JAX reference mirroring torch semantics (for validation)."""
    x = params["embedding"][tokens].astype(jnp.float32)

    def layer(xs, wih, whh, b):
        def step(carry, x_t):
            h, c = carry
            gates = x_t @ wih + h @ whh + b[0]
            i_g = jax.nn.sigmoid(gates[0 * HIDDEN:1 * HIDDEN])
            f_g = jax.nn.sigmoid(gates[1 * HIDDEN:2 * HIDDEN])
            g_g = jnp.tanh(gates[2 * HIDDEN:3 * HIDDEN])
            o_g = jax.nn.sigmoid(gates[3 * HIDDEN:4 * HIDDEN])
            c_new = f_g * c + i_g * g_g
            h_new = o_g * jnp.tanh(c_new)
            return (h_new, c_new), h_new
        init = (jnp.zeros((HIDDEN,), jnp.float32), jnp.zeros((HIDDEN,), jnp.float32))
        _, hs = lax.scan(step, init, xs)
        return hs

    h_l0 = layer(x, params["wih0"], params["whh0"], params["b0"])
    h_l1 = layer(h_l0, params["wih1"], params["whh1"], params["b1"])
    logits = h_l1 @ params["wout"] + params["bout"][0]
    return jax.nn.log_softmax(logits, axis=1)


def init_params(key):
    ks = jax.random.split(key, 12)
    bound = 1.0 / jnp.sqrt(HIDDEN)

    def unif(k, shape):
        return jax.random.uniform(k, shape, jnp.float32, -bound, bound)

    # Weights kept f32 to match PyTorch f32 semantics exactly (bf16 cast is a
    # free VMEM/DMA saving at larger sizes but changes numerics slightly).
    params = {
        "embedding": jax.random.normal(ks[0], (VOCAB_SIZE, EMBEDDING_DIM), jnp.float32),
        # layer 0
        "wih0": unif(ks[1], (EMBEDDING_DIM, 4 * HIDDEN)),
        "whh0": unif(ks[2], (HIDDEN, 4 * HIDDEN)),
        "b0":   unif(ks[3], (1, 4 * HIDDEN)) + unif(ks[4], (1, 4 * HIDDEN)),  # b_ih + b_hh
        # layer 1
        "wih1": unif(ks[5], (HIDDEN, 4 * HIDDEN)),
        "whh1": unif(ks[6], (HIDDEN, 4 * HIDDEN)),
        "b1":   unif(ks[7], (1, 4 * HIDDEN)) + unif(ks[8], (1, 4 * HIDDEN)),
        # output linear
        "wout": unif(ks[9], (HIDDEN, OUTPUT_SIZE)),
        "bout": unif(ks[10], (1, OUTPUT_SIZE)),
    }
    return params


if __name__ == "__main__":
    key = jax.random.PRNGKey(0)
    pkey, tkey = jax.random.split(key)
    params = init_params(pkey)

    seq_len = 8
    tokens = jax.random.randint(tkey, (seq_len,), 0, VOCAB_SIZE, dtype=jnp.int32)

    out = custom_lstm_forward(tokens, params)
    jax.block_until_ready(out)

    ref = reference_forward(tokens, params)
    assert out.shape == (seq_len, OUTPUT_SIZE)
    assert jnp.allclose(out, ref, atol=5e-4, rtol=5e-4), "mismatch vs pure-JAX reference"

    # TODO(synk): for multi-sequence workloads, batch the recurrence (B,128)
    # states and add a 'parallel' batch grid axis to use v7x's second TensorCore.
    print("KERNEL_OK")
</pallas_src>

<mosaic_0001>
module attributes {stable_mosaic.version = 11 : i64} {
  func.func @lstm_kernel(%arg0: memref<8x512xf32, #tpu.memory_space<vmem>>, %arg1: memref<128x512xf32, #tpu.memory_space<vmem>>, %arg2: memref<256x512xf32, #tpu.memory_space<vmem>>, %arg3: memref<1x512xf32, #tpu.memory_space<vmem>>, %arg4: memref<128x128xf32, #tpu.memory_space<vmem>>, %arg5: memref<1x128xf32, #tpu.memory_space<vmem>>, %arg6: memref<8x128xf32, #tpu.memory_space<vmem>>, %arg7: memref<8x128xf32, #tpu.memory_space<vmem>>) attributes {dimension_semantics = [], scalar_prefetch = 0 : i64, scratch_operands = 1 : i64, tpu.core_type = #tpu.core_type<tc>} {
    %c0 = arith.constant 0 : index
    %c0_0 = arith.constant 0 : index
    %0 = vector.load %arg1[%c0, %c0_0] : memref<128x512xf32, #tpu.memory_space<vmem>>, vector<128x512xf32>
    %c0_1 = arith.constant 0 : index
    %c0_2 = arith.constant 0 : index
    %1 = vector.load %arg2[%c0_1, %c0_2] : memref<256x512xf32, #tpu.memory_space<vmem>>, vector<256x512xf32>
    %c0_3 = arith.constant 0 : index
    %c0_4 = arith.constant 0 : index
    %2 = vector.load %arg3[%c0_3, %c0_4] : memref<1x512xf32, #tpu.memory_space<vmem>>, vector<1x512xf32>
    %cst = arith.constant 0.000000e+00 : f32
    %3 = vector.broadcast %cst : f32 to vector<1x128xf32>
    %cst_5 = arith.constant 0.000000e+00 : f32
    %4 = vector.broadcast %cst_5 : f32 to vector<1x128xf32>
    %cst_6 = arith.constant 0.000000e+00 : f32
    %5 = vector.broadcast %cst_6 : f32 to vector<1x128xf32>
    %cst_7 = arith.constant 0.000000e+00 : f32
    %6 = vector.broadcast %cst_7 : f32 to vector<1x128xf32>
    %c0_8 = arith.constant 0 : index
    %c0_9 = arith.constant 0 : index
    %7 = vector.load %arg0[%c0_8, %c0_9] : memref<8x512xf32, #tpu.memory_space<vmem>>, vector<1x512xf32>
    %cst_10 = arith.constant dense<0.000000e+00> : vector<1x512xf32>
    %8 = tpu.matmul %3, %0, %cst_10 {dimension_numbers = #tpu.dot_dimension_numbers<[1], [0], [0], [1], [0, 0, 1, 1], [], []>} : vector<1x128xf32>, vector<128x512xf32>, vector<1x512xf32> -> vector<1x512xf32>
    %9 = arith.addf %7, %8 : vector<1x512xf32>
    %10 = vector.extract_strided_slice %9 {offsets = [0, 0], sizes = [1, 128], strides = [1, 1]} : vector<1x512xf32> to vector<1x128xf32>
    %11 = arith.negf %10 : vector<1x128xf32>
    %12 = math.exp %11 : vector<1x128xf32>
    %cst_11 = arith.constant 1.000000e+00 : f32
    %13 = vector.broadcast %cst_11 : f32 to vector<1x128xf32>
    %14 = arith.addf %13, %12 : vector<1x128xf32>
    %15 = arith.divf %13, %14 : vector<1x128xf32>
    %16 = vector.extract_strided_slice %9 {offsets = [0, 128], sizes = [1, 128], strides = [1, 1]} : vector<1x512xf32> to vector<1x128xf32>
    %17 = arith.negf %16 : vector<1x128xf32>
    %18 = math.exp %17 : vector<1x128xf32>
    %cst_12 = arith.constant 1.000000e+00 : f32
    %19 = vector.broadcast %cst_12 : f32 to vector<1x128xf32>
    %20 = arith.addf %19, %18 : vector<1x128xf32>
    %21 = arith.divf %19, %20 : vector<1x128xf32>
    %22 = vector.extract_strided_slice %9 {offsets = [0, 256], sizes = [1, 128], strides = [1, 1]} : vector<1x512xf32> to vector<1x128xf32>
    %23 = math.tanh %22 : vector<1x128xf32>
    %24 = vector.extract_strided_slice %9 {offsets = [0, 384], sizes = [1, 128], strides = [1, 1]} : vector<1x512xf32> to vector<1x128xf32>
    %25 = arith.negf %24 : vector<1x128xf32>
    %26 = math.exp %25 : vector<1x128xf32>
    %cst_13 = arith.constant 1.000000e+00 : f32
    %27 = vector.broadcast %cst_13 : f32 to vector<1x128xf32>
    %28 = arith.addf %27, %26 : vector<1x128xf32>
    %29 = arith.divf %27, %28 : vector<1x128xf32>
    %30 = arith.mulf %21, %4 : vector<1x128xf32>
    %31 = arith.mulf %15, %23 : vector<1x128xf32>
    %32 = arith.addf %30, %31 : vector<1x128xf32>
    %33 = math.tanh %32 : vector<1x128xf32>
    %34 = arith.mulf %29, %33 : vector<1x128xf32>
    %35 = tpu.concatenate %34, %5 in 1 : vector<1x128xf32>, vector<1x128xf32> -> vector<1x256xf32>
    %cst_14 = arith.constant dense<0.000000e+00> : vector<1x512xf32>
    %36 = tpu.matmul %35, %1, %cst_14 {dimension_numbers = #tpu.dot_dimension_numbers<[1], [0], [0], [1], [0, 0, 1, 1], [], []>} : vector<1x256xf32>, vector<256x512xf32>, vector<1x512xf32> -> vector<1x512xf32>
    %37 = arith.addf %36, %2 : vector<1x512xf32>
    %38 = vector.extract_strided_slice %37 {offsets = [0, 0], sizes = [1, 128], strides = [1, 1]} : vector<1x512xf32> to vector<1x128xf32>
    %39 = arith.negf %38 : vector<1x128xf32>
    %40 = math.exp %39 : vector<1x128xf32>
    %cst_15 = arith.constant 1.000000e+00 : f32
    %41 = vector.broadcast %cst_15 : f32 to vector<1x128xf32>
    %42 = arith.addf %41, %40 : vector<1x128xf32>
    %43 = arith.divf %41, %42 : vector<1x128xf32>
    %44 = vector.extract_strided_slice %37 {offsets = [0, 128], sizes = [1, 128], strides = [1, 1]} : vector<1x512xf32> to vector<1x128xf32>
    %45 = arith.negf %44 : vector<1x128xf32>
    %46 = math.exp %45 : vector<1x128xf32>
    %cst_16 = arith.constant 1.000000e+00 : f32
    %47 = vector.broadcast %cst_16 : f32 to vector<1x128xf32>
    %48 = arith.addf %47, %46 : vector<1x128xf32>
    %49 = arith.divf %47, %48 : vector<1x128xf32>
    %50 = vector.extract_strided_slice %37 {offsets = [0, 256], sizes = [1, 128], strides = [1, 1]} : vector<1x512xf32> to vector<1x128xf32>
    %51 = math.tanh %50 : vector<1x128xf32>
    %52 = vector.extract_strided_slice %37 {offsets = [0, 384], sizes = [1, 128], strides = [1, 1]} : vector<1x512xf32> to vector<1x128xf32>
    %53 = arith.negf %52 : vector<1x128xf32>
    %54 = math.exp %53 : vector<1x128xf32>
    %cst_17 = arith.constant 1.000000e+00 : f32
    %55 = vector.broadcast %cst_17 : f32 to vector<1x128xf32>
    %56 = arith.addf %55, %54 : vector<1x128xf32>
    %57 = arith.divf %55, %56 : vector<1x128xf32>
    %58 = arith.mulf %49, %6 : vector<1x128xf32>
    %59 = arith.mulf %43, %51 : vector<1x128xf32>
    %60 = arith.addf %58, %59 : vector<1x128xf32>
    %61 = math.tanh %60 : vector<1x128xf32>
    %62 = arith.mulf %57, %61 : vector<1x128xf32>
    %c0_18 = arith.constant 0 : index
    %c0_19 = arith.constant 0 : index
    %63 = vector.load %arg7[%c0_18, %c0_19] : memref<8x128xf32, #tpu.memory_space<vmem>>, vector<1x128xf32>
    tpu.vector_store %arg7[%c0_18, %c0_19], %62 {strides = array<i32>} : memref<8x128xf32, #tpu.memory_space<vmem>>, vector<1x128xf32>,
    %c1 = arith.constant 1 : index
    %c0_20 = arith.constant 0 : index
    %64 = vector.load %arg0[%c1, %c0_20] : memref<8x512xf32, #tpu.memory_space<vmem>>, vector<1x512xf32>
    %cst_21 = arith.constant dense<0.000000e+00> : vector<1x512xf32>
    %65 = tpu.matmul %34, %0, %cst_21 {dimension_numbers = #tpu.dot_dimension_numbers<[1], [0], [0], [1], [0, 0, 1, 1], [], []>} : vector<1x128xf32>, vector<128x512xf32>, vector<1x512xf32> -> vector<1x512xf32>
    %66 = arith.addf %64, %65 : vector<1x512xf32>
    %67 = vector.extract_strided_slice %66 {offsets = [0, 0], sizes = [1, 128], strides = [1, 1]} : vector<1x512xf32> to vector<1x128xf32>
    %68 = arith.negf %67 : vector<1x128xf32>
    %69 = math.exp %68 : vector<1x128xf32>
    %cst_22 = arith.constant 1.000000e+00 : f32
    %70 = vector.broadcast %cst_22 : f32 to vector<1x128xf32>
    %71 = arith.addf %70, %69 : vector<1x128xf32>
    %72 = arith.divf %70, %71 : vector<1x128xf32>
    %73 = vector.extract_strided_slice %66 {offsets = [0, 128], sizes = [1, 128], strides = [1, 1]} : vector<1x512xf32> to vector<1x128xf32>
    %74 = arith.negf %73 : vector<1x128xf32>
    %75 = math.exp %74 : vector<1x128xf32>
    %cst_23 = arith.constant 1.000000e+00 : f32
    %76 = vector.broadcast %cst_23 : f32 to vector<1x128xf32>
    %77 = arith.addf %76, %75 : vector<1x128xf32>
    %78 = arith.divf %76, %77 : vector<1x128xf32>
    %79 = vector.extract_strided_slice %66 {offsets = [0, 256], sizes = [1, 128], strides = [1, 1]} : vector<1x512xf32> to vector<1x128xf32>
    %80 = math.tanh %79 : vector<1x128xf32>
    %81 = vector.extract_strided_slice %66 {offsets = [0, 384], sizes = [1, 128], strides = [1, 1]} : vector<1x512xf32> to vector<1x128xf32>
    %82 = arith.negf %81 : vector<1x128xf32>
    %83 = math.exp %82 : vector<1x128xf32>
    %cst_24 = arith.constant 1.000000e+00 : f32
    %84 = vector.broadcast %cst_24 : f32 to vector<1x128xf32>
    %85 = arith.addf %84, %83 : vector<1x128xf32>
    %86 = arith.divf %84, %85 : vector<1x128xf32>
    %87 = arith.mulf %78, %32 : vector<1x128xf32>
    %88 = arith.mulf %72, %80 : vector<1x128xf32>
    %89 = arith.addf %87, %88 : vector<1x128xf32>
    %90 = math.tanh %89 : vector<1x128xf32>
    %91 = arith.mulf %86, %90 : vector<1x128xf32>
    %92 = tpu.concatenate %91, %62 in 1 : vector<1x128xf32>, vector<1x128xf32> -> vector<1x256xf32>
    %cst_25 = arith.constant dense<0.000000e+00> : vector<1x512xf32>
    %93 = tpu.matmul %92, %1, %cst_25 {dimension_numbers = #tpu.dot_dimension_numbers<[1], [0], [0], [1], [0, 0, 1, 1], [], []>} : vector<1x256xf32>, vector<256x512xf32>, vector<1x512xf32> -> vector<1x512xf32>
    %94 = arith.addf %93, %2 : vector<1x512xf32>
    %95 = vector.extract_strided_slice %94 {offsets = [0, 0], sizes = [1, 128], strides = [1, 1]} : vector<1x512xf32> to vector<1x128xf32>
    %96 = arith.negf %95 : vector<1x128xf32>
    %97 = math.exp %96 : vector<1x128xf32>
    %cst_26 = arith.constant 1.000000e+00 : f32
    %98 = vector.broadcast %cst_26 : f32 to vector<1x128xf32>
    %99 = arith.addf %98, %97 : vector<1x128xf32>
    %100 = arith.divf %98, %99 : vector<1x128xf32>
    %101 = vector.extract_strided_slice %94 {offsets = [0, 128], sizes = [1, 128], strides = [1, 1]} : vector<1x512xf32> to vector<1x128xf32>
    %102 = arith.negf %101 : vector<1x128xf32>
    %103 = math.exp %102 : vector<1x128xf32>
    %cst_27 = arith.constant 1.000000e+00 : f32
    %104 = vector.broadcast %cst_27 : f32 to vector<1x128xf32>
    %105 = arith.addf %104, %103 : vector<1x128xf32>
    %106 = arith.divf %104, %105 : vector<1x128xf32>
    %107 = vector.extract_strided_slice %94 {offsets = [0, 256], sizes = [1, 128], strides = [1, 1]} : vector<1x512xf32> to vector<1x128xf32>
    %108 = math.tanh %107 : vector<1x128xf32>
    %109 = vector.extract_strided_slice %94 {offsets = [0, 384], sizes = [1, 128], strides = [1, 1]} : vector<1x512xf32> to vector<1x128xf32>
    %110 = arith.negf %109 : vector<1x128xf32>
    %111 = math.exp %110 : vector<1x128xf32>
    %cst_28 = arith.constant 1.000000e+00 : f32
    %112 = vector.broadcast %cst_28 : f32 to vector<1x128xf32>
    %113 = arith.addf %112, %111 : vector<1x128xf32>
    %114 = arith.divf %112, %113 : vector<1x128xf32>
    %115 = arith.mulf %106, %60 : vector<1x128xf32>
    %116 = arith.mulf %100, %108 : vector<1x128xf32>
    %117 = arith.addf %115, %116 : vector<1x128xf32>
    %118 = math.tanh %117 : vector<1x128xf32>
    %119 = arith.mulf %114, %118 : vector<1x128xf32>
    %c1_29 = arith.constant 1 : index
    %c0_30 = arith.constant 0 : index
    %120 = vector.load %arg7[%c1_29, %c0_30] : memref<8x128xf32, #tpu.memory_space<vmem>>, vector<1x128xf32>
    tpu.vector_store %arg7[%c1_29, %c0_30], %119 {strides = array<i32>} : memref<8x128xf32, #tpu.memory_space<vmem>>, vector<1x128xf32>,
    %c2 = arith.constant 2 : index
    %c0_31 = arith.constant 0 : index
    %121 = vector.load %arg0[%c2, %c0_31] : memref<8x512xf32, #tpu.memory_space<vmem>>, vector<1x512xf32>
    %cst_32 = arith.constant dense<0.000000e+00> : vector<1x512xf32>
    %122 = tpu.matmul %91, %0, %cst_32 {dimension_numbers = #tpu.dot_dimension_numbers<[1], [0], [0], [1], [0, 0, 1, 1], [], []>} : vector<1x128xf32>, vector<128x512xf32>, vector<1x512xf32> -> vector<1x512xf32>
    %123 = arith.addf %121, %122 : vector<1x512xf32>
    %124 = vector.extract_strided_slice %123 {offsets = [0, 0], sizes = [1, 128], strides = [1, 1]} : vector<1x512xf32> to vector<1x128xf32>
    %125 = arith.negf %124 : vector<1x128xf32>
    %126 = math.exp %125 : vector<1x128xf32>
    %cst_33 = arith.constant 1.000000e+00 : f32
    %127 = vector.broadcast %cst_33 : f32 to vector<1x128xf32>
    %128 = arith.addf %127, %126 : vector<1x128xf32>
    %129 = arith.divf %127, %128 : vector<1x128xf32>
    %130 = vector.extract_strided_slice %123 {offsets = [0, 128], sizes = [1, 128], strides = [1, 1]} : vector<1x512xf32> to vector<1x128xf32>
    %131 = arith.negf %130 : vector<1x128xf32>
    %132 = math.exp %131 : vector<1x128xf32>
    %cst_34 = arith.constant 1.000000e+00 : f32
    %133 = vector.broadcast %cst_34 : f32 to vector<1x128xf32>
    %134 = arith.addf %133, %132 : vector<1x128xf32>
    %135 = arith.divf %133, %134 : vector<1x128xf32>
    %136 = vector.extract_strided_slice %123 {offsets = [0, 256], sizes = [1, 128], strides = [1, 1]} : vector<1x512xf32> to vector<1x128xf32>
    %137 = math.tanh %136 : vector<1x128xf32>
    %138 = vector.extract_strided_slice %123 {offsets = [0, 384], sizes = [1, 128], strides = [1, 1]} : vector<1x512xf32> to vector<1x128xf32>
    %139 = arith.negf %138 : vector<1x128xf32>
    %140 = math.exp %139 : vector<1x128xf32>
    %cst_35 = arith.constant 1.000000e+00 : f32
    %141 = vector.broadcast %cst_35 : f32 to vector<1x128xf32>
    %142 = arith.addf %141, %140 : vector<1x128xf32>
    %143 = arith.divf %141, %142 : vector<1x128xf32>
    %144 = arith.mulf %135, %89 : vector<1x128xf32>
    %145 = arith.mulf %129, %137 : vector<1x128xf32>
    %146 = arith.addf %144, %145 : vector<1x128xf32>
    %147 = math.tanh %146 : vector<1x128xf32>
    %148 = arith.mulf %143, %147 : vector<1x128xf32>
    %149 = tpu.concatenate %148, %119 in 1 : vector<1x128xf32>, vector<1x128xf32> -> vector<1x256xf32>
    %cst_36 = arith.constant dense<0.000000e+00> : vector<1x512xf32>
    %150 = tpu.matmul %149, %1, %cst_36 {dimension_numbers = #tpu.dot_dimension_numbers<[1], [0], [0], [1], [0, 0, 1, 1], [], []>} : vector<1x256xf32>, vector<256x512xf32>, vector<1x512xf32> -> vector<1x512xf32>
    %151 = arith.addf %150, %2 : vector<1x512xf32>
    %152 = vector.extract_strided_slice %151 {offsets = [0, 0], sizes = [1, 128], strides = [1, 1]} : vector<1x512xf32> to vector<1x128xf32>
    %153 = arith.negf %152 : vector<1x128xf32>
    %154 = math.exp %153 : vector<1x128xf32>
    %cst_37 = arith.constant 1.000000e+00 : f32
    %155 = vector.broadcast %cst_37 : f32 to vector<1x128xf32>
    %156 = arith.addf %155, %154 : vector<1x128xf32>
    %157 = arith.divf %155, %156 : vector<1x128xf32>
    %158 = vector.extract_strided_slice %151 {offsets = [0, 128], sizes = [1, 128], strides = [1, 1]} : vector<1x512xf32> to vector<1x128xf32>
    %159 = arith.negf %158 : vector<1x128xf32>
    %160 = math.exp %159 : vector<1x128xf32>
    %cst_38 = arith.constant 1.000000e+00 : f32
    %161 = vector.broadcast %cst_38 : f32 to vector<1x128xf32>
    %162 = arith.addf %161, %160 : vector<1x128xf32>
    %163 = arith.divf %161, %162 : vector<1x128xf32>
    %164 = vector.extract_strided_slice %151 {offsets = [0, 256], sizes = [1, 128], strides = [1, 1]} : vector<1x512xf32> to vector<1x128xf32>
    %165 = math.tanh %164 : vector<1x128xf32>
    %166 = vector.extract_strided_slice %151 {offsets = [0, 384], sizes = [1, 128], strides = [1, 1]} : vector<1x512xf32> to vector<1x128xf32>
    %167 = arith.negf %166 : vector<1x128xf32>
    %168 = math.exp %167 : vector<1x128xf32>
    %cst_39 = arith.constant 1.000000e+00 : f32
    %169 = vector.broadcast %cst_39 : f32 to vector<1x128xf32>
    %170 = arith.addf %169, %168 : vector<1x128xf32>
    %171 = arith.divf %169, %170 : vector<1x128xf32>
    %172 = arith.mulf %163, %117 : vector<1x128xf32>
    %173 = arith.mulf %157, %165 : vector<1x128xf32>
    %174 = arith.addf %172, %173 : vector<1x128xf32>
    %175 = math.tanh %174 : vector<1x128xf32>
    %176 = arith.mulf %171, %175 : vector<1x128xf32>
    %c2_40 = arith.constant 2 : index
    %c0_41 = arith.constant 0 : index
    %177 = vector.load %arg7[%c2_40, %c0_41] : memref<8x128xf32, #tpu.memory_space<vmem>>, vector<1x128xf32>
    tpu.vector_store %arg7[%c2_40, %c0_41], %176 {strides = array<i32>} : memref<8x128xf32, #tpu.memory_space<vmem>>, vector<1x128xf32>,
    %c3 = arith.constant 3 : index
    %c0_42 = arith.constant 0 : index
    %178 = vector.load %arg0[%c3, %c0_42] : memref<8x512xf32, #tpu.memory_space<vmem>>, vector<1x512xf32>
    %cst_43 = arith.constant dense<0.000000e+00> : vector<1x512xf32>
    %179 = tpu.matmul %148, %0, %cst_43 {dimension_numbers = #tpu.dot_dimension_numbers<[1], [0], [0], [1], [0, 0, 1, 1], [], []>} : vector<1x128xf32>, vector<128x512xf32>, vector<1x512xf32> -> vector<1x512xf32>
    %180 = arith.addf %178, %179 : vector<1x512xf32>
    %181 = vector.extract_strided_slice %180 {offsets = [0, 0], sizes = [1, 128], strides = [1, 1]} : vector<1x512xf32> to vector<1x128xf32>
    %182 = arith.negf %181 : vector<1x128xf32>
    %183 = math.exp %182 : vector<1x128xf32>
    %cst_44 = arith.constant 1.000000e+00 : f32
    %184 = vector.broadcast %cst_44 : f32 to vector<1x128xf32>
    %185 = arith.addf %184, %183 : vector<1x128xf32>
    %186 = arith.divf %184, %185 : vector<1x128xf32>
    %187 = vector.extract_strided_slice %180 {offsets = [0, 128], sizes = [1, 128], strides = [1, 1]} : vector<1x512xf32> to vector<1x128xf32>
    %188 = arith.negf %187 : vector<1x128xf32>
    %189 = math.exp %188 : vector<1x128xf32>
    %cst_45 = arith.constant 1.000000e+00 : f32
    %190 = vector.broadcast %cst_45 : f32 to vector<1x128xf32>
    %191 = arith.addf %190, %189 : vector<1x128xf32>
    %192 = arith.divf %190, %191 : vector<1x128xf32>
    %193 = vector.extract_strided_slice %180 {offsets = [0, 256], sizes = [1, 128], strides = [1, 1]} : vector<1x512xf32> to vector<1x128xf32>
    %194 = math.tanh %193 : vector<1x128xf32>
    %195 = vector.extract_strided_slice %180 {offsets = [0, 384], sizes = [1, 128], strides = [1, 1]} : vector<1x512xf32> to vector<1x128xf32>
    %196 = arith.negf %195 : vector<1x128xf32>
    %197 = math.exp %196 : vector<1x128xf32>
    %cst_46 = arith.constant 1.000000e+00 : f32
    %198 = vector.broadcast %cst_46 : f32 to vector<1x128xf32>
    %199 = arith.addf %198, %197 : vector<1x128xf32>
    %200 = arith.divf %198, %199 : vector<1x128xf32>
    %201 = arith.mulf %192, %146 : vector<1x128xf32>
    %202 = arith.mulf %186, %194 : vector<1x128xf32>
    %203 = arith.addf %201, %202 : vector<1x128xf32>
    %204 = math.tanh %203 : vector<1x128xf32>
    %205 = arith.mulf %200, %204 : vector<1x128xf32>
    %206 = tpu.concatenate %205, %176 in 1 : vector<1x128xf32>, vector<1x128xf32> -> vector<1x256xf32>
    %cst_47 = arith.constant dense<0.000000e+00> : vector<1x512xf32>
    %207 = tpu.matmul %206, %1, %cst_47 {dimension_numbers = #tpu.dot_dimension_numbers<[1], [0], [0], [1], [0, 0, 1, 1], [], []>} : vector<1x256xf32>, vector<256x512xf32>, vector<1x512xf32> -> vector<1x512xf32>
    %208 = arith.addf %207, %2 : vector<1x512xf32>
    %209 = vector.extract_strided_slice %208 {offsets = [0, 0], sizes = [1, 128], strides = [1, 1]} : vector<1x512xf32> to vector<1x128xf32>
    %210 = arith.negf %209 : vector<1x128xf32>
    %211 = math.exp %210 : vector<1x128xf32>
    %cst_48 = arith.constant 1.000000e+00 : f32
    %212 = vector.broadcast %cst_48 : f32 to vector<1x128xf32>
    %213 = arith.addf %212, %211 : vector<1x128xf32>
    %214 = arith.divf %212, %213 : vector<1x128xf32>
    %215 = vector.extract_strided_slice %208 {offsets = [0, 128], sizes = [1, 128], strides = [1, 1]} : vector<1x512xf32> to vector<1x128xf32>
    %216 = arith.negf %215 : vector<1x128xf32>
    %217 = math.exp %216 : vector<1x128xf32>
    %cst_49 = arith.constant 1.000000e+00 : f32
    %218 = vector.broadcast %cst_49 : f32 to vector<1x128xf32>
    %219 = arith.addf %218, %217 : vector<1x128xf32>
    %220 = arith.divf %218, %219 : vector<1x128xf32>
    %221 = vector.extract_strided_slice %208 {offsets = [0, 256], sizes = [1, 128], strides = [1, 1]} : vector<1x512xf32> to vector<1x128xf32>
    %222 = math.tanh %221 : vector<1x128xf32>
    %223 = vector.extract_strided_slice %208 {offsets = [0, 384], sizes = [1, 128], strides = [1, 1]} : vector<1x512xf32> to vector<1x128xf32>
    %224 = arith.negf %223 : vector<1x128xf32>
    %225 = math.exp %224 : vector<1x128xf32>
    %cst_50 = arith.constant 1.000000e+00 : f32
    %226 = vector.broadcast %cst_50 : f32 to vector<1x128xf32>
    %227 = arith.addf %226, %225 : vector<1x128xf32>
    %228 = arith.divf %226, %227 : vector<1x128xf32>
    %229 = arith.mulf %220, %174 : vector<1x128xf32>
    %230 = arith.mulf %214, %222 : vector<1x128xf32>
    %231 = arith.addf %229, %230 : vector<1x128xf32>
    %232 = math.tanh %231 : vector<1x128xf32>
    %233 = arith.mulf %228, %232 : vector<1x128xf32>
    %c3_51 = arith.constant 3 : index
    %c0_52 = arith.constant 0 : index
    %234 = vector.load %arg7[%c3_51, %c0_52] : memref<8x128xf32, #tpu.memory_space<vmem>>, vector<1x128xf32>
    tpu.vector_store %arg7[%c3_51, %c0_52], %233 {strides = array<i32>} : memref<8x128xf32, #tpu.memory_space<vmem>>, vector<1x128xf32>,
    %c4 = arith.constant 4 : index
    %c0_53 = arith.constant 0 : index
    %235 = vector.load %arg0[%c4, %c0_53] : memref<8x512xf32, #tpu.memory_space<vmem>>, vector<1x512xf32>
    %cst_54 = arith.constant dense<0.000000e+00> : vector<1x512xf32>
    %236 = tpu.matmul %205, %0, %cst_54 {dimension_numbers = #tpu.dot_dimension_numbers<[1], [0], [0], [1], [0, 0, 1, 1], [], []>} : vector<1x128xf32>, vector<128x512xf32>, vector<1x512xf32> -> vector<1x512xf32>
    %237 = arith.addf %235, %236 : vector<1x512xf32>
    %238 = vector.extract_strided_slice %237 {offsets = [0, 0], sizes = [1, 128], strides = [1, 1]} : vector<1x512xf32> to vector<1x128xf32>
    %239 = arith.negf %238 : vector<1x128xf32>
    %240 = math.exp %239 : vector<1x128xf32>
    %cst_55 = arith.constant 1.000000e+00 : f32
    %241 = vector.broadcast %cst_55 : f32 to vector<1x128xf32>
    %242 = arith.addf %241, %240 : vector<1x128xf32>
    %243 = arith.divf %241, %242 : vector<1x128xf32>
    %244 = vector.extract_strided_slice %237 {offsets = [0, 128], sizes = [1, 128], strides = [1, 1]} : vector<1x512xf32> to vector<1x128xf32>
    %245 = arith.negf %244 : vector<1x128xf32>
    %246 = math.exp %245 : vector<1x128xf32>
    %cst_56 = arith.constant 1.000000e+00 : f32
    %247 = vector.broadcast %cst_56 : f32 to vector<1x128xf32>
    %248 = arith.addf %247, %246 : vector<1x128xf32>
    %249 = arith.divf %247, %248 : vector<1x128xf32>
    %250 = vector.extract_strided_slice %237 {offsets = [0, 256], sizes = [1, 128], strides = [1, 1]} : vector<1x512xf32> to vector<1x128xf32>
    %251 = math.tanh %250 : vector<1x128xf32>
    %252 = vector.extract_strided_slice %237 {offsets = [0, 384], sizes = [1, 128], strides = [1, 1]} : vector<1x512xf32> to vector<1x128xf32>
    %253 = arith.negf %252 : vector<1x128xf32>
    %254 = math.exp %253 : vector<1x128xf32>
    %cst_57 = arith.constant 1.000000e+00 : f32
    %255 = vector.broadcast %cst_57 : f32 to vector<1x128xf32>
    %256 = arith.addf %255, %254 : vector<1x128xf32>
    %257 = arith.divf %255, %256 : vector<1x128xf32>
    %258 = arith.mulf %249, %203 : vector<1x128xf32>
    %259 = arith.mulf %243, %251 : vector<1x128xf32>
    %260 = arith.addf %258, %259 : vector<1x128xf32>
    %261 = math.tanh %260 : vector<1x128xf32>
    %262 = arith.mulf %257, %261 : vector<1x128xf32>
    %263 = tpu.concatenate %262, %233 in 1 : vector<1x128xf32>, vector<1x128xf32> -> vector<1x256xf32>
    %cst_58 = arith.constant dense<0.000000e+00> : vector<1x512xf32>
    %264 = tpu.matmul %263, %1, %cst_58 {dimension_numbers = #tpu.dot_dimension_numbers<[1], [0], [0], [1], [0, 0, 1, 1], [], []>} : vector<1x256xf32>, vector<256x512xf32>, vector<1x512xf32> -> vector<1x512xf32>
    %265 = arith.addf %264, %2 : vector<1x512xf32>
    %266 = vector.extract_strided_slice %265 {offsets = [0, 0], sizes = [1, 128], strides = [1, 1]} : vector<1x512xf32> to vector<1x128xf32>
    %267 = arith.negf %266 : vector<1x128xf32>
    %268 = math.exp %267 : vector<1x128xf32>
    %cst_59 = arith.constant 1.000000e+00 : f32
    %269 = vector.broadcast %cst_59 : f32 to vector<1x128xf32>
    %270 = arith.addf %269, %268 : vector<1x128xf32>
    %271 = arith.divf %269, %270 : vector<1x128xf32>
    %272 = vector.extract_strided_slice %265 {offsets = [0, 128], sizes = [1, 128], strides = [1, 1]} : vector<1x512xf32> to vector<1x128xf32>
    %273 = arith.negf %272 : vector<1x128xf32>
    %274 = math.exp %273 : vector<1x128xf32>
    %cst_60 = arith.constant 1.000000e+00 : f32
    %275 = vector.broadcast %cst_60 : f32 to vector<1x128xf32>
    %276 = arith.addf %275, %274 : vector<1x128xf32>
    %277 = arith.divf %275, %276 : vector<1x128xf32>
    %278 = vector.extract_strided_slice %265 {offsets = [0, 256], sizes = [1, 128], strides = [1, 1]} : vector<1x512xf32> to vector<1x128xf32>
    %279 = math.tanh %278 : vector<1x128xf32>
    %280 = vector.extract_strided_slice %265 {offsets = [0, 384], sizes = [1, 128], strides = [1, 1]} : vector<1x512xf32> to vector<1x128xf32>
    %281 = arith.negf %280 : vector<1x128xf32>
    %282 = math.exp %281 : vector<1x128xf32>
    %cst_61 = arith.constant 1.000000e+00 : f32
    %283 = vector.broadcast %cst_61 : f32 to vector<1x128xf32>
    %284 = arith.addf %283, %282 : vector<1x128xf32>
    %285 = arith.divf %283, %284 : vector<1x128xf32>
    %286 = arith.mulf %277, %231 : vector<1x128xf32>
    %287 = arith.mulf %271, %279 : vector<1x128xf32>
    %288 = arith.addf %286, %287 : vector<1x128xf32>
    %289 = math.tanh %288 : vector<1x128xf32>
    %290 = arith.mulf %285, %289 : vector<1x128xf32>
    %c4_62 = arith.constant 4 : index
    %c0_63 = arith.constant 0 : index
    %291 = vector.load %arg7[%c4_62, %c0_63] : memref<8x128xf32, #tpu.memory_space<vmem>>, vector<1x128xf32>
    tpu.vector_store %arg7[%c4_62, %c0_63], %290 {strides = array<i32>} : memref<8x128xf32, #tpu.memory_space<vmem>>, vector<1x128xf32>,
    %c5 = arith.constant 5 : index
    %c0_64 = arith.constant 0 : index
    %292 = vector.load %arg0[%c5, %c0_64] : memref<8x512xf32, #tpu.memory_space<vmem>>, vector<1x512xf32>
    %cst_65 = arith.constant dense<0.000000e+00> : vector<1x512xf32>
    %293 = tpu.matmul %262, %0, %cst_65 {dimension_numbers = #tpu.dot_dimension_numbers<[1], [0], [0], [1], [0, 0, 1, 1], [], []>} : vector<1x128xf32>, vector<128x512xf32>, vector<1x512xf32> -> vector<1x512xf32>
    %294 = arith.addf %292, %293 : vector<1x512xf32>
    %295 = vector.extract_strided_slice %294 {offsets = [0, 0], sizes = [1, 128], strides = [1, 1]} : vector<1x512xf32> to vector<1x128xf32>
    %296 = arith.negf %295 : vector<1x128xf32>
    %297 = math.exp %296 : vector<1x128xf32>
    %cst_66 = arith.constant 1.000000e+00 : f32
    %298 = vector.broadcast %cst_66 : f32 to vector<1x128xf32>
    %299 = arith.addf %298, %297 : vector<1x128xf32>
    %300 = arith.divf %298, %299 : vector<1x128xf32>
    %301 = vector.extract_strided_slice %294 {offsets = [0, 128], sizes = [1, 128], strides = [1, 1]} : vector<1x512xf32> to vector<1x128xf32>
    %302 = arith.negf %301 : vector<1x128xf32>
    %303 = math.exp %302 : vector<1x128xf32>
    %cst_67 = arith.constant 1.000000e+00 : f32
    %304 = vector.broadcast %cst_67 : f32 to vector<1x128xf32>
    %305 = arith.addf %304, %303 : vector<1x128xf32>
    %306 = arith.divf %304, %305 : vector<1x128xf32>
    %307 = vector.extract_strided_slice %294 {offsets = [0, 256], sizes = [1, 128], strides = [1, 1]} : vector<1x512xf32> to vector<1x128xf32>
    %308 = math.tanh %307 : vector<1x128xf32>
    %309 = vector.extract_strided_slice %294 {offsets = [0, 384], sizes = [1, 128], strides = [1, 1]} : vector<1x512xf32> to vector<1x128xf32>
    %310 = arith.negf %309 : vector<1x128xf32>
    %311 = math.exp %310 : vector<1x128xf32>
    %cst_68 = arith.constant 1.000000e+00 : f32
    %312 = vector.broadcast %cst_68 : f32 to vector<1x128xf32>
    %313 = arith.addf %312, %311 : vector<1x128xf32>
    %314 = arith.divf %312, %313 : vector<1x128xf32>
    %315 = arith.mulf %306, %260 : vector<1x128xf32>
    %316 = arith.mulf %300, %308 : vector<1x128xf32>
    %317 = arith.addf %315, %316 : vector<1x128xf32>
    %318 = math.tanh %317 : vector<1x128xf32>
    %319 = arith.mulf %314, %318 : vector<1x128xf32>
    %320 = tpu.concatenate %319, %290 in 1 : vector<1x128xf32>, vector<1x128xf32> -> vector<1x256xf32>
    %cst_69 = arith.constant dense<0.000000e+00> : vector<1x512xf32>
    %321 = tpu.matmul %320, %1, %cst_69 {dimension_numbers = #tpu.dot_dimension_numbers<[1], [0], [0], [1], [0, 0, 1, 1], [], []>} : vector<1x256xf32>, vector<256x512xf32>, vector<1x512xf32> -> vector<1x512xf32>
    %322 = arith.addf %321, %2 : vector<1x512xf32>
    %323 = vector.extract_strided_slice %322 {offsets = [0, 0], sizes = [1, 128], strides = [1, 1]} : vector<1x512xf32> to vector<1x128xf32>
    %324 = arith.negf %323 : vector<1x128xf32>
    %325 = math.exp %324 : vector<1x128xf32>
    %cst_70 = arith.constant 1.000000e+00 : f32
    %326 = vector.broadcast %cst_70 : f32 to vector<1x128xf32>
    %327 = arith.addf %326, %325 : vector<1x128xf32>
    %328 = arith.divf %326, %327 : vector<1x128xf32>
    %329 = vector.extract_strided_slice %322 {offsets = [0, 128], sizes = [1, 128], strides = [1, 1]} : vector<1x512xf32> to vector<1x128xf32>
    %330 = arith.negf %329 : vector<1x128xf32>
    %331 = math.exp %330 : vector<1x128xf32>
    %cst_71 = arith.constant 1.000000e+00 : f32
    %332 = vector.broadcast %cst_71 : f32 to vector<1x128xf32>
    %333 = arith.addf %332, %331 : vector<1x128xf32>
    %334 = arith.divf %332, %333 : vector<1x128xf32>
    %335 = vector.extract_strided_slice %322 {offsets = [0, 256], sizes = [1, 128], strides = [1, 1]} : vector<1x512xf32> to vector<1x128xf32>
    %336 = math.tanh %335 : vector<1x128xf32>
    %337 = vector.extract_strided_slice %322 {offsets = [0, 384], sizes = [1, 128], strides = [1, 1]} : vector<1x512xf32> to vector<1x128xf32>
    %338 = arith.negf %337 : vector<1x128xf32>
    %339 = math.exp %338 : vector<1x128xf32>
    %cst_72 = arith.constant 1.000000e+00 : f32
    %340 = vector.broadcast %cst_72 : f32 to vector<1x128xf32>
    %341 = arith.addf %340, %339 : vector<1x128xf32>
    %342 = arith.divf %340, %341 : vector<1x128xf32>
    %343 = arith.mulf %334, %288 : vector<1x128xf32>
    %344 = arith.mulf %328, %336 : vector<1x128xf32>
    %345 = arith.addf %343, %344 : vector<1x128xf32>
    %346 = math.tanh %345 : vector<1x128xf32>
    %347 = arith.mulf %342, %346 : vector<1x128xf32>
    %c5_73 = arith.constant 5 : index
    %c0_74 = arith.constant 0 : index
    %348 = vector.load %arg7[%c5_73, %c0_74] : memref<8x128xf32, #tpu.memory_space<vmem>>, vector<1x128xf32>
    tpu.vector_store %arg7[%c5_73, %c0_74], %347 {strides = array<i32>} : memref<8x128xf32, #tpu.memory_space<vmem>>, vector<1x128xf32>,
    %c6 = arith.constant 6 : index
    %c0_75 = arith.constant 0 : index
    %349 = vector.load %arg0[%c6, %c0_75] : memref<8x512xf32, #tpu.memory_space<vmem>>, vector<1x512xf32>
    %cst_76 = arith.constant dense<0.000000e+00> : vector<1x512xf32>
    %350 = tpu.matmul %319, %0, %cst_76 {dimension_numbers = #tpu.dot_dimension_numbers<[1], [0], [0], [1], [0, 0, 1, 1], [], []>} : vector<1x128xf32>, vector<128x512xf32>, vector<1x512xf32> -> vector<1x512xf32>
    %351 = arith.addf %349, %350 : vector<1x512xf32>
    %352 = vector.extract_strided_slice %351 {offsets = [0, 0], sizes = [1, 128], strides = [1, 1]} : vector<1x512xf32> to vector<1x128xf32>
    %353 = arith.negf %352 : vector<1x128xf32>
    %354 = math.exp %353 : vector<1x128xf32>
    %cst_77 = arith.constant 1.000000e+00 : f32
    %355 = vector.broadcast %cst_77 : f32 to vector<1x128xf32>
    %356 = arith.addf %355, %354 : vector<1x128xf32>
    %357 = arith.divf %355, %356 : vector<1x128xf32>
    %358 = vector.extract_strided_slice %351 {offsets = [0, 128], sizes = [1, 128], strides = [1, 1]} : vector<1x512xf32> to vector<1x128xf32>
    %359 = arith.negf %358 : vector<1x128xf32>
    %360 = math.exp %359 : vector<1x128xf32>
    %cst_78 = arith.constant 1.000000e+00 : f32
    %361 = vector.broadcast %cst_78 : f32 to vector<1x128xf32>
    %362 = arith.addf %361, %360 : vector<1x128xf32>
    %363 = arith.divf %361, %362 : vector<1x128xf32>
    %364 = vector.extract_strided_slice %351 {offsets = [0, 256], sizes = [1, 128], strides = [1, 1]} : vector<1x512xf32> to vector<1x128xf32>
    %365 = math.tanh %364 : vector<1x128xf32>
    %366 = vector.extract_strided_slice %351 {offsets = [0, 384], sizes = [1, 128], strides = [1, 1]} : vector<1x512xf32> to vector<1x128xf32>
    %367 = arith.negf %366 : vector<1x128xf32>
    %368 = math.exp %367 : vector<1x128xf32>
    %cst_79 = arith.constant 1.000000e+00 : f32
    %369 = vector.broadcast %cst_79 : f32 to vector<1x128xf32>
    %370 = arith.addf %369, %368 : vector<1x128xf32>
    %371 = arith.divf %369, %370 : vector<1x128xf32>
    %372 = arith.mulf %363, %317 : vector<1x128xf32>
    %373 = arith.mulf %357, %365 : vector<1x128xf32>
    %374 = arith.addf %372, %373 : vector<1x128xf32>
    %375 = math.tanh %374 : vector<1x128xf32>
    %376 = arith.mulf %371, %375 : vector<1x128xf32>
    %377 = tpu.concatenate %376, %347 in 1 : vector<1x128xf32>, vector<1x128xf32> -> vector<1x256xf32>
    %cst_80 = arith.constant dense<0.000000e+00> : vector<1x512xf32>
    %378 = tpu.matmul %377, %1, %cst_80 {dimension_numbers = #tpu.dot_dimension_numbers<[1], [0], [0], [1], [0, 0, 1, 1], [], []>} : vector<1x256xf32>, vector<256x512xf32>, vector<1x512xf32> -> vector<1x512xf32>
    %379 = arith.addf %378, %2 : vector<1x512xf32>
    %380 = vector.extract_strided_slice %379 {offsets = [0, 0], sizes = [1, 128], strides = [1, 1]} : vector<1x512xf32> to vector<1x128xf32>
    %381 = arith.negf %380 : vector<1x128xf32>
    %382 = math.exp %381 : vector<1x128xf32>
    %cst_81 = arith.constant 1.000000e+00 : f32
    %383 = vector.broadcast %cst_81 : f32 to vector<1x128xf32>
    %384 = arith.addf %383, %382 : vector<1x128xf32>
    %385 = arith.divf %383, %384 : vector<1x128xf32>
    %386 = vector.extract_strided_slice %379 {offsets = [0, 128], sizes = [1, 128], strides = [1, 1]} : vector<1x512xf32> to vector<1x128xf32>
    %387 = arith.negf %386 : vector<1x128xf32>
    %388 = math.exp %387 : vector<1x128xf32>
    %cst_82 = arith.constant 1.000000e+00 : f32
    %389 = vector.broadcast %cst_82 : f32 to vector<1x128xf32>
    %390 = arith.addf %389, %388 : vector<1x128xf32>
    %391 = arith.divf %389, %390 : vector<1x128xf32>
    %392 = vector.extract_strided_slice %379 {offsets = [0, 256], sizes = [1, 128], strides = [1, 1]} : vector<1x512xf32> to vector<1x128xf32>
    %393 = math.tanh %392 : vector<1x128xf32>
    %394 = vector.extract_strided_slice %379 {offsets = [0, 384], sizes = [1, 128], strides = [1, 1]} : vector<1x512xf32> to vector<1x128xf32>
    %395 = arith.negf %394 : vector<1x128xf32>
    %396 = math.exp %395 : vector<1x128xf32>
    %cst_83 = arith.constant 1.000000e+00 : f32
    %397 = vector.broadcast %cst_83 : f32 to vector<1x128xf32>
    %398 = arith.addf %397, %396 : vector<1x128xf32>
    %399 = arith.divf %397, %398 : vector<1x128xf32>
    %400 = arith.mulf %391, %345 : vector<1x128xf32>
    %401 = arith.mulf %385, %393 : vector<1x128xf32>
    %402 = arith.addf %400, %401 : vector<1x128xf32>
    %403 = math.tanh %402 : vector<1x128xf32>
    %404 = arith.mulf %399, %403 : vector<1x128xf32>
    %c6_84 = arith.constant 6 : index
    %c0_85 = arith.constant 0 : index
    %405 = vector.load %arg7[%c6_84, %c0_85] : memref<8x128xf32, #tpu.memory_space<vmem>>, vector<1x128xf32>
    tpu.vector_store %arg7[%c6_84, %c0_85], %404 {strides = array<i32>} : memref<8x128xf32, #tpu.memory_space<vmem>>, vector<1x128xf32>,
    %c7 = arith.constant 7 : index
    %c0_86 = arith.constant 0 : index
    %406 = vector.load %arg0[%c7, %c0_86] : memref<8x512xf32, #tpu.memory_space<vmem>>, vector<1x512xf32>
    %cst_87 = arith.constant dense<0.000000e+00> : vector<1x512xf32>
    %407 = tpu.matmul %376, %0, %cst_87 {dimension_numbers = #tpu.dot_dimension_numbers<[1], [0], [0], [1], [0, 0, 1, 1], [], []>} : vector<1x128xf32>, vector<128x512xf32>, vector<1x512xf32> -> vector<1x512xf32>
    %408 = arith.addf %406, %407 : vector<1x512xf32>
    %409 = vector.extract_strided_slice %408 {offsets = [0, 0], sizes = [1, 128], strides = [1, 1]} : vector<1x512xf32> to vector<1x128xf32>
    %410 = arith.negf %409 : vector<1x128xf32>
    %411 = math.exp %410 : vector<1x128xf32>
    %cst_88 = arith.constant 1.000000e+00 : f32
    %412 = vector.broadcast %cst_88 : f32 to vector<1x128xf32>
    %413 = arith.addf %412, %411 : vector<1x128xf32>
    %414 = arith.divf %412, %413 : vector<1x128xf32>
    %415 = vector.extract_strided_slice %408 {offsets = [0, 128], sizes = [1, 128], strides = [1, 1]} : vector<1x512xf32> to vector<1x128xf32>
    %416 = arith.negf %415 : vector<1x128xf32>
    %417 = math.exp %416 : vector<1x128xf32>
    %cst_89 = arith.constant 1.000000e+00 : f32
    %418 = vector.broadcast %cst_89 : f32 to vector<1x128xf32>
    %419 = arith.addf %418, %417 : vector<1x128xf32>
    %420 = arith.divf %418, %419 : vector<1x128xf32>
    %421 = vector.extract_strided_slice %408 {offsets = [0, 256], sizes = [1, 128], strides = [1, 1]} : vector<1x512xf32> to vector<1x128xf32>
    %422 = math.tanh %421 : vector<1x128xf32>
    %423 = vector.extract_strided_slice %408 {offsets = [0, 384], sizes = [1, 128], strides = [1, 1]} : vector<1x512xf32> to vector<1x128xf32>
    %424 = arith.negf %423 : vector<1x128xf32>
    %425 = math.exp %424 : vector<1x128xf32>
    %cst_90 = arith.constant 1.000000e+00 : f32
    %426 = vector.broadcast %cst_90 : f32 to vector<1x128xf32>
    %427 = arith.addf %426, %425 : vector<1x128xf32>
    %428 = arith.divf %426, %427 : vector<1x128xf32>
    %429 = arith.mulf %420, %374 : vector<1x128xf32>
    %430 = arith.mulf %414, %422 : vector<1x128xf32>
    %431 = arith.addf %429, %430 : vector<1x128xf32>
    %432 = math.tanh %431 : vector<1x128xf32>
    %433 = arith.mulf %428, %432 : vector<1x128xf32>
    %434 = tpu.concatenate %433, %404 in 1 : vector<1x128xf32>, vector<1x128xf32> -> vector<1x256xf32>
    %cst_91 = arith.constant dense<0.000000e+00> : vector<1x512xf32>
    %435 = tpu.matmul %434, %1, %cst_91 {dimension_numbers = #tpu.dot_dimension_numbers<[1], [0], [0], [1], [0, 0, 1, 1], [], []>} : vector<1x256xf32>, vector<256x512xf32>, vector<1x512xf32> -> vector<1x512xf32>
    %436 = arith.addf %435, %2 : vector<1x512xf32>
    %437 = vector.extract_strided_slice %436 {offsets = [0, 0], sizes = [1, 128], strides = [1, 1]} : vector<1x512xf32> to vector<1x128xf32>
    %438 = arith.negf %437 : vector<1x128xf32>
    %439 = math.exp %438 : vector<1x128xf32>
    %cst_92 = arith.constant 1.000000e+00 : f32
    %440 = vector.broadcast %cst_92 : f32 to vector<1x128xf32>
    %441 = arith.addf %440, %439 : vector<1x128xf32>
    %442 = arith.divf %440, %441 : vector<1x128xf32>
    %443 = vector.extract_strided_slice %436 {offsets = [0, 128], sizes = [1, 128], strides = [1, 1]} : vector<1x512xf32> to vector<1x128xf32>
    %444 = arith.negf %443 : vector<1x128xf32>
    %445 = math.exp %444 : vector<1x128xf32>
    %cst_93 = arith.constant 1.000000e+00 : f32
    %446 = vector.broadcast %cst_93 : f32 to vector<1x128xf32>
    %447 = arith.addf %446, %445 : vector<1x128xf32>
    %448 = arith.divf %446, %447 : vector<1x128xf32>
    %449 = vector.extract_strided_slice %436 {offsets = [0, 256], sizes = [1, 128], strides = [1, 1]} : vector<1x512xf32> to vector<1x128xf32>
    %450 = math.tanh %449 : vector<1x128xf32>
    %451 = vector.extract_strided_slice %436 {offsets = [0, 384], sizes = [1, 128], strides = [1, 1]} : vector<1x512xf32> to vector<1x128xf32>
    %452 = arith.negf %451 : vector<1x128xf32>
    %453 = math.exp %452 : vector<1x128xf32>
    %cst_94 = arith.constant 1.000000e+00 : f32
    %454 = vector.broadcast %cst_94 : f32 to vector<1x128xf32>
    %455 = arith.addf %454, %453 : vector<1x128xf32>
    %456 = arith.divf %454, %455 : vector<1x128xf32>
    %457 = arith.mulf %448, %402 : vector<1x128xf32>
    %458 = arith.mulf %442, %450 : vector<1x128xf32>
    %459 = arith.addf %457, %458 : vector<1x128xf32>
    %460 = math.tanh %459 : vector<1x128xf32>
    %461 = arith.mulf %456, %460 : vector<1x128xf32>
    %c7_95 = arith.constant 7 : index
    %c0_96 = arith.constant 0 : index
    %462 = vector.load %arg7[%c7_95, %c0_96] : memref<8x128xf32, #tpu.memory_space<vmem>>, vector<1x128xf32>
    tpu.vector_store %arg7[%c7_95, %c0_96], %461 {strides = array<i32>} : memref<8x128xf32, #tpu.memory_space<vmem>>, vector<1x128xf32>,
    %c0_97 = arith.constant 0 : index
    %c0_98 = arith.constant 0 : index
    %463 = vector.load %arg7[%c0_97, %c0_98] : memref<8x128xf32, #tpu.memory_space<vmem>>, vector<8x128xf32>
    %c0_99 = arith.constant 0 : index
    %c0_100 = arith.constant 0 : index
    %464 = vector.load %arg4[%c0_99, %c0_100] : memref<128x128xf32, #tpu.memory_space<vmem>>, vector<128x128xf32>
    %cst_101 = arith.constant dense<0.000000e+00> : vector<8x128xf32>
    %465 = tpu.matmul %463, %464, %cst_101 {dimension_numbers = #tpu.dot_dimension_numbers<[1], [0], [0], [1], [0, 0, 1, 1], [], []>} : vector<8x128xf32>, vector<128x128xf32>, vector<8x128xf32> -> vector<8x128xf32>
    %c0_102 = arith.constant 0 : index
    %c0_103 = arith.constant 0 : index
    %466 = vector.load %arg5[%c0_102, %c0_103] : memref<1x128xf32, #tpu.memory_space<vmem>>, vector<1x128xf32>
    %467 = vector.broadcast %466 : vector<1x128xf32> to vector<8x128xf32>
    %468 = arith.addf %465, %467 : vector<8x128xf32>
    %cst_104 = arith.constant dense<0xFF800000> : vector<8xf32>
    %469 = vector.multi_reduction <maximumf>, %468, %cst_104 [1] : vector<8x128xf32> to vector<8xf32>
    %470 = vector.shape_cast %469 : vector<8xf32> to vector<8x1xf32>
    %471 = vector.broadcast %470 : vector<8x1xf32> to vector<8x128xf32>
    %472 = arith.subf %468, %471 : vector<8x128xf32>
    %473 = math.exp %472 : vector<8x128xf32>
    %cst_105 = arith.constant dense<0.000000e+00> : vector<8xf32>
    %474 = vector.multi_reduction <add>, %473, %cst_105 [1] : vector<8x128xf32> to vector<8xf32>
    %475 = vector.shape_cast %474 : vector<8xf32> to vector<8x1xf32>
    %476 = math.log %475 : vector<8x1xf32>
    %477 = vector.broadcast %476 : vector<8x1xf32> to vector<8x128xf32>
    %478 = arith.subf %472, %477 : vector<8x128xf32>
    %c0_106 = arith.constant 0 : index
    %c0_107 = arith.constant 0 : index
    %479 = vector.load %arg6[%c0_106, %c0_107] : memref<8x128xf32, #tpu.memory_space<vmem>>, vector<8x128xf32>
    tpu.vector_store %arg6[%c0_106, %c0_107], %478 {strides = array<i32>} : memref<8x128xf32, #tpu.memory_space<vmem>>, vector<8x128xf32>,
    return
  }
}

</mosaic_0001>

<bundles_post_ra>
// kernel: tpu_custom_call.1
= control target key start
LH: loop header
LB: loop body
LE: loop exit
PB: predicated region body
PF: predicated region fallthrough
CT: control target
= control target key end

     0   :  { %11 = vsyncpa [#allocation4], 0  ;;  %s6670_s0 = inlined_call_operand.hbm [shape: f32[8,512], index: 0, kind: input, shape index: {}]   ;;  %s6671_s1 = inlined_call_operand.hbm [shape: f32[128,512], index: 1, kind: input, shape index: {}]   ;;  %s6672_s2 = inlined_call_operand.hbm [shape: f32[256,512], index: 2, kind: input, shape index: {}]   ;;  %s6673_s3 = inlined_call_operand.vmem [shape: f32[1,512], index: 3, kind: input, shape index: {}]   ;;  %s6674_s4 = inlined_call_operand.hbm [shape: f32[128,128], index: 4, kind: input, shape index: {}]   ;;  %s6675_s5 = inlined_call_operand.vmem [shape: f32[1,128], index: 5, kind: input, shape index: {}]   ;;  %s6676_s6 = inlined_call_operand.hbm [shape: f32[8,128], index: 6, kind: output, shape index: {}]  }
   0x1   :  { %12 = vsyncpa [#allocation7], 0 }
   0x2   :  { %13 = vsyncpa [#allocation10], 0 }
   0x3   :  { %14 = vsyncpa [#allocation5], 0  ;;  %s5440_s21 = smov [#allocation6]   ;;  %s5322_s25 = scalar_lea.hbm %s6671_s1, 8192 }
   0x4   :  { %s30_s22 = sshll.u32 %s5440_s21, 4  ;;  %p5323_p0 = scmp.ne.s32.totalorder %s6671_s1, %s5322_s25  ;;  %s31_s22 = int_to_ptr.vmem [resolvable:$true] %s30_s22 }
   0x5   :  { %p5326_p1 = scmp.lt.u32.totalorder %s5322_s25, %s6671_s1 }
   0x7   :  { %p5328_p2 = pnand %p5326_p1, %p5323_p0 }
   0x9   :  { %5331 = shalt.err (!%p5328_p2)
}
   0xa   :  { %s5332_s30 = scalar_lea.vmem %s31_s22, 8192  ;;  %p5337_p4 = scmp.lt.s32.totalorder %s31_s22, %s31_s22 }
   0xb   :  { %p5333_p3 = scmp.ne.s32.totalorder %s31_s22, %s5332_s30  ;;  %p5338_p5 = scmp.lt.s32.totalorder %s5332_s30, %s5332_s30 }
   0xd   :  { %p5339_p6 = por %p5338_p5, %p5337_p4 }
   0xf   :  { %p5340_p7 = pnand %p5339_p6, %p5333_p3 }
  0x11   :  { %5343 = shalt.err (!%p5340_p7)
}
  0x12   :  { %s5441_s7 = smov 512   ;;  %s5442_s8 = smov 32  }
  0x13   :  { %36 = dma.hbm_to_vmem [thread:$0]  %s6671_s1, 8192, %s31_s22, [#allocation7], %s5441_s7, %s5441_s7, %s5442_s8  }
  0x14   :  { %s5443_s11 = smov [#allocation3]   ;;  %s5444_s13 = smov [#allocation8]  }
  0x15   :  { %s21_s12 = sshll.u32 %s5443_s11, 4  ;;  %s42_s14 = sshll.u32 %s5444_s13, 4  ;;  %s22_s12 = int_to_ptr.vmem [resolvable:$true] %s21_s12  ;;  %s43_s14 = int_to_ptr.vmem [resolvable:$true] %s42_s14 }
  0x16   :  { %s5344_s17 = scalar_lea.hbm %s6670_s0, 512 }
  0x17   :  { %p5345_p8 = scmp.ne.s32.totalorder %s6670_s0, %s5344_s17  ;;  %p5348_p9 = scmp.lt.u32.totalorder %s5344_s17, %s6670_s0 }
  0x19   :  { %p5350_p10 = pnand %p5348_p9, %p5345_p8 }
  0x1b   :  { %5353 = shalt.err (!%p5350_p10)
}
  0x1c   :  { %s5354_s1 = scalar_lea.vmem %s22_s12, 512  ;;  %p5359_p12 = scmp.lt.s32.totalorder %s22_s12, %s22_s12 }
  0x1d   :  { %p5355_p11 = scmp.ne.s32.totalorder %s22_s12, %s5354_s1  ;;  %p5360_p13 = scmp.lt.s32.totalorder %s5354_s1, %s5354_s1 }
  0x1f   :  { %p5361_p0 = por %p5360_p13, %p5359_p12 }
  0x21   :  { %p5362_p1 = pnand %p5361_p0, %p5355_p11 }
  0x23   :  { %5365 = shalt.err (!%p5362_p1)
}
  0x24   :  { %24 = dma.hbm_to_vmem [thread:$0]  %s6670_s0, 512, %s22_s12, [#allocation4]  }
  0x25   :  { %s5366_s26 = scalar_lea.hbm %s6672_s2, 16384 }
  0x26   :  { %p5367_p2 = scmp.ne.s32.totalorder %s6672_s2, %s5366_s26  ;;  %p5370_p3 = scmp.lt.u32.totalorder %s5366_s26, %s6672_s2 }
  0x28   :  { %p5372_p4 = pnand %p5370_p3, %p5367_p2 }
  0x2a   :  { %5375 = shalt.err (!%p5372_p4)
}
  0x2b   :  { %s5376_s9 = scalar_lea.vmem %s43_s14, 16384  ;;  %p5381_p6 = scmp.lt.s32.totalorder %s43_s14, %s43_s14 }
  0x2c   :  { %p5377_p5 = scmp.ne.s32.totalorder %s43_s14, %s5376_s9  ;;  %p5382_p7 = scmp.lt.s32.totalorder %s5376_s9, %s5376_s9 }
  0x2e   :  { %p5383_p8 = por %p5382_p7, %p5381_p6 }
  0x30   :  { %p5384_p9 = pnand %p5383_p8, %p5377_p5 }
  0x32   :  { %5387 = shalt.err (!%p5384_p9)
}
  0x33   :  { %48 = dma.hbm_to_vmem [thread:$0]  %s6672_s2, 16384, %s43_s14, [#allocation7], %s5441_s7, %s5441_s7, %s5442_s8  }
  0x34   :  { %s5445_s11 = smov [#allocation9]   ;;  %s5388_s16 = scalar_lea.hbm %s6674_s4, 2048 }
  0x35   :  { %s56_s12 = sshll.u32 %s5445_s11, 4  ;;  %p5389_p10 = scmp.ne.s32.totalorder %s6674_s4, %s5388_s16  ;;  %s57_s12 = int_to_ptr.vmem [resolvable:$true] %s56_s12 }
  0x36   :  { %p5392_p11 = scmp.lt.u32.totalorder %s5388_s16, %s6674_s4 }
  0x38   :  { %p5394_p12 = pnand %p5392_p11, %p5389_p10 }
  0x3a   :  { %5397 = shalt.err (!%p5394_p12)
}
  0x3b   :  { %s5398_s21 = scalar_lea.vmem %s57_s12, 2048  ;;  %p5403_p0 = scmp.lt.s32.totalorder %s57_s12, %s57_s12 }
  0x3c   :  { %p5399_p13 = scmp.ne.s32.totalorder %s57_s12, %s5398_s21  ;;  %p5404_p1 = scmp.lt.s32.totalorder %s5398_s21, %s5398_s21 }
  0x3e   :  { %p5405_p2 = por %p5404_p1, %p5403_p0 }
  0x40   :  { %p5406_p3 = pnand %p5405_p2, %p5399_p13 }
  0x42   :  { %5409 = shalt.err (!%p5406_p3)
}
  0x43   :  { %s5446_s2 = smov 128   ;;  %s5447_s7 = smov 8  }
  0x44   :  { %62 = dma.hbm_to_vmem [thread:$0]  %s6674_s4, 2048, %s57_s12, [#allocation10], %s5446_s2, %s5446_s2, %s5447_s7  }
  0x45   :  { %5432 = dma.done.wait [#allocation4], 512  }
  0x46   :  { %5433 = vsyncadd [#allocation4], 4294966784 }
  0x47   :  { %5434 = dma.done.wait [#allocation7], 24576  }
  0x48   :  { %5435 = vsyncadd [#allocation7], 4294942720 }
  0x49   :  { %5436 = dma.done.wait [#allocation10], 2048  }
  0x4a   :  { %5437 = vsyncadd [#allocation10], 4294965248  ;;  %v6677_v0 = vmov 0.0   ;;  %v78_v1 = vld [vmem:[#allocation6 + $0x8] sm:$0xff]  ;;  %v80_v3 = vld [vmem:[#allocation6 + $0x18] sm:$0xff]  ;;  %vm5451_vm0 = vmmov 0  }
  0x4b   :  { %335 = vmatprep.mubr.f32.mxu0 %v6677_v0  ;;  %406 = vmatprep.mubr.f32.mxu1 %v6677_v0  ;;  %v82_v2 = vld [vmem:[#allocation6 + $0x28] sm:$0xff]  ;;  %v84_v5 = vld [vmem:[#allocation6 + $0x38] sm:$0xff]  ;;  %v77_v6 = vld [vmem:[#allocation6] sm:$0xff]  ;;  %s5452_s23 = smov [#allocation11]  }
  0x4c   :  { %v5544_v4 = vpack.c.bf16 %v82_v2, %v78_v1  ;;  %v81_v7 = vld [vmem:[#allocation6 + $0x20] sm:$0xff]  ;;  %v5546_v8 = vpack.c.bf16 %v84_v5, %v80_v3  ;;  %v79_v10 = vld [vmem:[#allocation6 + $0x10] sm:$0xff]  ;;  %v86_v12 = vld [vmem:[#allocation6 + $0x48] sm:$0xff]  ;;  %s3377_s24 = sshll.u32 %s5452_s23, 4  ;;  %s3378_s24 = int_to_ptr.vmem [resolvable:$true] %s3377_s24 }
  0x4d   :  { %v5548_v9 = vpack.c.bf16 %v81_v7, %v77_v6  ;;  %v83_v11 = vld [vmem:[#allocation6 + $0x30] sm:$0xff]  ;;  %v90_v14 = vld [vmem:[#allocation6 + $0x68] sm:$0xff]  ;;  %v88_v15 = vld [vmem:[#allocation6 + $0x58] sm:$0xff]  ;;  %p5415_p5 = scmp.lt.s32.totalorder %s3378_s24, %s3378_s24 }
  0x4e   :  { %6799 = vst [vmem:[#allocation16_spill] sm:$0xff] %v5544_v4  ;;  %6800 = vst [vmem:[#allocation17_spill] sm:$0xff] %v5546_v8  ;;  %3490 = vmatprep.subr.bf16.mxu0 %v5544_v4  ;;  %v5551_v13 = vpack.c.bf16 %v83_v11, %v79_v10  ;;  %v92_v16 = vld [vmem:[#allocation6 + $0x78] sm:$0xff]  ;;  %3522 = vmatprep.subr.bf16.mxu1 %v5546_v8  ;;  %v5555_v17 = vpack.c.bf16 %v90_v14, %v86_v12  ;;  %v85_v19 = vld [vmem:[#allocation6 + $0x40] sm:$0xff] }
  0x4f   :  { %3492 = vmatpush1.bf16.msra.mxu0 %v5548_v9  ;;  %v5557_v18 = vpack.c.bf16 %v92_v16, %v88_v15  ;;  %v89_v20 = vld [vmem:[#allocation6 + $0x60] sm:$0xff]  ;;  %v87_v21 = vld [vmem:[#allocation6 + $0x50] sm:$0xff]  ;;  %v94_v24 = vld [vmem:[#allocation6 + $0x88] sm:$0xff] }
  0x50   :  { %3524 = vmatpush1.bf16.msra.mxu1 %v5551_v13  ;;  %v5560_v22 = vpack.c.bf16 %v89_v20, %v85_v19  ;;  %v91_v23 = vld [vmem:[#allocation6 + $0x70] sm:$0xff]  ;;  %v98_v25 = vld [vmem:[#allocation6 + $0xa8] sm:$0xff]  ;;  %3494 = vmatprep.subr.bf16.mxu0 %v5555_v17  ;;  %v96_v28 = vld [vmem:[#allocation6 + $0x98] sm:$0xff] }
  0x51   :  { %3526 = vmatprep.subr.bf16.mxu1 %v5557_v18  ;;  %v5564_v26 = vpack.c.bf16 %v91_v23, %v87_v21  ;;  %v5566_v27 = vpack.c.bf16 %v98_v25, %v94_v24  ;;  %v100_v29 = vld [vmem:[#allocation6 + $0xb8] sm:$0xff]  ;;  %v93_v30 = vld [vmem:[#allocation6 + $0x80] sm:$0xff]  ;;  %v95_v33 = vld [vmem:[#allocation6 + $0x90] sm:$0xff] }
  0x52   :  { %v5568_v31 = vpack.c.bf16 %v100_v29, %v96_v28  ;;  %v97_v32 = vld [vmem:[#allocation6 + $0xa0] sm:$0xff]  ;;  %v99_v34 = vld [vmem:[#allocation6 + $0xb0] sm:$0xff]  ;;  %v102_v36 = vld [vmem:[#allocation6 + $0xc8] sm:$0xff] }
  0x53   :  { %3496 = vmatpush1.bf16.msra.mxu0 %v5560_v22  ;;  %v5571_v35 = vpack.c.bf16 %v97_v32, %v93_v30  ;;  %v106_v37 = vld [vmem:[#allocation6 + $0xe8] sm:$0xff]  ;;  %v104_v38 = vld [vmem:[#allocation6 + $0xd8] sm:$0xff]  ;;  %v5575_v39 = vpack.c.bf16 %v99_v34, %v95_v33  ;;  %v101_v42 = vld [vmem:[#allocation6 + $0xc0] sm:$0xff] }
  0x54   :  { %3528 = vmatpush1.bf16.msra.mxu1 %v5564_v26  ;;  %3498 = vmatprep.subr.bf16.mxu0 %v5566_v27  ;;  %v5577_v40 = vpack.c.bf16 %v106_v37, %v102_v36  ;;  %v108_v41 = vld [vmem:[#allocation6 + $0xf8] sm:$0xff]  ;;  %v105_v43 = vld [vmem:[#allocation6 + $0xe0] sm:$0xff]  ;;  %v103_v45 = vld [vmem:[#allocation6 + $0xd0] sm:$0xff] }
  0x55   :  { %3530 = vmatprep.subr.bf16.mxu1 %v5568_v31  ;;  %v5580_v44 = vpack.c.bf16 %v108_v41, %v104_v38  ;;  %v107_v46 = vld [vmem:[#allocation6 + $0xf0] sm:$0xff]  ;;  %v110_v47 = vld [vmem:[#allocation6 + $0x108] sm:$0xff]  ;;  %v112_v49 = vld [vmem:[#allocation6 + $0x118] sm:$0xff]  ;;  %v5583_v51 = vpack.c.bf16 %v105_v43, %v101_v42 }
  0x56   :  { %v114_v48 = vld [vmem:[#allocation6 + $0x128] sm:$0xff]  ;;  %v116_v50 = vld [vmem:[#allocation6 + $0x138] sm:$0xff]  ;;  %v5587_v52 = vpack.c.bf16 %v107_v46, %v103_v45  ;;  %v109_v54 = vld [vmem:[#allocation6 + $0x100] sm:$0xff] }
  0x57   :  { %3500 = vmatpush1.bf16.msra.mxu0 %v5571_v35  ;;  %v5589_v53 = vpack.c.bf16 %v114_v48, %v110_v47  ;;  %v113_v55 = vld [vmem:[#allocation6 + $0x120] sm:$0xff]  ;;  %v111_v56 = vld [vmem:[#allocation6 + $0x110] sm:$0xff]  ;;  %v5592_v57 = vpack.c.bf16 %v116_v50, %v112_v49  ;;  %v118_v59 = vld [vmem:[#allocation6 + $0x148] sm:$0xff] }
  0x58   :  { %3532 = vmatpush1.bf16.msra.mxu1 %v5575_v39  ;;  %3502 = vmatprep.subr.bf16.mxu0 %v5577_v40  ;;  %v115_v58 = vld [vmem:[#allocation6 + $0x130] sm:$0xff]  ;;  %v122_v60 = vld [vmem:[#allocation6 + $0x168] sm:$0xff]  ;;  %v120_v61 = vld [vmem:[#allocation6 + $0x158] sm:$0xff]  ;;  %v5595_v63 = vpack.c.bf16 %v113_v55, %v109_v54 }
  0x59   :  { %3534 = vmatprep.subr.bf16.mxu1 %v5580_v44  ;;  %v124_v62 = vld [vmem:[#allocation6 + $0x178] sm:$0xff]  ;;  %v5599_v1 = vpack.c.bf16 %v115_v58, %v111_v56  ;;  %v5601_v2 = vpack.c.bf16 %v122_v60, %v118_v59  ;;  %v117_v3 = vld [vmem:[#allocation6 + $0x140] sm:$0xff]  ;;  %v119_v6 = vld [vmem:[#allocation6 + $0x150] sm:$0xff] }
  0x5a   :  { %v121_v5 = vld [vmem:[#allocation6 + $0x160] sm:$0xff]  ;;  %v5604_v7 = vpack.c.bf16 %v124_v62, %v120_v61  ;;  %v123_v10 = vld [vmem:[#allocation6 + $0x170] sm:$0xff]  ;;  %v126_v11 = vld [vmem:[#allocation6 + $0x188] sm:$0xff] }
  0x5b   :  { %3504 = vmatpush1.bf16.msra.mxu0 %v5583_v51  ;;  %v130_v12 = vld [vmem:[#allocation6 + $0x1a8] sm:$0xff]  ;;  %v128_v14 = vld [vmem:[#allocation6 + $0x198] sm:$0xff]  ;;  %v5607_v16 = vpack.c.bf16 %v121_v5, %v117_v3  ;;  %v5611_v19 = vpack.c.bf16 %v123_v10, %v119_v6  ;;  %v125_v21 = vld [vmem:[#allocation6 + $0x180] sm:$0xff] }
  0x5c   :  { %3536 = vmatpush1.bf16.msra.mxu1 %v5587_v52  ;;  %3506 = vmatprep.subr.bf16.mxu0 %v5589_v53  ;;  %v132_v15 = vld [vmem:[#allocation6 + $0x1b8] sm:$0xff]  ;;  %v5613_v20 = vpack.c.bf16 %v130_v12, %v126_v11  ;;  %v129_v23 = vld [vmem:[#allocation6 + $0x1a0] sm:$0xff]  ;;  %v127_v24 = vld [vmem:[#allocation6 + $0x190] sm:$0xff] }
  0x5d   :  { %3538 = vmatprep.subr.bf16.mxu1 %v5592_v57  ;;  %v5616_v25 = vpack.c.bf16 %v132_v15, %v128_v14  ;;  %v131_v28 = vld [vmem:[#allocation6 + $0x1b0] sm:$0xff]  ;;  %v134_v29 = vld [vmem:[#allocation6 + $0x1c8] sm:$0xff]  ;;  %v136_v32 = vld [vmem:[#allocation6 + $0x1d8] sm:$0xff]  ;;  %v5619_v34 = vpack.c.bf16 %v129_v23, %v125_v21 }
  0x5e   :  { %v138_v30 = vld [vmem:[#allocation6 + $0x1e8] sm:$0xff]  ;;  %v140_v33 = vld [vmem:[#allocation6 + $0x1f8] sm:$0xff]  ;;  %v5623_v36 = vpack.c.bf16 %v131_v28, %v127_v24  ;;  %v133_v38 = vld [vmem:[#allocation6 + $0x1c0] sm:$0xff] }
  0x5f   :  { %3508 = vmatpush1.bf16.msra.mxu0 %v5595_v63  ;;  %v5625_v37 = vpack.c.bf16 %v138_v30, %v134_v29  ;;  %v137_v41 = vld [vmem:[#allocation6 + $0x1e0] sm:$0xff]  ;;  %v135_v42 = vld [vmem:[#allocation6 + $0x1d0] sm:$0xff]  ;;  %v5628_v43 = vpack.c.bf16 %v140_v33, %v136_v32  ;;  %v142_v46 = vld [vmem:[#allocation8 + $0x8] sm:$0xff] }
  0x60   :  { %3540 = vmatpush1.bf16.msra.mxu1 %v5599_v1  ;;  %3510 = vmatprep.subr.bf16.mxu0 %v5601_v2  ;;  %v139_v45 = vld [vmem:[#allocation6 + $0x1f0] sm:$0xff]  ;;  %v146_v47 = vld [vmem:[#allocation8 + $0x28] sm:$0xff]  ;;  %v144_v48 = vld [vmem:[#allocation8 + $0x18] sm:$0xff]  ;;  %v5631_v50 = vpack.c.bf16 %v137_v41, %v133_v38 }
  0x61   :  { %3542 = vmatprep.subr.bf16.mxu1 %v5604_v7  ;;  %v148_v49 = vld [vmem:[#allocation8 + $0x38] sm:$0xff]  ;;  %v5635_v54 = vpack.c.bf16 %v139_v45, %v135_v42  ;;  %v5637_v55 = vpack.c.bf16 %v146_v47, %v142_v46  ;;  %v141_v56 = vld [vmem:[#allocation8] sm:$0xff]  ;;  %v143_v59 = vld [vmem:[#allocation8 + $0x10] sm:$0xff] }
  0x62   :  { %v145_v58 = vld [vmem:[#allocation8 + $0x20] sm:$0xff]  ;;  %v5640_v60 = vpack.c.bf16 %v148_v49, %v144_v48  ;;  %v147_v61 = vld [vmem:[#allocation8 + $0x30] sm:$0xff]  ;;  %v150_v62 = vld [vmem:[#allocation8 + $0x48] sm:$0xff] }
  0x63   :  { %3512 = vmatpush1.bf16.msra.mxu0 %v5607_v16  ;;  %v154_v3 = vld [vmem:[#allocation8 + $0x68] sm:$0xff]  ;;  %v152_v5 = vld [vmem:[#allocation8 + $0x58] sm:$0xff]  ;;  %v5643_v10 = vpack.c.bf16 %v145_v58, %v141_v56  ;;  %v5647_v11 = vpack.c.bf16 %v147_v61, %v143_v59  ;;  %v149_v14 = vld [vmem:[#allocation8 + $0x40] sm:$0xff] }
  0x64   :  { %3544 = vmatpush1.bf16.msra.mxu1 %v5611_v19  ;;  %3514 = vmatprep.subr.bf16.mxu0 %v5613_v20  ;;  %v156_v6 = vld [vmem:[#allocation8 + $0x78] sm:$0xff]  ;;  %v5649_v12 = vpack.c.bf16 %v154_v3, %v150_v62  ;;  %v153_v15 = vld [vmem:[#allocation8 + $0x60] sm:$0xff]  ;;  %v151_v23 = vld [vmem:[#allocation8 + $0x50] sm:$0xff] }
  0x65   :  { %3546 = vmatprep.subr.bf16.mxu1 %v5616_v25  ;;  %v5652_v21 = vpack.c.bf16 %v156_v6, %v152_v5  ;;  %v155_v24 = vld [vmem:[#allocation8 + $0x70] sm:$0xff]  ;;  %v5657_v28 = vpack.c.bf16 %v153_v15, %v149_v14  ;;  %v158_v30 = vld [vmem:[#allocation8 + $0x88] sm:$0xff]  ;;  %v160_v33 = vld [vmem:[#allocation8 + $0x98] sm:$0xff] }
  0x66   :  { %v5661_v29 = vpack.c.bf16 %v155_v24, %v151_v23  ;;  %v162_v32 = vld [vmem:[#allocation8 + $0xa8] sm:$0xff]  ;;  %v164_v41 = vld [vmem:[#allocation8 + $0xb8] sm:$0xff]  ;;  %v157_v45 = vld [vmem:[#allocation8 + $0x80] sm:$0xff] }
  0x67   :  { %3516 = vmatpush1.bf16.msra.mxu0 %v5619_v34  ;;  %v5668_v38 = vpack.c.bf16 %v162_v32, %v158_v30  ;;  %v5670_v42 = vpack.c.bf16 %v164_v41, %v160_v33  ;;  %v161_v46 = vld [vmem:[#allocation8 + $0xa0] sm:$0xff]  ;;  %v159_v47 = vld [vmem:[#allocation8 + $0x90] sm:$0xff]  ;;  %v166_v58 = vld [vmem:[#allocation8 + $0xc8] sm:$0xff] }
  0x68   :  { %3548 = vmatpush1.bf16.msra.mxu1 %v5623_v36  ;;  %3518 = vmatprep.subr.bf16.mxu0 %v5625_v37  ;;  %v5673_v48 = vpack.c.bf16 %v161_v46, %v157_v45  ;;  %v163_v49 = vld [vmem:[#allocation8 + $0xb0] sm:$0xff]  ;;  %v170_v59 = vld [vmem:[#allocation8 + $0xe8] sm:$0xff]  ;;  %v168_v61 = vld [vmem:[#allocation8 + $0xd8] sm:$0xff] }
  0x69   :  { %3550 = vmatprep.subr.bf16.mxu1 %v5628_v43  ;;  %v5676_v56 = vpack.c.bf16 %v163_v49, %v159_v47  ;;  %v5680_v62 = vpack.c.bf16 %v170_v59, %v166_v58  ;;  %v172_v3 = vld [vmem:[#allocation8 + $0xf8] sm:$0xff]  ;;  %v165_v5 = vld [vmem:[#allocation8 + $0xc0] sm:$0xff]  ;;  %v167_v15 = vld [vmem:[#allocation8 + $0xd0] sm:$0xff] }
  0x6a   :  { %6801 = vst [vmem:[#allocation18_spill] sm:$0xff] %v5673_v48  ;;  %v5682_v6 = vpack.c.bf16 %v172_v3, %v168_v61  ;;  %v169_v14 = vld [vmem:[#allocation8 + $0xe0] sm:$0xff]  ;;  %v171_v23 = vld [vmem:[#allocation8 + $0xf0] sm:$0xff]  ;;  %v174_v32 = vld [vmem:[#allocation8 + $0x108] sm:$0xff] }
  0x6b   :  { %3520 = vmatpush1.bf16.msra.mxu0 %v5631_v50  ;;  %6802 = vst [vmem:[#allocation19_spill] sm:$0xff] %v5676_v56  ;;  %6803 = vst [vmem:[#allocation20_spill] sm:$0xff] %v5680_v62  ;;  %v5685_v24 = vpack.c.bf16 %v169_v14, %v165_v5  ;;  %v5687_v30 = vpack.c.bf16 %v171_v23, %v167_v15  ;;  %v178_v33 = vld [vmem:[#allocation8 + $0x128] sm:$0xff]  ;;  %v176_v41 = vld [vmem:[#allocation8 + $0x118] sm:$0xff] }
  0x6c   :  { %3552 = vmatpush1.bf16.msra.mxu1 %v5635_v54  ;;  %3554 = vmatprep.subr.bf16.mxu0 %v5637_v55  ;;  %6804 = vst [vmem:[#allocation21_spill] sm:$0xff] %v5682_v6  ;;  %v5692_v45 = vpack.c.bf16 %v178_v33, %v174_v32  ;;  %v180_v46 = vld [vmem:[#allocation8 + $0x138] sm:$0xff]  ;;  %v173_v47 = vld [vmem:[#allocation8 + $0x100] sm:$0xff]  ;;  %v175_v61 = vld [vmem:[#allocation8 + $0x110] sm:$0xff] }
  0x6d   :  { %3618 = vmatprep.subr.bf16.mxu1 %v5640_v60  ;;  %6805 = vst [vmem:[#allocation22_spill] sm:$0xff] %v5685_v24  ;;  %6806 = vst [vmem:[#allocation23_spill] sm:$0xff] %v5687_v30  ;;  %v177_v49 = vld [vmem:[#allocation8 + $0x120] sm:$0xff]  ;;  %v5694_v58 = vpack.c.bf16 %v180_v46, %v176_v41  ;;  %v179_v3 = vld [vmem:[#allocation8 + $0x130] sm:$0xff] }
  0x6e   :  { %336 = vmatmul.mubr.f32.vlgmr.msra.gmra.mrb[0].mxu0 %v6677_v0  ;;  %6807 = vst [vmem:[#allocation24_spill] sm:$0xff] %v5692_v45  ;;  %v5696_v59 = vpack.c.bf16 %v177_v49, %v173_v47  ;;  %v5699_v5 = vpack.c.bf16 %v179_v3, %v175_v61  ;;  %v182_v14 = vld [vmem:[#allocation8 + $0x148] sm:$0xff]  ;;  %v184_v23 = vld [vmem:[#allocation8 + $0x158] sm:$0xff]  ;;  %v181_v41 = vld [vmem:[#allocation8 + $0x140] sm:$0xff] }
  0x6f   :  { %407 = vmatmul.mubr.f32.vlgmr.msra.gmra.mrb[0].mxu1 %v6677_v0  ;;  %3556 = vmatpush1.bf16.msra.mxu0 %v5643_v10  ;;  %6808 = vst [vmem:[#allocation25_spill] sm:$0xff] %v5694_v58  ;;  %v186_v15 = vld [vmem:[#allocation8 + $0x168] sm:$0xff]  ;;  %v188_v33 = vld [vmem:[#allocation8 + $0x178] sm:$0xff]  ;;  %v185_v46 = vld [vmem:[#allocation8 + $0x160] sm:$0xff] }
  0x70   :  { %3620 = vmatpush1.bf16.msra.mxu1 %v5647_v11  ;;  %3558 = vmatprep.subr.bf16.mxu0 %v5649_v12  ;;  %6809 = vst [vmem:[#allocation26_spill] sm:$0xff] %v5696_v59  ;;  %6810 = vst [vmem:[#allocation27_spill] sm:$0xff] %v5699_v5  ;;  %v5704_v32 = vpack.c.bf16 %v186_v15, %v182_v14  ;;  %v5706_v47 = vpack.c.bf16 %v188_v33, %v184_v23  ;;  %v183_v61 = vld [vmem:[#allocation8 + $0x150] sm:$0xff]  ;;  %v196_v15 = vld [vmem:[#allocation8 + $0x1b8] sm:$0xff] }
  0x71   :  { %3622 = vmatprep.subr.bf16.mxu1 %v5652_v21  ;;  %559 = vmatprep.mubr.f32.mxu0 %v6677_v0  ;;  %v5708_v49 = vpack.c.bf16 %v185_v46, %v181_v41  ;;  %v187_v3 = vld [vmem:[#allocation8 + $0x170] sm:$0xff]  ;;  %v189_v23 = vld [vmem:[#allocation8 + $0x180] sm:$0xff] }
  0x72   :  { %630 = vmatprep.mubr.f32.mxu1 %v6677_v0  ;;  %6811 = vst [vmem:[#allocation28_spill] sm:$0xff] %v5704_v32  ;;  %6812 = vst [vmem:[#allocation29_spill] sm:$0xff] %v5706_v47  ;;  %v5711_v0 = vpack.c.bf16 %v187_v3, %v183_v61  ;;  %v193_v33 = vld [vmem:[#allocation8 + $0x1a0] sm:$0xff]  ;;  %v191_v61 = vld [vmem:[#allocation8 + $0x190] sm:$0xff] }
  0x73   :  { %3560 = vmatpush1.bf16.msra.mxu0 %v5657_v28  ;;  %6813 = vst [vmem:[#allocation30_spill] sm:$0xff] %v5708_v49  ;;  %v5720_v46 = vpack.c.bf16 %v193_v33, %v189_v23  ;;  %v195_v3 = vld [vmem:[#allocation8 + $0x1b0] sm:$0xff] }
  0x74   :  { %3624 = vmatpush1.bf16.msra.mxu1 %v5661_v29  ;;  %3562 = vmatprep.subr.bf16.mxu0 %v5668_v38  ;;  %6814 = vst [vmem:[#allocation31_spill] sm:$0xff] %v5711_v0 }
  0x75   :  { %3626 = vmatprep.subr.bf16.mxu1 %v5670_v42  ;;  %6817 = vst [vmem:[#allocation34_spill] sm:$0xff] %v5720_v46 }
  0x77   :  { %3564 = vmatpush1.bf16.msra.mxu0 %v5673_v48  ;;  %v256_v48 = vld [vmem:[#allocation8 + $0x398] sm:$0xff] }
  0x78   :  { %3628 = vmatpush1.bf16.msra.mxu1 %v5676_v56  ;;  %3566 = vmatprep.subr.bf16.mxu0 %v5680_v62  ;;  %v246_v62 = vld [vmem:[#allocation8 + $0x348] sm:$0xff] }
  0x79   :  { %3630 = vmatprep.subr.bf16.mxu1 %v5682_v6  ;;  %v239_v6 = vld [vmem:[#allocation8 + $0x310] sm:$0xff]  ;;  %v254_v56 = vld [vmem:[#allocation8 + $0x388] sm:$0xff] }
  0x7b   :  { %3568 = vmatpush1.bf16.msra.mxu0 %v5685_v24  ;;  %v242_v24 = vld [vmem:[#allocation8 + $0x328] sm:$0xff] }
  0x7c   :  { %3632 = vmatpush1.bf16.msra.mxu1 %v5687_v30  ;;  %3570 = vmatprep.subr.bf16.mxu0 %v5692_v45  ;;  %v226_v45 = vld [vmem:[#allocation8 + $0x2a8] sm:$0xff]  ;;  %v225_v30 = vld [vmem:[#allocation8 + $0x2a0] sm:$0xff] }
  0x7d   :  { %3634 = vmatprep.subr.bf16.mxu1 %v5694_v58  ;;  %v194_v58 = vld [vmem:[#allocation8 + $0x1a8] sm:$0xff] }
  0x7f   :  { %3572 = vmatpush1.bf16.msra.mxu0 %v5696_v59  ;;  %v190_v59 = vld [vmem:[#allocation8 + $0x188] sm:$0xff] }
  0x80   :  { %3636 = vmatpush1.bf16.msra.mxu1 %v5699_v5  ;;  %3574 = vmatprep.subr.bf16.mxu0 %v5704_v32  ;;  %v192_v5 = vld [vmem:[#allocation8 + $0x198] sm:$0xff]  ;;  %v5716_v14 = vpack.c.bf16 %v194_v58, %v190_v59  ;;  %v202_v32 = vld [vmem:[#allocation8 + $0x1e8] sm:$0xff] }
  0x81   :  { %3638 = vmatprep.subr.bf16.mxu1 %v5706_v47  ;;  %v5718_v41 = vpack.c.bf16 %v196_v15, %v192_v5  ;;  %v5723_v47 = vpack.c.bf16 %v195_v3, %v191_v61  ;;  %v204_v59 = vld [vmem:[#allocation8 + $0x1f8] sm:$0xff]  ;;  %v197_v5 = vld [vmem:[#allocation8 + $0x1c0] sm:$0xff]  ;;  %v199_v61 = vld [vmem:[#allocation8 + $0x1d0] sm:$0xff] }
  0x82   :  { %6815 = vst [vmem:[#allocation32_spill] sm:$0xff] %v5716_v14  ;;  %v201_v15 = vld [vmem:[#allocation8 + $0x1e0] sm:$0xff]  ;;  %v203_v3 = vld [vmem:[#allocation8 + $0x1f0] sm:$0xff] }
  0x83   :  { %3576 = vmatpush1.bf16.msra.mxu0 %v5708_v49  ;;  %6816 = vst [vmem:[#allocation33_spill] sm:$0xff] %v5718_v41  ;;  %6818 = vst [vmem:[#allocation35_spill] sm:$0xff] %v5723_v47  ;;  %v198_v49 = vld [vmem:[#allocation8 + $0x1c8] sm:$0xff]  ;;  %v5732_v33 = vpack.c.bf16 %v201_v15, %v197_v5 }
  0x84   :  { %3640 = vmatpush1.bf16.msra.mxu1 %v5711_v0  ;;  %3578 = vmatprep.subr.bf16.mxu0 %v5716_v14  ;;  %v200_v0 = vld [vmem:[#allocation8 + $0x1d8] sm:$0xff]  ;;  %v5728_v58 = vpack.c.bf16 %v202_v32, %v198_v49  ;;  %v210_v14 = vld [vmem:[#allocation8 + $0x228] sm:$0xff]  ;;  %v205_v49 = vld [vmem:[#allocation8 + $0x200] sm:$0xff] }
  0x85   :  { %3642 = vmatprep.subr.bf16.mxu1 %v5718_v41  ;;  %v5730_v23 = vpack.c.bf16 %v204_v59, %v200_v0  ;;  %6821 = vst [vmem:[#allocation38_spill] sm:$0xff] %v5732_v33  ;;  %v5735_v41 = vpack.c.bf16 %v203_v3, %v199_v61  ;;  %v212_v0 = vld [vmem:[#allocation8 + $0x238] sm:$0xff]  ;;  %v209_v59 = vld [vmem:[#allocation8 + $0x220] sm:$0xff]  ;;  %v207_v61 = vld [vmem:[#allocation8 + $0x210] sm:$0xff] }
  0x86   :  { %6819 = vst [vmem:[#allocation36_spill] sm:$0xff] %v5728_v58  ;;  %v5744_v15 = vpack.c.bf16 %v209_v59, %v205_v49  ;;  %v211_v3 = vld [vmem:[#allocation8 + $0x230] sm:$0xff] }
  0x87   :  { %3580 = vmatpush1.bf16.msra.mxu0 %v5720_v46  ;;  %6820 = vst [vmem:[#allocation37_spill] sm:$0xff] %v5730_v23  ;;  %6822 = vst [vmem:[#allocation39_spill] sm:$0xff] %v5735_v41  ;;  %v206_v46 = vld [vmem:[#allocation8 + $0x208] sm:$0xff] }
  0x88   :  { %3644 = vmatpush1.bf16.msra.mxu1 %v5723_v47  ;;  %3582 = vmatprep.subr.bf16.mxu0 %v5728_v58  ;;  %v208_v47 = vld [vmem:[#allocation8 + $0x218] sm:$0xff]  ;;  %v5740_v32 = vpack.c.bf16 %v210_v14, %v206_v46  ;;  %6825 = vst [vmem:[#allocation42_spill] sm:$0xff] %v5744_v15  ;;  %v218_v58 = vld [vmem:[#allocation8 + $0x268] sm:$0xff]  ;;  %v213_v46 = vld [vmem:[#allocation8 + $0x240] sm:$0xff] }
  0x89   :  { %3646 = vmatprep.subr.bf16.mxu1 %v5730_v23  ;;  %v5742_v5 = vpack.c.bf16 %v212_v0, %v208_v47  ;;  %v5747_v23 = vpack.c.bf16 %v211_v3, %v207_v61  ;;  %v220_v47 = vld [vmem:[#allocation8 + $0x278] sm:$0xff]  ;;  %v217_v0 = vld [vmem:[#allocation8 + $0x260] sm:$0xff]  ;;  %v215_v61 = vld [vmem:[#allocation8 + $0x250] sm:$0xff] }
  0x8a   :  { %6823 = vst [vmem:[#allocation40_spill] sm:$0xff] %v5740_v32  ;;  %v5756_v59 = vpack.c.bf16 %v217_v0, %v213_v46  ;;  %v219_v3 = vld [vmem:[#allocation8 + $0x270] sm:$0xff] }
  0x8b   :  { %3584 = vmatpush1.bf16.msra.mxu0 %v5732_v33  ;;  %6824 = vst [vmem:[#allocation41_spill] sm:$0xff] %v5742_v5  ;;  %6826 = vst [vmem:[#allocation43_spill] sm:$0xff] %v5747_v23  ;;  %v214_v33 = vld [vmem:[#allocation8 + $0x248] sm:$0xff]  ;;  %v223_v46 = vld [vmem:[#allocation8 + $0x290] sm:$0xff] }
  0x8c   :  { %3648 = vmatpush1.bf16.msra.mxu1 %v5735_v41  ;;  %3586 = vmatprep.subr.bf16.mxu0 %v5740_v32  ;;  %v216_v41 = vld [vmem:[#allocation8 + $0x258] sm:$0xff]  ;;  %v5752_v14 = vpack.c.bf16 %v218_v58, %v214_v33  ;;  %6829 = vst [vmem:[#allocation46_spill] sm:$0xff] %v5756_v59  ;;  %v222_v32 = vld [vmem:[#allocation8 + $0x288] sm:$0xff]  ;;  %v227_v0 = vld [vmem:[#allocation8 + $0x2b0] sm:$0xff] }
  0x8d   :  { %3650 = vmatprep.subr.bf16.mxu1 %v5742_v5  ;;  %v5754_v49 = vpack.c.bf16 %v220_v47, %v216_v41  ;;  %v5759_v5 = vpack.c.bf16 %v219_v3, %v215_v61  ;;  %v5762_v58 = vpack.c.bf16 %v226_v45, %v222_v32  ;;  %v228_v33 = vld [vmem:[#allocation8 + $0x2b8] sm:$0xff]  ;;  %v230_v61 = vld [vmem:[#allocation8 + $0x2c8] sm:$0xff]  ;;  %v5771_v3 = vpack.c.bf16 %v227_v0, %v223_v46 }
  0x8e   :  { %6827 = vst [vmem:[#allocation44_spill] sm:$0xff] %v5752_v14  ;;  %v234_v45 = vld [vmem:[#allocation8 + $0x2e8] sm:$0xff]  ;;  %v232_v32 = vld [vmem:[#allocation8 + $0x2d8] sm:$0xff] }
  0x8f   :  { %3588 = vmatpush1.bf16.msra.mxu0 %v5744_v15  ;;  %6828 = vst [vmem:[#allocation45_spill] sm:$0xff] %v5754_v49  ;;  %6830 = vst [vmem:[#allocation47_spill] sm:$0xff] %v5759_v5  ;;  %v224_v15 = vld [vmem:[#allocation8 + $0x298] sm:$0xff] }
  0x90   :  { %3652 = vmatpush1.bf16.msra.mxu1 %v5747_v23  ;;  %3590 = vmatprep.subr.bf16.mxu0 %v5752_v14  ;;  %6831 = vst [vmem:[#allocation48_spill] sm:$0xff] %v5762_v58  ;;  %v221_v23 = vld [vmem:[#allocation8 + $0x280] sm:$0xff]  ;;  %v5766_v41 = vpack.c.bf16 %v228_v33, %v224_v15  ;;  %6834 = vst [vmem:[#allocation51_spill] sm:$0xff] %v5771_v3  ;;  %v5774_v14 = vpack.c.bf16 %v234_v45, %v230_v61 }
  0x91   :  { %3654 = vmatprep.subr.bf16.mxu1 %v5754_v49  ;;  %v5768_v47 = vpack.c.bf16 %v225_v30, %v221_v23  ;;  %v236_v49 = vld [vmem:[#allocation8 + $0x2f8] sm:$0xff]  ;;  %v229_v15 = vld [vmem:[#allocation8 + $0x2c0] sm:$0xff]  ;;  %v231_v30 = vld [vmem:[#allocation8 + $0x2d0] sm:$0xff] }
  0x92   :  { %6832 = vst [vmem:[#allocation49_spill] sm:$0xff] %v5766_v41  ;;  %6835 = vst [vmem:[#allocation52_spill] sm:$0xff] %v5774_v14  ;;  %v233_v33 = vld [vmem:[#allocation8 + $0x2e0] sm:$0xff]  ;;  %v235_v23 = vld [vmem:[#allocation8 + $0x2f0] sm:$0xff] }
  0x93   :  { %3592 = vmatpush1.bf16.msra.mxu0 %v5756_v59  ;;  %6833 = vst [vmem:[#allocation50_spill] sm:$0xff] %v5768_v47  ;;  %v5776_v59 = vpack.c.bf16 %v236_v49, %v232_v32  ;;  %v5780_v46 = vpack.c.bf16 %v233_v33, %v229_v15  ;;  %v5782_v0 = vpack.c.bf16 %v235_v23, %v231_v30  ;;  %v237_v61 = vld [vmem:[#allocation8 + $0x300] sm:$0xff]  ;;  %v248_v15 = vld [vmem:[#allocation8 + $0x358] sm:$0xff] }
  0x94   :  { %3656 = vmatpush1.bf16.msra.mxu1 %v5759_v5  ;;  %3594 = vmatprep.subr.bf16.mxu0 %v5762_v58  ;;  %v238_v5 = vld [vmem:[#allocation8 + $0x308] sm:$0xff]  ;;  %v240_v58 = vld [vmem:[#allocation8 + $0x318] sm:$0xff]  ;;  %v241_v32 = vld [vmem:[#allocation8 + $0x320] sm:$0xff] }
  0x95   :  { %3658 = vmatprep.subr.bf16.mxu1 %v5766_v41  ;;  %6836 = vst [vmem:[#allocation53_spill] sm:$0xff] %v5776_v59  ;;  %6837 = vst [vmem:[#allocation54_spill] sm:$0xff] %v5780_v46  ;;  %v244_v41 = vld [vmem:[#allocation8 + $0x338] sm:$0xff]  ;;  %v5786_v49 = vpack.c.bf16 %v242_v24, %v238_v5  ;;  %v5792_v30 = vpack.c.bf16 %v241_v32, %v237_v61  ;;  %v249_v24 = vld [vmem:[#allocation8 + $0x360] sm:$0xff] }
  0x96   :  { %6838 = vst [vmem:[#allocation55_spill] sm:$0xff] %v5782_v0  ;;  %v5788_v45 = vpack.c.bf16 %v244_v41, %v240_v58  ;;  %v252_v33 = vld [vmem:[#allocation8 + $0x378] sm:$0xff]  ;;  %v247_v41 = vld [vmem:[#allocation8 + $0x350] sm:$0xff]  ;;  %v253_v61 = vld [vmem:[#allocation8 + $0x380] sm:$0xff] }
  0x97   :  { %3596 = vmatpush1.bf16.msra.mxu0 %v5768_v47  ;;  %6839 = vst [vmem:[#allocation56_spill] sm:$0xff] %v5786_v49  ;;  %v243_v47 = vld [vmem:[#allocation8 + $0x330] sm:$0xff]  ;;  %6841 = vst [vmem:[#allocation58_spill] sm:$0xff] %v5792_v30  ;;  %v5800_v58 = vpack.c.bf16 %v252_v33, %v248_v15  ;;  %v257_v32 = vld [vmem:[#allocation8 + $0x3a0] sm:$0xff] }
  0x98   :  { %3660 = vmatpush1.bf16.msra.mxu1 %v5771_v3  ;;  %3598 = vmatprep.subr.bf16.mxu0 %v5774_v14  ;;  %6840 = vst [vmem:[#allocation57_spill] sm:$0xff] %v5788_v45  ;;  %v250_v3 = vld [vmem:[#allocation8 + $0x368] sm:$0xff]  ;;  %v5794_v23 = vpack.c.bf16 %v243_v47, %v239_v6  ;;  %v251_v14 = vld [vmem:[#allocation8 + $0x370] sm:$0xff] }
  0x99   :  { %3662 = vmatprep.subr.bf16.mxu1 %v5776_v59  ;;  %v245_v59 = vld [vmem:[#allocation8 + $0x340] sm:$0xff]  ;;  %v5798_v5 = vpack.c.bf16 %v250_v3, %v246_v62  ;;  %6844 = vst [vmem:[#allocation61_spill] sm:$0xff] %v5800_v58  ;;  %v5806_v47 = vpack.c.bf16 %v251_v14, %v247_v41  ;;  %v255_v15 = vld [vmem:[#allocation8 + $0x390] sm:$0xff]  ;;  %v5816_v14 = vpack.c.bf16 %v257_v32, %v253_v61 }
  0x9a   :  { %6842 = vst [vmem:[#allocation59_spill] sm:$0xff] %v5794_v23  ;;  %v5804_v6 = vpack.c.bf16 %v249_v24, %v245_v59  ;;  %v259_v33 = vld [vmem:[#allocation8 + $0x3b0] sm:$0xff]  ;;  %v261_v24 = vld [vmem:[#allocation8 + $0x3c0] sm:$0xff] }
  0x9b   :  { %3600 = vmatpush1.bf16.msra.mxu0 %v5780_v46  ;;  %6843 = vst [vmem:[#allocation60_spill] sm:$0xff] %v5798_v5  ;;  %v258_v46 = vld [vmem:[#allocation8 + $0x3a8] sm:$0xff]  ;;  %6846 = vst [vmem:[#allocation63_spill] sm:$0xff] %v5806_v47  ;;  %v5818_v59 = vpack.c.bf16 %v259_v33, %v255_v15  ;;  %v267_v41 = vld [vmem:[#allocation8 + $0x3f0] sm:$0xff] }
  0x9c   :  { %3664 = vmatpush1.bf16.msra.mxu1 %v5782_v0  ;;  %3602 = vmatprep.subr.bf16.mxu0 %v5786_v49  ;;  %v260_v0 = vld [vmem:[#allocation8 + $0x3b8] sm:$0xff]  ;;  %6845 = vst [vmem:[#allocation62_spill] sm:$0xff] %v5804_v6  ;;  %v5810_v62 = vpack.c.bf16 %v258_v46, %v254_v56  ;;  %6849 = vst [vmem:[#allocation66_spill] sm:$0xff] %v5816_v14  ;;  %v265_v46 = vld [vmem:[#allocation8 + $0x3e0] sm:$0xff] }
  0x9d   :  { %3666 = vmatprep.subr.bf16.mxu1 %v5788_v45  ;;  %v5812_v3 = vpack.c.bf16 %v260_v0, %v256_v48  ;;  %v262_v45 = vld [vmem:[#allocation8 + $0x3c8] sm:$0xff]  ;;  %v264_v49 = vld [vmem:[#allocation8 + $0x3d8] sm:$0xff]  ;;  %6850 = vst [vmem:[#allocation67_spill] sm:$0xff] %v5818_v59  ;;  %v263_v0 = vld [vmem:[#allocation8 + $0x3d0] sm:$0xff]  ;;  %v5828_v61 = vpack.c.bf16 %v265_v46, %v261_v24 }
  0x9e   :  { %6847 = vst [vmem:[#allocation64_spill] sm:$0xff] %v5810_v62  ;;  %v5830_v32 = vpack.c.bf16 %v267_v41, %v263_v0 }
  0x9f   :  { %3604 = vmatpush1.bf16.msra.mxu0 %v5792_v30  ;;  %6848 = vst [vmem:[#allocation65_spill] sm:$0xff] %v5812_v3  ;;  %v266_v30 = vld [vmem:[#allocation8 + $0x3e8] sm:$0xff]  ;;  %6853 = vst [vmem:[#allocation70_spill] sm:$0xff] %v5828_v61 }
  0xa0   :  { %3668 = vmatpush1.bf16.msra.mxu1 %v5794_v23  ;;  %3606 = vmatprep.subr.bf16.mxu0 %v5798_v5  ;;  %v268_v23 = vld [vmem:[#allocation8 + $0x3f8] sm:$0xff]  ;;  %v5822_v48 = vpack.c.bf16 %v266_v30, %v262_v45  ;;  %6854 = vst [vmem:[#allocation71_spill] sm:$0xff] %v5830_v32  ;;  %v422_v30 = vlaneseq }
  0xa1   :  { %3670 = vmatprep.subr.bf16.mxu1 %v5800_v58  ;;  %v5824_v56 = vpack.c.bf16 %v268_v23, %v264_v49  ;;  %v5449_v49 = vmov 1966171168  }
  0xa2   :  { %6851 = vst [vmem:[#allocation68_spill] sm:$0xff] %v5822_v48  ;;  %v420_v45 = vunpack.c.l.s4 %v5449_v49  ;;  %v5838_v15 = vshrl.u32 %v422_v30, 7 }
  0xa3   :  { %3608 = vmatpush1.bf16.msra.mxu0 %v5804_v6  ;;  %6852 = vst [vmem:[#allocation69_spill] sm:$0xff] %v5824_v56 }
  0xa4   :  { %3672 = vmatpush1.bf16.msra.mxu1 %v5806_v47  ;;  %3610 = vmatprep.subr.bf16.mxu0 %v5810_v62  ;;  %v421_v23 = vunpack.c.0.s8 %v420_v45  ;;  %6855 = vst [vmem:[#allocation72_spill] sm:$0xff] %v5838_v15 }
  0xa5   :  { %3674 = vmatprep.subr.bf16.mxu1 %v5812_v3 }
  0xa6   :  { %v5841_v24 = vsub.s32 %v421_v23, %v5838_v15 }
  0xa7   :  { %3612 = vmatpush1.bf16.msra.mxu0 %v5816_v14 }
  0xa8   :  { %3676 = vmatpush1.bf16.msra.mxu1 %v5818_v59  ;;  %3614 = vmatprep.subr.bf16.mxu0 %v5822_v48  ;;  %v270_v48 = vld [vmem:[#allocation3] ss:$8 sm:$0xf] }
  0xa9   :  { %3678 = vmatprep.subr.bf16.mxu1 %v5824_v56 }
  0xab   :  { %3616 = vmatpush1.bf16.msra.mxu0 %v5828_v61 }
  0xac   :  { %3680 = vmatpush1.bf16.msra.mxu1 %v5830_v32  ;;  %3682 = vmatprep.subr.bf16.mxu0 %v5544_v4 }
  0xad   :  { %3714 = vmatprep.subr.bf16.mxu1 %v5546_v8 }
 0x141   :  { %v337_v33 = vpop.f32.mrb[0].mxu0 }
 0x142   :  { %v408_v46 = vpop.f32.mrb[0].mxu1  ;;  %v339_v0 = vpop.f32.mrb[1].mxu0 }
 0x143   :  { %v417_v41 = vcombine.low %v337_v33, %v339_v0  ;;  %v410_v61 = vpop.f32.mrb[1].mxu1 }
 0x144   :  { %v418_v56 = vcombine.low %v408_v46, %v410_v61 }
 0x145   :  { %v425_v32 = vrot.slane %v417_v41, %v5841_v24 }
 0x146   :  { %v432_v4 = vrot.slane %v418_v56, %v5841_v24 }
 0x148   :  { %v433_v8 = vcombine.low %v425_v32, %v432_v4 }
 0x14a   :  { %v440_v49 = vrot.slane %v433_v8, %v5841_v24 }
 0x14c   :  { %v442_v45 = vadd.f32 %v440_v49, %v270_v48 }
 0x14e   :  { %v3388_v30 = vmul.f32 -1.442695, %v442_v45  ;;  %v450_v59 = vrot.slane %v442_v45, 1  ;;  %v461_v23 = vrot.slane %v442_v45, 3  ;;  %v458_v33 = vrot.slane %v442_v45, 2 }
 0x150   :  { %5062 = vpow2.f32 %v3388_v30  ;;  %v3389_v14 = vmul.f32 -1.442695, %v450_v59  ;;  %v3390_v15 = vmul.f32 -1.442695, %v461_v23  ;;  %v6857_v30 = vld [vmem:[#allocation18_spill] sm:$0xff]  ;;  %v6858_v23 = vld [vmem:[#allocation19_spill] sm:$0xff] }
 0x152   :  { %5064 = vpow2.f32 %v3389_v14 }
 0x153   :  { %5066 = vpow2.f32 %v3390_v15  ;;  %v6856_v15 = vmov 0.0  }
 0x15a   :  { %v5063_v3 = vpop.eup %5062 }
 0x15b   :  { %v446_v0 = vadd.f32 1.0, %v5063_v3 }
 0x15c   :  { %v5065_v61 = vpop.eup %5064 }
 0x15d   :  { %5068 = vrcp.f32 %v446_v0  ;;  %v455_v46 = vadd.f32 1.0, %v5065_v61  ;;  %v5067_v4 = vpop.eup %5066  ;;  %v6860_v0 = vld [vmem:[#allocation21_spill] sm:$0xff]  ;;  %v6861_v61 = vld [vmem:[#allocation22_spill] sm:$0xff] }
 0x15e   :  { %5070 = vtanh.f32 %v458_v33  ;;  %v466_v32 = vadd.f32 1.0, %v5067_v4  ;;  %v6859_v33 = vld [vmem:[#allocation20_spill] sm:$0xff] }
 0x15f   :  { %5072 = vrcp.f32 %v455_v46  ;;  %v6862_v46 = vld [vmem:[#allocation23_spill] sm:$0xff]  ;;  %v6863_v4 = vld [vmem:[#allocation24_spill] sm:$0xff] }
 0x160   :  { %5074 = vrcp.f32 %v466_v32  ;;  %v6867_v32 = vld [vmem:[#allocation28_spill] sm:$0xff] }
 0x167   :  { %v5069_v56 = vpop.eup %5068 }
 0x168   :  { %v5071_v8 = vpop.eup %5070 }
 0x169   :  { %v5073_v48 = vpop.eup %5072  ;;  %v470_v49 = vmul.f32 %v5071_v8, %v5069_v56  ;;  %v6864_v56 = vld [vmem:[#allocation25_spill] sm:$0xff]  ;;  %v6865_v8 = vld [vmem:[#allocation26_spill] sm:$0xff] }
 0x16a   :  { %v469_v41 = vmul.f32 0.0, %v5073_v48  ;;  %v5075_v14 = vpop.eup %5074  ;;  %v6866_v48 = vld [vmem:[#allocation27_spill] sm:$0xff] }
 0x16c   :  { %v5846_v59 = vadd.f32 %v470_v49, %v469_v41  ;;  %v6868_v41 = vld [vmem:[#allocation29_spill] sm:$0xff]  ;;  %v6869_v49 = vld [vmem:[#allocation30_spill] sm:$0xff] }
 0x16e   :  { %5076 = vtanh.f32 %v5846_v59 }
 0x178   :  { %v5077_v3 = vpop.eup %5076 }
 0x179   :  { %v473_v45 = vmul.f32 %v5077_v3, %v5075_v14  ;;  %v6870_v14 = vld [vmem:[#allocation31_spill] sm:$0xff]  ;;  %v6871_v3 = vld [vmem:[#allocation32_spill] sm:$0xff] }
 0x17b   :  { %560 = vmatmul.mubr.f32.vlgmr.msra.gmra.mrb[2].mxu0 %v473_v45  ;;  %631 = vmatmul.mubr.f32.vlgmr.msra.gmra.mrb[2].mxu1 %v473_v45 }
 0x17c   :  { %3684 = vmatpush1.bf16.msra.mxu0 %v5548_v9  ;;  %3716 = vmatpush1.bf16.msra.mxu1 %v5551_v13 }
 0x17d   :  { %3686 = vmatprep.subr.bf16.mxu0 %v5555_v17  ;;  %3718 = vmatprep.subr.bf16.mxu1 %v5557_v18 }
 0x17e   :  { %728 = vmatprep.mubr.f32.mxu0 %v6856_v15  ;;  %799 = vmatprep.mubr.f32.mxu1 %v6856_v15 }
 0x180   :  { %3688 = vmatpush1.bf16.msra.mxu0 %v5560_v22  ;;  %3720 = vmatpush1.bf16.msra.mxu1 %v5564_v26 }
 0x181   :  { %3690 = vmatprep.subr.bf16.mxu0 %v5566_v27  ;;  %3722 = vmatprep.subr.bf16.mxu1 %v5568_v31 }
 0x184   :  { %3692 = vmatpush1.bf16.msra.mxu0 %v5571_v35  ;;  %3724 = vmatpush1.bf16.msra.mxu1 %v5575_v39 }
 0x185   :  { %3694 = vmatprep.subr.bf16.mxu0 %v5577_v40  ;;  %3726 = vmatprep.subr.bf16.mxu1 %v5580_v44 }
 0x188   :  { %3696 = vmatpush1.bf16.msra.mxu0 %v5583_v51  ;;  %3728 = vmatpush1.bf16.msra.mxu1 %v5587_v52 }
 0x189   :  { %3698 = vmatprep.subr.bf16.mxu0 %v5589_v53  ;;  %3730 = vmatprep.subr.bf16.mxu1 %v5592_v57 }
 0x18c   :  { %3700 = vmatpush1.bf16.msra.mxu0 %v5595_v63  ;;  %3732 = vmatpush1.bf16.msra.mxu1 %v5599_v1 }
 0x18d   :  { %3702 = vmatprep.subr.bf16.mxu0 %v5601_v2  ;;  %3734 = vmatprep.subr.bf16.mxu1 %v5604_v7 }
 0x190   :  { %3704 = vmatpush1.bf16.msra.mxu0 %v5607_v16  ;;  %3736 = vmatpush1.bf16.msra.mxu1 %v5611_v19 }
 0x191   :  { %3706 = vmatprep.subr.bf16.mxu0 %v5613_v20  ;;  %3738 = vmatprep.subr.bf16.mxu1 %v5616_v25 }
 0x194   :  { %3708 = vmatpush1.bf16.msra.mxu0 %v5619_v34  ;;  %3740 = vmatpush1.bf16.msra.mxu1 %v5623_v36 }
 0x195   :  { %3710 = vmatprep.subr.bf16.mxu0 %v5625_v37  ;;  %3742 = vmatprep.subr.bf16.mxu1 %v5628_v43 }
 0x198   :  { %3712 = vmatpush1.bf16.msra.mxu0 %v5631_v50  ;;  %3744 = vmatpush1.bf16.msra.mxu1 %v5635_v54 }
 0x199   :  { %3746 = vmatprep.subr.bf16.mxu0 %v5637_v55  ;;  %3810 = vmatprep.subr.bf16.mxu1 %v5640_v60 }
 0x19b   :  { %729 = vmatmul.mubr.f32.vlgmr.msra.gmra.mrb[4].mxu0 %v473_v45  ;;  %800 = vmatmul.mubr.f32.vlgmr.msra.gmra.mrb[4].mxu1 %v473_v45  ;;  %v6872_v45 = vld [vmem:[#allocation33_spill] sm:$0xff] }
 0x19c   :  { %3748 = vmatpush1.bf16.msra.mxu0 %v5643_v10  ;;  %3812 = vmatpush1.bf16.msra.mxu1 %v5647_v11 }
 0x19d   :  { %3750 = vmatprep.subr.bf16.mxu0 %v5649_v12  ;;  %3814 = vmatprep.subr.bf16.mxu1 %v5652_v21 }
 0x1a0   :  { %3752 = vmatpush1.bf16.msra.mxu0 %v5657_v28  ;;  %3816 = vmatpush1.bf16.msra.mxu1 %v5661_v29 }
 0x1a1   :  { %3754 = vmatprep.subr.bf16.mxu0 %v5668_v38  ;;  %3818 = vmatprep.subr.bf16.mxu1 %v5670_v42 }
 0x1a4   :  { %3756 = vmatpush1.bf16.msra.mxu0 %v6857_v30  ;;  %3820 = vmatpush1.bf16.msra.mxu1 %v6858_v23 }
 0x1a5   :  { %3758 = vmatprep.subr.bf16.mxu0 %v6859_v33  ;;  %3822 = vmatprep.subr.bf16.mxu1 %v6860_v0 }
 0x1a8   :  { %3760 = vmatpush1.bf16.msra.mxu0 %v6861_v61  ;;  %3824 = vmatpush1.bf16.msra.mxu1 %v6862_v46  ;;  %v6873_v46 = vld [vmem:[#allocation34_spill] sm:$0xff] }
 0x1a9   :  { %3762 = vmatprep.subr.bf16.mxu0 %v6863_v4  ;;  %3826 = vmatprep.subr.bf16.mxu1 %v6864_v56  ;;  %v6874_v4 = vld [vmem:[#allocation35_spill] sm:$0xff]  ;;  %v6875_v56 = vld [vmem:[#allocation36_spill] sm:$0xff] }
 0x1ac   :  { %3764 = vmatpush1.bf16.msra.mxu0 %v6865_v8  ;;  %3828 = vmatpush1.bf16.msra.mxu1 %v6866_v48  ;;  %v6876_v8 = vld [vmem:[#allocation37_spill] sm:$0xff]  ;;  %v6877_v48 = vld [vmem:[#allocation38_spill] sm:$0xff] }
 0x1ad   :  { %3766 = vmatprep.subr.bf16.mxu0 %v6867_v32  ;;  %3830 = vmatprep.subr.bf16.mxu1 %v6868_v41  ;;  %v6878_v32 = vld [vmem:[#allocation39_spill] sm:$0xff]  ;;  %v6879_v41 = vld [vmem:[#allocation40_spill] sm:$0xff] }
 0x1b0   :  { %3768 = vmatpush1.bf16.msra.mxu0 %v6869_v49  ;;  %3832 = vmatpush1.bf16.msra.mxu1 %v6870_v14  ;;  %v6880_v49 = vld [vmem:[#allocation41_spill] sm:$0xff]  ;;  %v6881_v14 = vld [vmem:[#allocation42_spill] sm:$0xff] }
 0x1b1   :  { %3770 = vmatprep.subr.bf16.mxu0 %v6871_v3  ;;  %3834 = vmatprep.subr.bf16.mxu1 %v6872_v45  ;;  %v6882_v3 = vld [vmem:[#allocation43_spill] sm:$0xff]  ;;  %v6883_v45 = vld [vmem:[#allocation44_spill] sm:$0xff] }
 0x1b4   :  { %3772 = vmatpush1.bf16.msra.mxu0 %v6873_v46  ;;  %3836 = vmatpush1.bf16.msra.mxu1 %v6874_v4  ;;  %v6884_v46 = vld [vmem:[#allocation45_spill] sm:$0xff]  ;;  %v6885_v4 = vld [vmem:[#allocation46_spill] sm:$0xff] }
 0x1b5   :  { %3774 = vmatprep.subr.bf16.mxu0 %v6875_v56  ;;  %3838 = vmatprep.subr.bf16.mxu1 %v6876_v8  ;;  %v6886_v56 = vld [vmem:[#allocation47_spill] sm:$0xff]  ;;  %v6887_v8 = vld [vmem:[#allocation48_spill] sm:$0xff] }
 0x1b8   :  { %3776 = vmatpush1.bf16.msra.mxu0 %v6877_v48  ;;  %3840 = vmatpush1.bf16.msra.mxu1 %v6878_v32  ;;  %v6888_v48 = vld [vmem:[#allocation49_spill] sm:$0xff]  ;;  %v6889_v32 = vld [vmem:[#allocation50_spill] sm:$0xff] }
 0x1b9   :  { %3778 = vmatprep.subr.bf16.mxu0 %v6879_v41  ;;  %3842 = vmatprep.subr.bf16.mxu1 %v6880_v49  ;;  %v6890_v41 = vld [vmem:[#allocation51_spill] sm:$0xff]  ;;  %v6891_v49 = vld [vmem:[#allocation52_spill] sm:$0xff] }
 0x1bc   :  { %3780 = vmatpush1.bf16.msra.mxu0 %v6881_v14  ;;  %3844 = vmatpush1.bf16.msra.mxu1 %v6882_v3  ;;  %v6892_v14 = vld [vmem:[#allocation53_spill] sm:$0xff]  ;;  %v6893_v3 = vld [vmem:[#allocation54_spill] sm:$0xff] }
 0x1bd   :  { %3782 = vmatprep.subr.bf16.mxu0 %v6883_v45  ;;  %3846 = vmatprep.subr.bf16.mxu1 %v6884_v46  ;;  %v6894_v45 = vld [vmem:[#allocation55_spill] sm:$0xff]  ;;  %v6895_v46 = vld [vmem:[#allocation56_spill] sm:$0xff] }
 0x1c0   :  { %3784 = vmatpush1.bf16.msra.mxu0 %v6885_v4  ;;  %3848 = vmatpush1.bf16.msra.mxu1 %v6886_v56  ;;  %v6896_v4 = vld [vmem:[#allocation57_spill] sm:$0xff]  ;;  %v6897_v56 = vld [vmem:[#allocation58_spill] sm:$0xff] }
 0x1c1   :  { %3786 = vmatprep.subr.bf16.mxu0 %v6887_v8  ;;  %3850 = vmatprep.subr.bf16.mxu1 %v6888_v48  ;;  %v6898_v8 = vld [vmem:[#allocation59_spill] sm:$0xff] }
 0x1c4   :  { %3788 = vmatpush1.bf16.msra.mxu0 %v6889_v32  ;;  %3852 = vmatpush1.bf16.msra.mxu1 %v6890_v41 }
 0x1c5   :  { %3790 = vmatprep.subr.bf16.mxu0 %v6891_v49  ;;  %3854 = vmatprep.subr.bf16.mxu1 %v6892_v14 }
 0x1c8   :  { %3792 = vmatpush1.bf16.msra.mxu0 %v6893_v3  ;;  %3856 = vmatpush1.bf16.msra.mxu1 %v6894_v45  ;;  %v6899_v3 = vld [vmem:[#allocation65_spill] sm:$0xff]  ;;  %v6900_v45 = vld [vmem:[#allocation66_spill] sm:$0xff] }
 0x1c9   :  { %3794 = vmatprep.subr.bf16.mxu0 %v6895_v46  ;;  %3858 = vmatprep.subr.bf16.mxu1 %v6896_v4  ;;  %v6901_v46 = vld [vmem:[#allocation67_spill] sm:$0xff]  ;;  %v6902_v4 = vld [vmem:[#allocation68_spill] sm:$0xff] }
 0x1cc   :  { %3796 = vmatpush1.bf16.msra.mxu0 %v6897_v56  ;;  %3860 = vmatpush1.bf16.msra.mxu1 %v6898_v8  ;;  %v6903_v56 = vld [vmem:[#allocation69_spill] sm:$0xff]  ;;  %v6904_v8 = vld [vmem:[#allocation70_spill] sm:$0xff] }
 0x1cd   :  { %3798 = vmatprep.subr.bf16.mxu0 %v5798_v5  ;;  %3862 = vmatprep.subr.bf16.mxu1 %v5800_v58  ;;  %v6905_v5 = vld [vmem:[#allocation71_spill] sm:$0xff]  ;;  %v6906_v58 = vld [vmem:[#allocation16_spill] sm:$0xff] }
 0x1d0   :  { %3800 = vmatpush1.bf16.msra.mxu0 %v5804_v6  ;;  %3864 = vmatpush1.bf16.msra.mxu1 %v5806_v47  ;;  %v6907_v6 = vld [vmem:[#allocation17_spill] sm:$0xff]  ;;  %v6908_v47 = vld [vmem:[#allocation72_spill] sm:$0xff] }
 0x1d1   :  { %3802 = vmatprep.subr.bf16.mxu0 %v5810_v62  ;;  %3866 = vmatprep.subr.bf16.mxu1 %v6899_v3  ;;  %v477_v62 = vsub.s32 0, %v6908_v47 }
 0x1d4   :  { %3804 = vmatpush1.bf16.msra.mxu0 %v6900_v45  ;;  %3868 = vmatpush1.bf16.msra.mxu1 %v6901_v46  ;;  %v269_v45 = vld [vmem:[%s6673_s3] sm:$0xf]  ;;  %v481_v46 = vsub.s32 1, %v6908_v47 }
 0x1d5   :  { %3806 = vmatprep.subr.bf16.mxu0 %v6902_v4  ;;  %3870 = vmatprep.subr.bf16.mxu1 %v6903_v56  ;;  %v5952_v3 = vrot.slane %v269_v45, %v477_v62  ;;  %v485_v62 = vsub.s32 2, %v6908_v47 }
 0x1d6   :  { %v5954_v4 = vrot.slane %v269_v45, %v481_v46 }
 0x1d7   :  { %6909 = vst [vmem:[#allocation18_spill] sm:$0xff] %v5952_v3  ;;  %v5963_v61 = vrot.slane %v269_v45, %v485_v62 }
 0x1d8   :  { %3808 = vmatpush1.bf16.msra.mxu0 %v6904_v8  ;;  %3872 = vmatpush1.bf16.msra.mxu1 %v6905_v5  ;;  %v489_v5 = vsub.s32 3, %v6908_v47 }
 0x1d9   :  { %3874 = vmatprep.subr.bf16.mxu0 %v6906_v58  ;;  %3906 = vmatprep.subr.bf16.mxu1 %v6907_v6  ;;  %6911 = vst [vmem:[#allocation73_spill] sm:$0xff] %v5963_v61 }
 0x1da   :  { %v5959_v48 = vrot.slane %v269_v45, %v489_v5 }
 0x1dc   :  { %6910 = vst [vmem:[#allocation72_spill] sm:$0xff] %v5959_v48 }
 0x24e   :  { %v561_v56 = vpop.f32.mrb[2].mxu0  ;;  %v632_v8 = vpop.f32.mrb[2].mxu1 }
 0x24f   :  { %v562_v58 = vadd.f32 %v561_v56, %v5952_v3  ;;  %v563_v14 = vpop.f32.mrb[3].mxu0  ;;  %v634_v6 = vpop.f32.mrb[3].mxu1  ;;  %v633_v33 = vadd.f32 %v632_v8, %v5963_v61 }
 0x250   :  { %v564_v49 = vadd.f32 %v563_v14, %v5954_v4  ;;  %v635_v46 = vadd.f32 %v634_v6, %v5959_v48 }
 0x251   :  { %v3391_v41 = vmul.f32 -1.442695, %v562_v58 }
 0x252   :  { %v3392_v32 = vmul.f32 -1.442695, %v564_v49  ;;  %v3393_v0 = vmul.f32 -1.442695, %v635_v46 }
 0x253   :  { %5078 = vpow2.f32 %v3391_v41 }
 0x254   :  { %5080 = vpow2.f32 %v3392_v32 }
 0x255   :  { %5082 = vpow2.f32 %v3393_v0 }
 0x256   :  { %5084 = vtanh.f32 %v633_v33 }
 0x25d   :  { %v5079_v56 = vpop.eup %5078 }
 0x25e   :  { %v5081_v3 = vpop.eup %5080  ;;  %v640_v23 = vadd.f32 1.0, %v5079_v56 }
 0x25f   :  { %v646_v58 = vadd.f32 1.0, %v5081_v3  ;;  %v5083_v5 = vpop.eup %5082 }
 0x260   :  { %5086 = vrcp.f32 %v640_v23  ;;  %v5085_v41 = vpop.eup %5084  ;;  %v653_v14 = vadd.f32 1.0, %v5083_v5 }
 0x261   :  { %5088 = vrcp.f32 %v646_v58  ;;  %v663_v58 = vld [vmem:[#allocation3 + $0x1] ss:$8 sm:$0xf] }
 0x262   :  { %5090 = vrcp.f32 %v653_v14 }
 0x26a   :  { %v5087_v49 = vpop.eup %5086 }
 0x26b   :  { %v5089_v47 = vpop.eup %5088  ;;  %v657_v32 = vmul.f32 %v5087_v49, %v5085_v41 }
 0x26c   :  { %v656_v6 = vmul.f32 0.0, %v5089_v47  ;;  %v5091_v49 = vpop.eup %5090 }
 0x26e   :  { %v5966_v45 = vadd.f32 %v657_v32, %v656_v6  ;;  %v730_v62 = vpop.f32.mrb[4].mxu0  ;;  %v801_v46 = vpop.f32.mrb[4].mxu1 }
 0x26f   :  { %v732_v8 = vpop.f32.mrb[5].mxu0  ;;  %v803_v61 = vpop.f32.mrb[5].mxu1 }
 0x270   :  { %5092 = vtanh.f32 %v5966_v45  ;;  %v810_v33 = vcombine.low %v730_v62, %v732_v8  ;;  %v811_v0 = vcombine.low %v801_v46, %v803_v61 }
 0x272   :  { %v818_v23 = vrot.slane %v810_v33, %v5841_v24  ;;  %v825_v3 = vrot.slane %v811_v0, %v5841_v24 }
 0x274   :  { %v826_v56 = vcombine.low %v818_v23, %v825_v3 }
 0x276   :  { %v833_v5 = vrot.slane %v826_v56, %v5841_v24 }
 0x278   :  { %v835_v41 = vadd.f32 %v833_v5, %v663_v58 }
 0x27a   :  { %v5093_v47 = vpop.eup %5092  ;;  %v3394_v32 = vmul.f32 -1.442695, %v835_v41  ;;  %v843_v6 = vrot.slane %v835_v41, 1  ;;  %v854_v61 = vrot.slane %v835_v41, 3  ;;  %v851_v8 = vrot.slane %v835_v41, 2 }
 0x27b   :  { %v660_v14 = vmul.f32 %v5093_v47, %v5091_v49 }
 0x27c   :  { %5094 = vpow2.f32 %v3394_v32  ;;  %v3395_v48 = vmul.f32 -1.442695, %v843_v6  ;;  %v3396_v62 = vmul.f32 -1.442695, %v854_v61  ;;  %v6913_v61 = vld [vmem:[#allocation20_spill] sm:$0xff] }
 0x27d   :  { %661 = vst [vmem:[#allocation2] sm:$0x1] %v660_v14  ;;  %931 = vmatprep.mubr.f32.mxu0 %v660_v14  ;;  %1002 = vmatprep.mubr.f32.mxu1 %v660_v14 }
 0x27e   :  { %5096 = vpow2.f32 %v3395_v48 }
 0x27f   :  { %5098 = vpow2.f32 %v3396_v62  ;;  %v6914_v62 = vld [vmem:[#allocation21_spill] sm:$0xff] }
 0x286   :  { %v5095_v46 = vpop.eup %5094 }
 0x287   :  { %v839_v33 = vadd.f32 1.0, %v5095_v46  ;;  %v6915_v46 = vld [vmem:[#allocation22_spill] sm:$0xff] }
 0x288   :  { %v5097_v0 = vpop.eup %5096 }
 0x289   :  { %5100 = vrcp.f32 %v839_v33  ;;  %v848_v23 = vadd.f32 1.0, %v5097_v0  ;;  %v5099_v3 = vpop.eup %5098  ;;  %v6917_v33 = vld [vmem:[#allocation24_spill] sm:$0xff]  ;;  %v6918_v0 = vld [vmem:[#allocation25_spill] sm:$0xff] }
 0x28a   :  { %5102 = vtanh.f32 %v851_v8  ;;  %v859_v49 = vadd.f32 1.0, %v5099_v3  ;;  %v6916_v8 = vld [vmem:[#allocation23_spill] sm:$0xff] }
 0x28b   :  { %5104 = vrcp.f32 %v848_v23  ;;  %v6919_v23 = vld [vmem:[#allocation26_spill] sm:$0xff]  ;;  %v6920_v3 = vld [vmem:[#allocation27_spill] sm:$0xff] }
 0x28c   :  { %5106 = vrcp.f32 %v859_v49  ;;  %v6924_v49 = vld [vmem:[#allocation31_spill] sm:$0xff] }
 0x293   :  { %v5101_v56 = vpop.eup %5100 }
 0x294   :  { %v5103_v58 = vpop.eup %5102 }
 0x295   :  { %v5105_v5 = vpop.eup %5104  ;;  %v863_v32 = vmul.f32 %v5103_v58, %v5101_v56  ;;  %v6921_v56 = vld [vmem:[#allocation28_spill] sm:$0xff]  ;;  %v6922_v58 = vld [vmem:[#allocation29_spill] sm:$0xff] }
 0x296   :  { %v862_v47 = vmul.f32 %v5105_v5, %v5846_v59  ;;  %v5107_v41 = vpop.eup %5106  ;;  %v6912_v59 = vld [vmem:[#allocation19_spill] sm:$0xff]  ;;  %v6923_v5 = vld [vmem:[#allocation30_spill] sm:$0xff] }
 0x298   :  { %v5973_v48 = vadd.f32 %v863_v32, %v862_v47  ;;  %v6925_v47 = vld [vmem:[#allocation32_spill] sm:$0xff]  ;;  %v6926_v32 = vld [vmem:[#allocation33_spill] sm:$0xff] }
 0x29a   :  { %5108 = vtanh.f32 %v5973_v48 }
 0x2a4   :  { %v5109_v6 = vpop.eup %5108 }
 0x2a5   :  { %v866_v14 = vmul.f32 %v5109_v6, %v5107_v41  ;;  %v6927_v41 = vld [vmem:[#allocation34_spill] sm:$0xff]  ;;  %v6928_v6 = vld [vmem:[#allocation35_spill] sm:$0xff] }
 0x2a7   :  { %932 = vmatmul.mubr.f32.vlgmr.msra.gmra.mrb[6].mxu0 %v866_v14  ;;  %1003 = vmatmul.mubr.f32.vlgmr.msra.gmra.mrb[6].mxu1 %v866_v14 }
 0x2a8   :  { %3876 = vmatpush1.bf16.msra.mxu0 %v5548_v9  ;;  %3908 = vmatpush1.bf16.msra.mxu1 %v5551_v13 }
 0x2a9   :  { %3878 = vmatprep.subr.bf16.mxu0 %v5555_v17  ;;  %3910 = vmatprep.subr.bf16.mxu1 %v5557_v18 }
 0x2aa   :  { %1100 = vmatprep.mubr.f32.mxu0 %v6856_v15  ;;  %1171 = vmatprep.mubr.f32.mxu1 %v6856_v15 }
 0x2ac   :  { %3880 = vmatpush1.bf16.msra.mxu0 %v5560_v22  ;;  %3912 = vmatpush1.bf16.msra.mxu1 %v5564_v26 }
 0x2ad   :  { %3882 = vmatprep.subr.bf16.mxu0 %v5566_v27  ;;  %3914 = vmatprep.subr.bf16.mxu1 %v5568_v31 }
 0x2b0   :  { %3884 = vmatpush1.bf16.msra.mxu0 %v5571_v35  ;;  %3916 = vmatpush1.bf16.msra.mxu1 %v5575_v39 }
 0x2b1   :  { %3886 = vmatprep.subr.bf16.mxu0 %v5577_v40  ;;  %3918 = vmatprep.subr.bf16.mxu1 %v5580_v44 }
 0x2b4   :  { %3888 = vmatpush1.bf16.msra.mxu0 %v5583_v51  ;;  %3920 = vmatpush1.bf16.msra.mxu1 %v5587_v52 }
 0x2b5   :  { %3890 = vmatprep.subr.bf16.mxu0 %v5589_v53  ;;  %3922 = vmatprep.subr.bf16.mxu1 %v5592_v57 }
 0x2b8   :  { %3892 = vmatpush1.bf16.msra.mxu0 %v5595_v63  ;;  %3924 = vmatpush1.bf16.msra.mxu1 %v5599_v1 }
 0x2b9   :  { %3894 = vmatprep.subr.bf16.mxu0 %v5601_v2  ;;  %3926 = vmatprep.subr.bf16.mxu1 %v5604_v7 }
 0x2bc   :  { %3896 = vmatpush1.bf16.msra.mxu0 %v5607_v16  ;;  %3928 = vmatpush1.bf16.msra.mxu1 %v5611_v19 }
 0x2bd   :  { %3898 = vmatprep.subr.bf16.mxu0 %v5613_v20  ;;  %3930 = vmatprep.subr.bf16.mxu1 %v5616_v25 }
 0x2c0   :  { %3900 = vmatpush1.bf16.msra.mxu0 %v5619_v34  ;;  %3932 = vmatpush1.bf16.msra.mxu1 %v5623_v36 }
 0x2c1   :  { %3902 = vmatprep.subr.bf16.mxu0 %v5625_v37  ;;  %3934 = vmatprep.subr.bf16.mxu1 %v5628_v43 }
 0x2c4   :  { %3904 = vmatpush1.bf16.msra.mxu0 %v5631_v50  ;;  %3936 = vmatpush1.bf16.msra.mxu1 %v5635_v54 }
 0x2c5   :  { %3938 = vmatprep.subr.bf16.mxu0 %v5637_v55  ;;  %4002 = vmatprep.subr.bf16.mxu1 %v5640_v60 }
 0x2c7   :  { %1101 = vmatmul.mubr.f32.vlgmr.msra.gmra.mrb[8].mxu0 %v866_v14  ;;  %1172 = vmatmul.mubr.f32.vlgmr.msra.gmra.mrb[8].mxu1 %v866_v14  ;;  %v6929_v14 = vld [vmem:[#allocation36_spill] sm:$0xff] }
 0x2c8   :  { %3940 = vmatpush1.bf16.msra.mxu0 %v5643_v10  ;;  %4004 = vmatpush1.bf16.msra.mxu1 %v5647_v11 }
 0x2c9   :  { %3942 = vmatprep.subr.bf16.mxu0 %v5649_v12  ;;  %4006 = vmatprep.subr.bf16.mxu1 %v5652_v21 }
 0x2cc   :  { %3944 = vmatpush1.bf16.msra.mxu0 %v5657_v28  ;;  %4008 = vmatpush1.bf16.msra.mxu1 %v5661_v29 }
 0x2cd   :  { %3946 = vmatprep.subr.bf16.mxu0 %v5668_v38  ;;  %4010 = vmatprep.subr.bf16.mxu1 %v5670_v42 }
 0x2d0   :  { %3948 = vmatpush1.bf16.msra.mxu0 %v6857_v30  ;;  %4012 = vmatpush1.bf16.msra.mxu1 %v6912_v59 }
 0x2d1   :  { %3950 = vmatprep.subr.bf16.mxu0 %v6913_v61  ;;  %4014 = vmatprep.subr.bf16.mxu1 %v6914_v62 }
 0x2d4   :  { %3952 = vmatpush1.bf16.msra.mxu0 %v6915_v46  ;;  %4016 = vmatpush1.bf16.msra.mxu1 %v6916_v8 }
 0x2d5   :  { %3954 = vmatprep.subr.bf16.mxu0 %v6917_v33  ;;  %4018 = vmatprep.subr.bf16.mxu1 %v6918_v0  ;;  %v6967_v0 = vld [vmem:[#allocation18_spill] sm:$0xff] }
 0x2d8   :  { %3956 = vmatpush1.bf16.msra.mxu0 %v6919_v23  ;;  %4020 = vmatpush1.bf16.msra.mxu1 %v6920_v3  ;;  %v6930_v23 = vld [vmem:[#allocation37_spill] sm:$0xff]  ;;  %v6931_v3 = vld [vmem:[#allocation38_spill] sm:$0xff] }
 0x2d9   :  { %3958 = vmatprep.subr.bf16.mxu0 %v6921_v56  ;;  %4022 = vmatprep.subr.bf16.mxu1 %v6922_v58  ;;  %v6932_v56 = vld [vmem:[#allocation39_spill] sm:$0xff]  ;;  %v6933_v58 = vld [vmem:[#allocation40_spill] sm:$0xff] }
 0x2dc   :  { %3960 = vmatpush1.bf16.msra.mxu0 %v6923_v5  ;;  %4024 = vmatpush1.bf16.msra.mxu1 %v6924_v49  ;;  %v6934_v5 = vld [vmem:[#allocation41_spill] sm:$0xff]  ;;  %v6935_v49 = vld [vmem:[#allocation42_spill] sm:$0xff] }
 0x2dd   :  { %3962 = vmatprep.subr.bf16.mxu0 %v6925_v47  ;;  %4026 = vmatprep.subr.bf16.mxu1 %v6926_v32  ;;  %v6936_v47 = vld [vmem:[#allocation43_spill] sm:$0xff]  ;;  %v6937_v32 = vld [vmem:[#allocation44_spill] sm:$0xff] }
 0x2e0   :  { %3964 = vmatpush1.bf16.msra.mxu0 %v6927_v41  ;;  %4028 = vmatpush1.bf16.msra.mxu1 %v6928_v6  ;;  %v6938_v41 = vld [vmem:[#allocation45_spill] sm:$0xff]  ;;  %v6939_v6 = vld [vmem:[#allocation46_spill] sm:$0xff] }
 0x2e1   :  { %3966 = vmatprep.subr.bf16.mxu0 %v6929_v14  ;;  %4030 = vmatprep.subr.bf16.mxu1 %v6930_v23  ;;  %v6940_v14 = vld [vmem:[#allocation47_spill] sm:$0xff]  ;;  %v6941_v23 = vld [vmem:[#allocation48_spill] sm:$0xff] }
 0x2e4   :  { %3968 = vmatpush1.bf16.msra.mxu0 %v6931_v3  ;;  %4032 = vmatpush1.bf16.msra.mxu1 %v6932_v56  ;;  %v6942_v3 = vld [vmem:[#allocation49_spill] sm:$0xff]  ;;  %v6943_v56 = vld [vmem:[#allocation50_spill] sm:$0xff] }
 0x2e5   :  { %3970 = vmatprep.subr.bf16.mxu0 %v6933_v58  ;;  %4034 = vmatprep.subr.bf16.mxu1 %v6934_v5  ;;  %v6944_v58 = vld [vmem:[#allocation51_spill] sm:$0xff]  ;;  %v6945_v5 = vld [vmem:[#allocation52_spill] sm:$0xff] }
 0x2e8   :  { %3972 = vmatpush1.bf16.msra.mxu0 %v6935_v49  ;;  %4036 = vmatpush1.bf16.msra.mxu1 %v6936_v47  ;;  %v6946_v49 = vld [vmem:[#allocation53_spill] sm:$0xff]  ;;  %v6947_v47 = vld [vmem:[#allocation54_spill] sm:$0xff] }
 0x2e9   :  { %3974 = vmatprep.subr.bf16.mxu0 %v6937_v32  ;;  %4038 = vmatprep.subr.bf16.mxu1 %v6938_v41  ;;  %v6948_v32 = vld [vmem:[#allocation55_spill] sm:$0xff]  ;;  %v6949_v41 = vld [vmem:[#allocation56_spill] sm:$0xff] }
 0x2ec   :  { %3976 = vmatpush1.bf16.msra.mxu0 %v6939_v6  ;;  %4040 = vmatpush1.bf16.msra.mxu1 %v6940_v14  ;;  %v6950_v6 = vld [vmem:[#allocation57_spill] sm:$0xff]  ;;  %v6951_v14 = vld [vmem:[#allocation58_spill] sm:$0xff] }
 0x2ed   :  { %3978 = vmatprep.subr.bf16.mxu0 %v6941_v23  ;;  %4042 = vmatprep.subr.bf16.mxu1 %v6942_v3  ;;  %v6952_v23 = vld [vmem:[#allocation59_spill] sm:$0xff]  ;;  %v6953_v3 = vld [vmem:[#allocation60_spill] sm:$0xff] }
 0x2f0   :  { %3980 = vmatpush1.bf16.msra.mxu0 %v6943_v56  ;;  %4044 = vmatpush1.bf16.msra.mxu1 %v6944_v58  ;;  %v6954_v56 = vld [vmem:[#allocation61_spill] sm:$0xff]  ;;  %v6955_v58 = vld [vmem:[#allocation62_spill] sm:$0xff] }
 0x2f1   :  { %3982 = vmatprep.subr.bf16.mxu0 %v6945_v5  ;;  %4046 = vmatprep.subr.bf16.mxu1 %v6946_v49  ;;  %v6956_v5 = vld [vmem:[#allocation63_spill] sm:$0xff]  ;;  %v6957_v49 = vld [vmem:[#allocation64_spill] sm:$0xff] }
 0x2f4   :  { %3984 = vmatpush1.bf16.msra.mxu0 %v6947_v47  ;;  %4048 = vmatpush1.bf16.msra.mxu1 %v6948_v32  ;;  %v6958_v47 = vld [vmem:[#allocation65_spill] sm:$0xff]  ;;  %v6959_v32 = vld [vmem:[#allocation66_spill] sm:$0xff] }
 0x2f5   :  { %3986 = vmatprep.subr.bf16.mxu0 %v6949_v41  ;;  %4050 = vmatprep.subr.bf16.mxu1 %v6950_v6  ;;  %v6960_v41 = vld [vmem:[#allocation67_spill] sm:$0xff]  ;;  %v6961_v6 = vld [vmem:[#allocation68_spill] sm:$0xff] }
 0x2f8   :  { %3988 = vmatpush1.bf16.msra.mxu0 %v6951_v14  ;;  %4052 = vmatpush1.bf16.msra.mxu1 %v6952_v23  ;;  %v6962_v14 = vld [vmem:[#allocation69_spill] sm:$0xff]  ;;  %v6963_v23 = vld [vmem:[#allocation70_spill] sm:$0xff] }
 0x2f9   :  { %3990 = vmatprep.subr.bf16.mxu0 %v6953_v3  ;;  %4054 = vmatprep.subr.bf16.mxu1 %v6954_v56  ;;  %v6964_v3 = vld [vmem:[#allocation71_spill] sm:$0xff]  ;;  %v6965_v56 = vld [vmem:[#allocation16_spill] sm:$0xff] }
 0x2fc   :  { %3992 = vmatpush1.bf16.msra.mxu0 %v6955_v58  ;;  %4056 = vmatpush1.bf16.msra.mxu1 %v6956_v5  ;;  %v6966_v58 = vld [vmem:[#allocation17_spill] sm:$0xff] }
 0x2fd   :  { %3994 = vmatprep.subr.bf16.mxu0 %v6957_v49  ;;  %4058 = vmatprep.subr.bf16.mxu1 %v6958_v47 }
 0x300   :  { %3996 = vmatpush1.bf16.msra.mxu0 %v6959_v32  ;;  %4060 = vmatpush1.bf16.msra.mxu1 %v6960_v41 }
 0x301   :  { %3998 = vmatprep.subr.bf16.mxu0 %v6961_v6  ;;  %4062 = vmatprep.subr.bf16.mxu1 %v6962_v14  ;;  %v6968_v14 = vld [vmem:[#allocation72_spill] sm:$0xff] }
 0x304   :  { %4000 = vmatpush1.bf16.msra.mxu0 %v6963_v23  ;;  %4064 = vmatpush1.bf16.msra.mxu1 %v6964_v3  ;;  %v6969_v3 = vld [vmem:[#allocation73_spill] sm:$0xff] }
 0x305   :  { %4066 = vmatprep.subr.bf16.mxu0 %v6965_v56  ;;  %4098 = vmatprep.subr.bf16.mxu1 %v6966_v58 }
 0x37a   :  { %v933_v5 = vpop.f32.mrb[6].mxu0  ;;  %v1004_v49 = vpop.f32.mrb[6].mxu1 }
 0x37b   :  { %v934_v47 = vadd.f32 %v933_v5, %v6967_v0  ;;  %v935_v33 = vpop.f32.mrb[7].mxu0  ;;  %v1006_v32 = vpop.f32.mrb[7].mxu1  ;;  %v1005_v62 = vadd.f32 %v1004_v49, %v6969_v3 }
 0x37c   :  { %v936_v41 = vadd.f32 %v935_v33, %v5954_v4  ;;  %v1007_v23 = vadd.f32 %v1006_v32, %v6968_v14 }
 0x37d   :  { %v3397_v8 = vmul.f32 -1.442695, %v934_v47 }
 0x37e   :  { %v3398_v6 = vmul.f32 -1.442695, %v936_v41  ;;  %v3399_v46 = vmul.f32 -1.442695, %v1007_v23 }
 0x37f   :  { %5110 = vpow2.f32 %v3397_v8 }
 0x380   :  { %5112 = vpow2.f32 %v3398_v6 }
 0x381   :  { %5114 = vpow2.f32 %v3399_v46 }
 0x382   :  { %5116 = vtanh.f32 %v1005_v62 }
 0x389   :  { %v5111_v56 = vpop.eup %5110 }
 0x38a   :  { %v5113_v61 = vpop.eup %5112  ;;  %v1012_v58 = vadd.f32 1.0, %v5111_v56 }
 0x38b   :  { %v1018_v59 = vadd.f32 1.0, %v5113_v61  ;;  %v5115_v5 = vpop.eup %5114 }
 0x38c   :  { %5118 = vrcp.f32 %v1012_v58  ;;  %v5117_v0 = vpop.eup %5116  ;;  %v1025_v8 = vadd.f32 1.0, %v5115_v5 }
 0x38d   :  { %5120 = vrcp.f32 %v1018_v59 }
 0x38e   :  { %5122 = vrcp.f32 %v1025_v8 }
 0x396   :  { %v5119_v33 = vpop.eup %5118 }
 0x397   :  { %v5121_v47 = vpop.eup %5120  ;;  %v1029_v41 = vmul.f32 %v5119_v33, %v5117_v0  ;;  %v1035_v0 = vld [vmem:[#allocation3 + $0x2] ss:$8 sm:$0xf] }
 0x398   :  { %v1028_v6 = vmul.f32 %v5121_v47, %v5966_v45  ;;  %v5123_v33 = vpop.eup %5122 }
 0x39a   :  { %v1102_v32 = vpop.f32.mrb[8].mxu0  ;;  %v1173_v23 = vpop.f32.mrb[8].mxu1  ;;  %v6079_v14 = vadd.f32 %v1029_v41, %v1028_v6 }
 0x39b   :  { %v1104_v49 = vpop.f32.mrb[9].mxu0  ;;  %v1175_v56 = vpop.f32.mrb[9].mxu1 }
 0x39c   :  { %v1182_v46 = vcombine.low %v1102_v32, %v1104_v49  ;;  %v1183_v62 = vcombine.low %v1173_v23, %v1175_v56  ;;  %5124 = vtanh.f32 %v6079_v14 }
 0x39e   :  { %v1190_v59 = vrot.slane %v1182_v46, %v5841_v24  ;;  %v1197_v61 = vrot.slane %v1183_v62, %v5841_v24 }
 0x3a0   :  { %v1198_v58 = vcombine.low %v1190_v59, %v1197_v61 }
 0x3a2   :  { %v1205_v5 = vrot.slane %v1198_v58, %v5841_v24 }
 0x3a4   :  { %v1207_v45 = vadd.f32 %v1205_v5, %v1035_v0 }
 0x3a6   :  { %v5125_v47 = vpop.eup %5124  ;;  %v3400_v41 = vmul.f32 -1.442695, %v1207_v45  ;;  %v1215_v6 = vrot.slane %v1207_v45, 1  ;;  %v1226_v32 = vrot.slane %v1207_v45, 3  ;;  %v1223_v56 = vrot.slane %v1207_v45, 2 }
 0x3a7   :  { %v1032_v8 = vmul.f32 %v5125_v47, %v5123_v33 }
 0x3a8   :  { %5126 = vpow2.f32 %v3400_v41  ;;  %v3401_v3 = vmul.f32 -1.442695, %v1215_v6  ;;  %v3402_v23 = vmul.f32 -1.442695, %v1226_v32  ;;  %v6971_v32 = vld [vmem:[#allocation20_spill] sm:$0xff] }
 0x3a9   :  { %1033 = vst [vmem:[#allocation2 + $0x1] sm:$0x1] %v1032_v8  ;;  %1303 = vmatprep.mubr.f32.mxu0 %v1032_v8  ;;  %1374 = vmatprep.mubr.f32.mxu1 %v1032_v8 }
 0x3aa   :  { %5128 = vpow2.f32 %v3401_v3 }
 0x3ab   :  { %5130 = vpow2.f32 %v3402_v23  ;;  %v6972_v23 = vld [vmem:[#allocation21_spill] sm:$0xff] }
 0x3b2   :  { %v5127_v49 = vpop.eup %5126 }
 0x3b3   :  { %v1211_v46 = vadd.f32 1.0, %v5127_v49  ;;  %v6973_v49 = vld [vmem:[#allocation22_spill] sm:$0xff] }
 0x3b4   :  { %v5129_v62 = vpop.eup %5128 }
 0x3b5   :  { %5132 = vrcp.f32 %v1211_v46  ;;  %v1220_v59 = vadd.f32 1.0, %v5129_v62  ;;  %v5131_v61 = vpop.eup %5130  ;;  %v6975_v46 = vld [vmem:[#allocation24_spill] sm:$0xff]  ;;  %v6976_v62 = vld [vmem:[#allocation25_spill] sm:$0xff] }
 0x3b6   :  { %5134 = vtanh.f32 %v1223_v56  ;;  %v1231_v33 = vadd.f32 1.0, %v5131_v61  ;;  %v6974_v56 = vld [vmem:[#allocation23_spill] sm:$0xff] }
 0x3b7   :  { %5136 = vrcp.f32 %v1220_v59  ;;  %v6977_v59 = vld [vmem:[#allocation26_spill] sm:$0xff]  ;;  %v6978_v61 = vld [vmem:[#allocation27_spill] sm:$0xff] }
 0x3b8   :  { %5138 = vrcp.f32 %v1231_v33  ;;  %v6982_v33 = vld [vmem:[#allocation31_spill] sm:$0xff] }
 0x3bf   :  { %v5133_v58 = vpop.eup %5132 }
 0x3c0   :  { %v5135_v0 = vpop.eup %5134 }
 0x3c1   :  { %v5137_v5 = vpop.eup %5136  ;;  %v1235_v41 = vmul.f32 %v5135_v0, %v5133_v58  ;;  %v6979_v58 = vld [vmem:[#allocation28_spill] sm:$0xff]  ;;  %v6980_v0 = vld [vmem:[#allocation29_spill] sm:$0xff] }
 0x3c2   :  { %v1234_v47 = vmul.f32 %v5137_v5, %v5973_v48  ;;  %v5139_v45 = vpop.eup %5138  ;;  %v6970_v48 = vld [vmem:[#allocation19_spill] sm:$0xff]  ;;  %v6981_v5 = vld [vmem:[#allocation30_spill] sm:$0xff] }
 0x3c4   :  { %v6086_v3 = vadd.f32 %v1235_v41, %v1234_v47  ;;  %v6983_v47 = vld [vmem:[#allocation32_spill] sm:$0xff]  ;;  %v6984_v41 = vld [vmem:[#allocation33_spill] sm:$0xff] }
 0x3c6   :  { %5140 = vtanh.f32 %v6086_v3 }
 0x3d0   :  { %v5141_v6 = vpop.eup %5140 }
 0x3d1   :  { %v1238_v8 = vmul.f32 %v5141_v6, %v5139_v45  ;;  %v6985_v45 = vld [vmem:[#allocation34_spill] sm:$0xff]  ;;  %v6986_v6 = vld [vmem:[#allocation35_spill] sm:$0xff] }
 0x3d3   :  { %1304 = vmatmul.mubr.f32.vlgmr.msra.gmra.mrb[10].mxu0 %v1238_v8  ;;  %1375 = vmatmul.mubr.f32.vlgmr.msra.gmra.mrb[10].mxu1 %v1238_v8 }
 0x3d4   :  { %4068 = vmatpush1.bf16.msra.mxu0 %v5548_v9  ;;  %4100 = vmatpush1.bf16.msra.mxu1 %v5551_v13 }
 0x3d5   :  { %4070 = vmatprep.subr.bf16.mxu0 %v5555_v17  ;;  %4102 = vmatprep.subr.bf16.mxu1 %v5557_v18 }
 0x3d6   :  { %1472 = vmatprep.mubr.f32.mxu0 %v6856_v15  ;;  %1543 = vmatprep.mubr.f32.mxu1 %v6856_v15 }
 0x3d8   :  { %4072 = vmatpush1.bf16.msra.mxu0 %v5560_v22  ;;  %4104 = vmatpush1.bf16.msra.mxu1 %v5564_v26 }
 0x3d9   :  { %4074 = vmatprep.subr.bf16.mxu0 %v5566_v27  ;;  %4106 = vmatprep.subr.bf16.mxu1 %v5568_v31 }
 0x3dc   :  { %4076 = vmatpush1.bf16.msra.mxu0 %v5571_v35  ;;  %4108 = vmatpush1.bf16.msra.mxu1 %v5575_v39 }
 0x3dd   :  { %4078 = vmatprep.subr.bf16.mxu0 %v5577_v40  ;;  %4110 = vmatprep.subr.bf16.mxu1 %v5580_v44 }
 0x3e0   :  { %4080 = vmatpush1.bf16.msra.mxu0 %v5583_v51  ;;  %4112 = vmatpush1.bf16.msra.mxu1 %v5587_v52 }
 0x3e1   :  { %4082 = vmatprep.subr.bf16.mxu0 %v5589_v53  ;;  %4114 = vmatprep.subr.bf16.mxu1 %v5592_v57 }
 0x3e4   :  { %4084 = vmatpush1.bf16.msra.mxu0 %v5595_v63  ;;  %4116 = vmatpush1.bf16.msra.mxu1 %v5599_v1 }
 0x3e5   :  { %4086 = vmatprep.subr.bf16.mxu0 %v5601_v2  ;;  %4118 = vmatprep.subr.bf16.mxu1 %v5604_v7 }
 0x3e8   :  { %4088 = vmatpush1.bf16.msra.mxu0 %v5607_v16  ;;  %4120 = vmatpush1.bf16.msra.mxu1 %v5611_v19 }
 0x3e9   :  { %4090 = vmatprep.subr.bf16.mxu0 %v5613_v20  ;;  %4122 = vmatprep.subr.bf16.mxu1 %v5616_v25 }
 0x3ec   :  { %4092 = vmatpush1.bf16.msra.mxu0 %v5619_v34  ;;  %4124 = vmatpush1.bf16.msra.mxu1 %v5623_v36 }
 0x3ed   :  { %4094 = vmatprep.subr.bf16.mxu0 %v5625_v37  ;;  %4126 = vmatprep.subr.bf16.mxu1 %v5628_v43 }
 0x3f0   :  { %4096 = vmatpush1.bf16.msra.mxu0 %v5631_v50  ;;  %4128 = vmatpush1.bf16.msra.mxu1 %v5635_v54 }
 0x3f1   :  { %4130 = vmatprep.subr.bf16.mxu0 %v5637_v55  ;;  %4194 = vmatprep.subr.bf16.mxu1 %v5640_v60 }
 0x3f3   :  { %1473 = vmatmul.mubr.f32.vlgmr.msra.gmra.mrb[12].mxu0 %v1238_v8  ;;  %1544 = vmatmul.mubr.f32.vlgmr.msra.gmra.mrb[12].mxu1 %v1238_v8  ;;  %v6987_v8 = vld [vmem:[#allocation36_spill] sm:$0xff] }
 0x3f4   :  { %4132 = vmatpush1.bf16.msra.mxu0 %v5643_v10  ;;  %4196 = vmatpush1.bf16.msra.mxu1 %v5647_v11 }
 0x3f5   :  { %4134 = vmatprep.subr.bf16.mxu0 %v5649_v12  ;;  %4198 = vmatprep.subr.bf16.mxu1 %v5652_v21 }
 0x3f8   :  { %4136 = vmatpush1.bf16.msra.mxu0 %v5657_v28  ;;  %4200 = vmatpush1.bf16.msra.mxu1 %v5661_v29 }
 0x3f9   :  { %4138 = vmatprep.subr.bf16.mxu0 %v5668_v38  ;;  %4202 = vmatprep.subr.bf16.mxu1 %v5670_v42 }
 0x3fc   :  { %4140 = vmatpush1.bf16.msra.mxu0 %v6857_v30  ;;  %4204 = vmatpush1.bf16.msra.mxu1 %v6970_v48 }
 0x3fd   :  { %4142 = vmatprep.subr.bf16.mxu0 %v6971_v32  ;;  %4206 = vmatprep.subr.bf16.mxu1 %v6972_v23 }
 0x400   :  { %4144 = vmatpush1.bf16.msra.mxu0 %v6973_v49  ;;  %4208 = vmatpush1.bf16.msra.mxu1 %v6974_v56 }
 0x401   :  { %4146 = vmatprep.subr.bf16.mxu0 %v6975_v46  ;;  %4210 = vmatprep.subr.bf16.mxu1 %v6976_v62  ;;  %v7025_v62 = vld [vmem:[#allocation18_spill] sm:$0xff] }
 0x404   :  { %4148 = vmatpush1.bf16.msra.mxu0 %v6977_v59  ;;  %4212 = vmatpush1.bf16.msra.mxu1 %v6978_v61  ;;  %v6988_v59 = vld [vmem:[#allocation37_spill] sm:$0xff]  ;;  %v6989_v61 = vld [vmem:[#allocation38_spill] sm:$0xff] }
 0x405   :  { %4150 = vmatprep.subr.bf16.mxu0 %v6979_v58  ;;  %4214 = vmatprep.subr.bf16.mxu1 %v6980_v0  ;;  %v6990_v58 = vld [vmem:[#allocation39_spill] sm:$0xff]  ;;  %v6991_v0 = vld [vmem:[#allocation40_spill] sm:$0xff] }
 0x408   :  { %4152 = vmatpush1.bf16.msra.mxu0 %v6981_v5  ;;  %4216 = vmatpush1.bf16.msra.mxu1 %v6982_v33  ;;  %v6992_v5 = vld [vmem:[#allocation41_spill] sm:$0xff]  ;;  %v6993_v33 = vld [vmem:[#allocation42_spill] sm:$0xff] }
 0x409   :  { %4154 = vmatprep.subr.bf16.mxu0 %v6983_v47  ;;  %4218 = vmatprep.subr.bf16.mxu1 %v6984_v41  ;;  %v6994_v47 = vld [vmem:[#allocation43_spill] sm:$0xff]  ;;  %v6995_v41 = vld [vmem:[#allocation44_spill] sm:$0xff] }
 0x40c   :  { %4156 = vmatpush1.bf16.msra.mxu0 %v6985_v45  ;;  %4220 = vmatpush1.bf16.msra.mxu1 %v6986_v6  ;;  %v6996_v45 = vld [vmem:[#allocation45_spill] sm:$0xff]  ;;  %v6997_v6 = vld [vmem:[#allocation46_spill] sm:$0xff] }
 0x40d   :  { %4158 = vmatprep.subr.bf16.mxu0 %v6987_v8  ;;  %4222 = vmatprep.subr.bf16.mxu1 %v6988_v59  ;;  %v6998_v8 = vld [vmem:[#allocation47_spill] sm:$0xff]  ;;  %v6999_v59 = vld [vmem:[#allocation48_spill] sm:$0xff] }
 0x410   :  { %4160 = vmatpush1.bf16.msra.mxu0 %v6989_v61  ;;  %4224 = vmatpush1.bf16.msra.mxu1 %v6990_v58  ;;  %v7000_v61 = vld [vmem:[#allocation49_spill] sm:$0xff]  ;;  %v7001_v58 = vld [vmem:[#allocation50_spill] sm:$0xff] }
 0x411   :  { %4162 = vmatprep.subr.bf16.mxu0 %v6991_v0  ;;  %4226 = vmatprep.subr.bf16.mxu1 %v6992_v5  ;;  %v7002_v0 = vld [vmem:[#allocation51_spill] sm:$0xff]  ;;  %v7003_v5 = vld [vmem:[#allocation52_spill] sm:$0xff] }
 0x414   :  { %4164 = vmatpush1.bf16.msra.mxu0 %v6993_v33  ;;  %4228 = vmatpush1.bf16.msra.mxu1 %v6994_v47  ;;  %v7004_v33 = vld [vmem:[#allocation53_spill] sm:$0xff]  ;;  %v7005_v47 = vld [vmem:[#allocation54_spill] sm:$0xff] }
 0x415   :  { %4166 = vmatprep.subr.bf16.mxu0 %v6995_v41  ;;  %4230 = vmatprep.subr.bf16.mxu1 %v6996_v45  ;;  %v7006_v41 = vld [vmem:[#allocation55_spill] sm:$0xff]  ;;  %v7007_v45 = vld [vmem:[#allocation56_spill] sm:$0xff] }
 0x418   :  { %4168 = vmatpush1.bf16.msra.mxu0 %v6997_v6  ;;  %4232 = vmatpush1.bf16.msra.mxu1 %v6998_v8  ;;  %v7008_v6 = vld [vmem:[#allocation57_spill] sm:$0xff]  ;;  %v7009_v8 = vld [vmem:[#allocation58_spill] sm:$0xff] }
 0x419   :  { %4170 = vmatprep.subr.bf16.mxu0 %v6999_v59  ;;  %4234 = vmatprep.subr.bf16.mxu1 %v7000_v61  ;;  %v7010_v59 = vld [vmem:[#allocation59_spill] sm:$0xff]  ;;  %v7011_v61 = vld [vmem:[#allocation60_spill] sm:$0xff] }
 0x41c   :  { %4172 = vmatpush1.bf16.msra.mxu0 %v7001_v58  ;;  %4236 = vmatpush1.bf16.msra.mxu1 %v7002_v0  ;;  %v7012_v58 = vld [vmem:[#allocation61_spill] sm:$0xff]  ;;  %v7013_v0 = vld [vmem:[#allocation62_spill] sm:$0xff] }
 0x41d   :  { %4174 = vmatprep.subr.bf16.mxu0 %v7003_v5  ;;  %4238 = vmatprep.subr.bf16.mxu1 %v7004_v33  ;;  %v7014_v5 = vld [vmem:[#allocation63_spill] sm:$0xff]  ;;  %v7015_v33 = vld [vmem:[#allocation64_spill] sm:$0xff] }
 0x420   :  { %4176 = vmatpush1.bf16.msra.mxu0 %v7005_v47  ;;  %4240 = vmatpush1.bf16.msra.mxu1 %v7006_v41  ;;  %v7016_v47 = vld [vmem:[#allocation65_spill] sm:$0xff]  ;;  %v7017_v41 = vld [vmem:[#allocation66_spill] sm:$0xff] }
 0x421   :  { %4178 = vmatprep.subr.bf16.mxu0 %v7007_v45  ;;  %4242 = vmatprep.subr.bf16.mxu1 %v7008_v6  ;;  %v7018_v45 = vld [vmem:[#allocation67_spill] sm:$0xff]  ;;  %v7019_v6 = vld [vmem:[#allocation68_spill] sm:$0xff] }
 0x424   :  { %4180 = vmatpush1.bf16.msra.mxu0 %v7009_v8  ;;  %4244 = vmatpush1.bf16.msra.mxu1 %v7010_v59  ;;  %v7020_v8 = vld [vmem:[#allocation69_spill] sm:$0xff]  ;;  %v7021_v59 = vld [vmem:[#allocation70_spill] sm:$0xff] }
 0x425   :  { %4182 = vmatprep.subr.bf16.mxu0 %v7011_v61  ;;  %4246 = vmatprep.subr.bf16.mxu1 %v7012_v58  ;;  %v7022_v61 = vld [vmem:[#allocation71_spill] sm:$0xff]  ;;  %v7023_v58 = vld [vmem:[#allocation16_spill] sm:$0xff] }
 0x428   :  { %4184 = vmatpush1.bf16.msra.mxu0 %v7013_v0  ;;  %4248 = vmatpush1.bf16.msra.mxu1 %v7014_v5  ;;  %v7024_v0 = vld [vmem:[#allocation17_spill] sm:$0xff] }
 0x429   :  { %4186 = vmatprep.subr.bf16.mxu0 %v7015_v33  ;;  %4250 = vmatprep.subr.bf16.mxu1 %v7016_v47 }
 0x42c   :  { %4188 = vmatpush1.bf16.msra.mxu0 %v7017_v41  ;;  %4252 = vmatpush1.bf16.msra.mxu1 %v7018_v45 }
 0x42d   :  { %4190 = vmatprep.subr.bf16.mxu0 %v7019_v6  ;;  %4254 = vmatprep.subr.bf16.mxu1 %v7020_v8  ;;  %v7026_v8 = vld [vmem:[#allocation72_spill] sm:$0xff] }
 0x430   :  { %4192 = vmatpush1.bf16.msra.mxu0 %v7021_v59  ;;  %4256 = vmatpush1.bf16.msra.mxu1 %v7022_v61  ;;  %v7027_v61 = vld [vmem:[#allocation73_spill] sm:$0xff] }
 0x431   :  { %4258 = vmatprep.subr.bf16.mxu0 %v7023_v58  ;;  %4290 = vmatprep.subr.bf16.mxu1 %v7024_v0 }
 0x4a6   :  { %v1305_v5 = vpop.f32.mrb[10].mxu0  ;;  %v1376_v33 = vpop.f32.mrb[10].mxu1 }
 0x4a7   :  { %v1306_v47 = vadd.f32 %v1305_v5, %v7025_v62  ;;  %v1307_v46 = vpop.f32.mrb[11].mxu0  ;;  %v1378_v41 = vpop.f32.mrb[11].mxu1  ;;  %v1377_v23 = vadd.f32 %v1376_v33, %v7027_v61 }
 0x4a8   :  { %v1308_v45 = vadd.f32 %v1307_v46, %v5954_v4  ;;  %v1379_v59 = vadd.f32 %v1378_v41, %v7026_v8 }
 0x4a9   :  { %v3403_v56 = vmul.f32 -1.442695, %v1306_v47 }
 0x4aa   :  { %v3404_v6 = vmul.f32 -1.442695, %v1308_v45  ;;  %v3405_v49 = vmul.f32 -1.442695, %v1379_v59 }
 0x4ab   :  { %5142 = vpow2.f32 %v3403_v56 }
 0x4ac   :  { %5144 = vpow2.f32 %v3404_v6 }
 0x4ad   :  { %5146 = vpow2.f32 %v3405_v49 }
 0x4ae   :  { %5148 = vtanh.f32 %v1377_v23 }
 0x4b5   :  { %v5143_v58 = vpop.eup %5142 }
 0x4b6   :  { %v5145_v32 = vpop.eup %5144  ;;  %v1384_v0 = vadd.f32 1.0, %v5143_v58 }
 0x4b7   :  { %v1390_v48 = vadd.f32 1.0, %v5145_v32  ;;  %v5147_v5 = vpop.eup %5146 }
 0x4b8   :  { %5150 = vrcp.f32 %v1384_v0  ;;  %v5149_v62 = vpop.eup %5148  ;;  %v1397_v56 = vadd.f32 1.0, %v5147_v5 }
 0x4b9   :  { %5152 = vrcp.f32 %v1390_v48 }
 0x4ba   :  { %5154 = vrcp.f32 %v1397_v56 }
 0x4c2   :  { %v5151_v46 = vpop.eup %5150 }
 0x4c3   :  { %v5153_v47 = vpop.eup %5152  ;;  %v1401_v45 = vmul.f32 %v5151_v46, %v5149_v62  ;;  %v1407_v62 = vld [vmem:[#allocation3 + $0x3] ss:$8 sm:$0xf] }
 0x4c4   :  { %v1400_v6 = vmul.f32 %v5153_v47, %v6079_v14  ;;  %v5155_v46 = vpop.eup %5154 }
 0x4c6   :  { %v1474_v41 = vpop.f32.mrb[12].mxu0  ;;  %v1545_v59 = vpop.f32.mrb[12].mxu1  ;;  %v6192_v8 = vadd.f32 %v1401_v45, %v1400_v6 }
 0x4c7   :  { %v1476_v33 = vpop.f32.mrb[13].mxu0  ;;  %v1547_v58 = vpop.f32.mrb[13].mxu1 }
 0x4c8   :  { %v1554_v49 = vcombine.low %v1474_v41, %v1476_v33  ;;  %v1555_v23 = vcombine.low %v1545_v59, %v1547_v58  ;;  %5156 = vtanh.f32 %v6192_v8 }
 0x4ca   :  { %v1562_v48 = vrot.slane %v1554_v49, %v5841_v24  ;;  %v1569_v32 = vrot.slane %v1555_v23, %v5841_v24 }
 0x4cc   :  { %v1570_v0 = vcombine.low %v1562_v48, %v1569_v32 }
 0x4ce   :  { %v1577_v5 = vrot.slane %v1570_v0, %v5841_v24 }
 0x4d0   :  { %v1579_v14 = vadd.f32 %v1577_v5, %v1407_v62 }
 0x4d2   :  { %v5157_v47 = vpop.eup %5156  ;;  %v3406_v45 = vmul.f32 -1.442695, %v1579_v14  ;;  %v1587_v6 = vrot.slane %v1579_v14, 1  ;;  %v1598_v41 = vrot.slane %v1579_v14, 3  ;;  %v1595_v58 = vrot.slane %v1579_v14, 2 }
 0x4d3   :  { %v1404_v56 = vmul.f32 %v5157_v47, %v5155_v46 }
 0x4d4   :  { %5158 = vpow2.f32 %v3406_v45  ;;  %v3407_v61 = vmul.f32 -1.442695, %v1587_v6  ;;  %v3408_v59 = vmul.f32 -1.442695, %v1598_v41  ;;  %v7029_v41 = vld [vmem:[#allocation20_spill] sm:$0xff] }
 0x4d5   :  { %1405 = vst [vmem:[#allocation2 + $0x2] sm:$0x1] %v1404_v56  ;;  %1675 = vmatprep.mubr.f32.mxu0 %v1404_v56  ;;  %1746 = vmatprep.mubr.f32.mxu1 %v1404_v56 }
 0x4d6   :  { %5160 = vpow2.f32 %v3407_v61 }
 0x4d7   :  { %5162 = vpow2.f32 %v3408_v59  ;;  %v7030_v59 = vld [vmem:[#allocation21_spill] sm:$0xff] }
 0x4de   :  { %v5159_v33 = vpop.eup %5158 }
 0x4df   :  { %v1583_v49 = vadd.f32 1.0, %v5159_v33  ;;  %v7031_v33 = vld [vmem:[#allocation22_spill] sm:$0xff] }
 0x4e0   :  { %v5161_v23 = vpop.eup %5160 }
 0x4e1   :  { %5164 = vrcp.f32 %v1583_v49  ;;  %v1592_v48 = vadd.f32 1.0, %v5161_v23  ;;  %v5163_v32 = vpop.eup %5162  ;;  %v7033_v49 = vld [vmem:[#allocation24_spill] sm:$0xff]  ;;  %v7034_v23 = vld [vmem:[#allocation25_spill] sm:$0xff] }
 0x4e2   :  { %5166 = vtanh.f32 %v1595_v58  ;;  %v1603_v46 = vadd.f32 1.0, %v5163_v32  ;;  %v7032_v58 = vld [vmem:[#allocation23_spill] sm:$0xff] }
 0x4e3   :  { %5168 = vrcp.f32 %v1592_v48  ;;  %v7035_v48 = vld [vmem:[#allocation26_spill] sm:$0xff]  ;;  %v7036_v32 = vld [vmem:[#allocation27_spill] sm:$0xff] }
 0x4e4   :  { %5170 = vrcp.f32 %v1603_v46  ;;  %v7040_v46 = vld [vmem:[#allocation31_spill] sm:$0xff] }
 0x4eb   :  { %v5165_v0 = vpop.eup %5164 }
 0x4ec   :  { %v5167_v62 = vpop.eup %5166 }
 0x4ed   :  { %v5169_v5 = vpop.eup %5168  ;;  %v1607_v45 = vmul.f32 %v5167_v62, %v5165_v0  ;;  %v7037_v0 = vld [vmem:[#allocation28_spill] sm:$0xff]  ;;  %v7038_v62 = vld [vmem:[#allocation29_spill] sm:$0xff] }
 0x4ee   :  { %v1606_v47 = vmul.f32 %v5169_v5, %v6086_v3  ;;  %v5171_v14 = vpop.eup %5170  ;;  %v7028_v3 = vld [vmem:[#allocation19_spill] sm:$0xff]  ;;  %v7039_v5 = vld [vmem:[#allocation30_spill] sm:$0xff] }
 0x4f0   :  { %v6199_v61 = vadd.f32 %v1607_v45, %v1606_v47  ;;  %v7041_v47 = vld [vmem:[#allocation32_spill] sm:$0xff]  ;;  %v7042_v45 = vld [vmem:[#allocation33_spill] sm:$0xff] }
 0x4f2   :  { %5172 = vtanh.f32 %v6199_v61 }
 0x4fc   :  { %v5173_v6 = vpop.eup %5172 }
 0x4fd   :  { %v1610_v56 = vmul.f32 %v5173_v6, %v5171_v14  ;;  %v7043_v14 = vld [vmem:[#allocation34_spill] sm:$0xff]  ;;  %v7044_v6 = vld [vmem:[#allocation35_spill] sm:$0xff] }
 0x4ff   :  { %1676 = vmatmul.mubr.f32.vlgmr.msra.gmra.mrb[14].mxu0 %v1610_v56  ;;  %1747 = vmatmul.mubr.f32.vlgmr.msra.gmra.mrb[14].mxu1 %v1610_v56 }
 0x500   :  { %4260 = vmatpush1.bf16.msra.mxu0 %v5548_v9  ;;  %4292 = vmatpush1.bf16.msra.mxu1 %v5551_v13 }
 0x501   :  { %4262 = vmatprep.subr.bf16.mxu0 %v5555_v17  ;;  %4294 = vmatprep.subr.bf16.mxu1 %v5557_v18 }
 0x502   :  { %1844 = vmatprep.mubr.f32.mxu0 %v6856_v15  ;;  %1915 = vmatprep.mubr.f32.mxu1 %v6856_v15 }
 0x504   :  { %4264 = vmatpush1.bf16.msra.mxu0 %v5560_v22  ;;  %4296 = vmatpush1.bf16.msra.mxu1 %v5564_v26 }
 0x505   :  { %4266 = vmatprep.subr.bf16.mxu0 %v5566_v27  ;;  %4298 = vmatprep.subr.bf16.mxu1 %v5568_v31 }
 0x508   :  { %4268 = vmatpush1.bf16.msra.mxu0 %v5571_v35  ;;  %4300 = vmatpush1.bf16.msra.mxu1 %v5575_v39 }
 0x509   :  { %4270 = vmatprep.subr.bf16.mxu0 %v5577_v40  ;;  %4302 = vmatprep.subr.bf16.mxu1 %v5580_v44 }
 0x50c   :  { %4272 = vmatpush1.bf16.msra.mxu0 %v5583_v51  ;;  %4304 = vmatpush1.bf16.msra.mxu1 %v5587_v52 }
 0x50d   :  { %4274 = vmatprep.subr.bf16.mxu0 %v5589_v53  ;;  %4306 = vmatprep.subr.bf16.mxu1 %v5592_v57 }
 0x510   :  { %4276 = vmatpush1.bf16.msra.mxu0 %v5595_v63  ;;  %4308 = vmatpush1.bf16.msra.mxu1 %v5599_v1 }
 0x511   :  { %4278 = vmatprep.subr.bf16.mxu0 %v5601_v2  ;;  %4310 = vmatprep.subr.bf16.mxu1 %v5604_v7 }
 0x514   :  { %4280 = vmatpush1.bf16.msra.mxu0 %v5607_v16  ;;  %4312 = vmatpush1.bf16.msra.mxu1 %v5611_v19 }
 0x515   :  { %4282 = vmatprep.subr.bf16.mxu0 %v5613_v20  ;;  %4314 = vmatprep.subr.bf16.mxu1 %v5616_v25 }
 0x518   :  { %4284 = vmatpush1.bf16.msra.mxu0 %v5619_v34  ;;  %4316 = vmatpush1.bf16.msra.mxu1 %v5623_v36 }
 0x519   :  { %4286 = vmatprep.subr.bf16.mxu0 %v5625_v37  ;;  %4318 = vmatprep.subr.bf16.mxu1 %v5628_v43 }
 0x51c   :  { %4288 = vmatpush1.bf16.msra.mxu0 %v5631_v50  ;;  %4320 = vmatpush1.bf16.msra.mxu1 %v5635_v54 }
 0x51d   :  { %4322 = vmatprep.subr.bf16.mxu0 %v5637_v55  ;;  %4386 = vmatprep.subr.bf16.mxu1 %v5640_v60 }
 0x51f   :  { %1845 = vmatmul.mubr.f32.vlgmr.msra.gmra.mrb[16].mxu0 %v1610_v56  ;;  %1916 = vmatmul.mubr.f32.vlgmr.msra.gmra.mrb[16].mxu1 %v1610_v56  ;;  %v7045_v56 = vld [vmem:[#allocation36_spill] sm:$0xff] }
 0x520   :  { %4324 = vmatpush1.bf16.msra.mxu0 %v5643_v10  ;;  %4388 = vmatpush1.bf16.msra.mxu1 %v5647_v11 }
 0x521   :  { %4326 = vmatprep.subr.bf16.mxu0 %v5649_v12  ;;  %4390 = vmatprep.subr.bf16.mxu1 %v5652_v21 }
 0x524   :  { %4328 = vmatpush1.bf16.msra.mxu0 %v5657_v28  ;;  %4392 = vmatpush1.bf16.msra.mxu1 %v5661_v29 }
 0x525   :  { %4330 = vmatprep.subr.bf16.mxu0 %v5668_v38  ;;  %4394 = vmatprep.subr.bf16.mxu1 %v5670_v42 }
 0x528   :  { %4332 = vmatpush1.bf16.msra.mxu0 %v6857_v30  ;;  %4396 = vmatpush1.bf16.msra.mxu1 %v7028_v3 }
 0x529   :  { %4334 = vmatprep.subr.bf16.mxu0 %v7029_v41  ;;  %4398 = vmatprep.subr.bf16.mxu1 %v7030_v59 }
 0x52c   :  { %4336 = vmatpush1.bf16.msra.mxu0 %v7031_v33  ;;  %4400 = vmatpush1.bf16.msra.mxu1 %v7032_v58 }
 0x52d   :  { %4338 = vmatprep.subr.bf16.mxu0 %v7033_v49  ;;  %4402 = vmatprep.subr.bf16.mxu1 %v7034_v23  ;;  %v7083_v23 = vld [vmem:[#allocation18_spill] sm:$0xff] }
 0x530   :  { %4340 = vmatpush1.bf16.msra.mxu0 %v7035_v48  ;;  %4404 = vmatpush1.bf16.msra.mxu1 %v7036_v32  ;;  %v7046_v48 = vld [vmem:[#allocation37_spill] sm:$0xff]  ;;  %v7047_v32 = vld [vmem:[#allocation38_spill] sm:$0xff] }
 0x531   :  { %4342 = vmatprep.subr.bf16.mxu0 %v7037_v0  ;;  %4406 = vmatprep.subr.bf16.mxu1 %v7038_v62  ;;  %v7048_v0 = vld [vmem:[#allocation39_spill] sm:$0xff]  ;;  %v7049_v62 = vld [vmem:[#allocation40_spill] sm:$0xff] }
 0x534   :  { %4344 = vmatpush1.bf16.msra.mxu0 %v7039_v5  ;;  %4408 = vmatpush1.bf16.msra.mxu1 %v7040_v46  ;;  %v7050_v5 = vld [vmem:[#allocation41_spill] sm:$0xff]  ;;  %v7051_v46 = vld [vmem:[#allocation42_spill] sm:$0xff] }
 0x535   :  { %4346 = vmatprep.subr.bf16.mxu0 %v7041_v47  ;;  %4410 = vmatprep.subr.bf16.mxu1 %v7042_v45  ;;  %v7052_v47 = vld [vmem:[#allocation43_spill] sm:$0xff]  ;;  %v7053_v45 = vld [vmem:[#allocation44_spill] sm:$0xff] }
 0x538   :  { %4348 = vmatpush1.bf16.msra.mxu0 %v7043_v14  ;;  %4412 = vmatpush1.bf16.msra.mxu1 %v7044_v6  ;;  %v7054_v14 = vld [vmem:[#allocation45_spill] sm:$0xff]  ;;  %v7055_v6 = vld [vmem:[#allocation46_spill] sm:$0xff] }
 0x539   :  { %4350 = vmatprep.subr.bf16.mxu0 %v7045_v56  ;;  %4414 = vmatprep.subr.bf16.mxu1 %v7046_v48  ;;  %v7056_v56 = vld [vmem:[#allocation47_spill] sm:$0xff]  ;;  %v7057_v48 = vld [vmem:[#allocation48_spill] sm:$0xff] }
 0x53c   :  { %4352 = vmatpush1.bf16.msra.mxu0 %v7047_v32  ;;  %4416 = vmatpush1.bf16.msra.mxu1 %v7048_v0  ;;  %v7058_v32 = vld [vmem:[#allocation49_spill] sm:$0xff]  ;;  %v7059_v0 = vld [vmem:[#allocation50_spill] sm:$0xff] }
 0x53d   :  { %4354 = vmatprep.subr.bf16.mxu0 %v7049_v62  ;;  %4418 = vmatprep.subr.bf16.mxu1 %v7050_v5  ;;  %v7060_v62 = vld [vmem:[#allocation51_spill] sm:$0xff]  ;;  %v7061_v5 = vld [vmem:[#allocation52_spill] sm:$0xff] }
 0x540   :  { %4356 = vmatpush1.bf16.msra.mxu0 %v7051_v46  ;;  %4420 = vmatpush1.bf16.msra.mxu1 %v7052_v47  ;;  %v7062_v46 = vld [vmem:[#allocation53_spill] sm:$0xff]  ;;  %v7063_v47 = vld [vmem:[#allocation54_spill] sm:$0xff] }
 0x541   :  { %4358 = vmatprep.subr.bf16.mxu0 %v7053_v45  ;;  %4422 = vmatprep.subr.bf16.mxu1 %v7054_v14  ;;  %v7064_v45 = vld [vmem:[#allocation55_spill] sm:$0xff]  ;;  %v7065_v14 = vld [vmem:[#allocation56_spill] sm:$0xff] }
 0x544   :  { %4360 = vmatpush1.bf16.msra.mxu0 %v7055_v6  ;;  %4424 = vmatpush1.bf16.msra.mxu1 %v7056_v56  ;;  %v7066_v6 = vld [vmem:[#allocation57_spill] sm:$0xff]  ;;  %v7067_v56 = vld [vmem:[#allocation58_spill] sm:$0xff] }
 0x545   :  { %4362 = vmatprep.subr.bf16.mxu0 %v7057_v48  ;;  %4426 = vmatprep.subr.bf16.mxu1 %v7058_v32  ;;  %v7068_v48 = vld [vmem:[#allocation59_spill] sm:$0xff]  ;;  %v7069_v32 = vld [vmem:[#allocation60_spill] sm:$0xff] }
 0x548   :  { %4364 = vmatpush1.bf16.msra.mxu0 %v7059_v0  ;;  %4428 = vmatpush1.bf16.msra.mxu1 %v7060_v62  ;;  %v7070_v0 = vld [vmem:[#allocation61_spill] sm:$0xff]  ;;  %v7071_v62 = vld [vmem:[#allocation62_spill] sm:$0xff] }
 0x549   :  { %4366 = vmatprep.subr.bf16.mxu0 %v7061_v5  ;;  %4430 = vmatprep.subr.bf16.mxu1 %v7062_v46  ;;  %v7072_v5 = vld [vmem:[#allocation63_spill] sm:$0xff]  ;;  %v7073_v46 = vld [vmem:[#allocation64_spill] sm:$0xff] }
 0x54c   :  { %4368 = vmatpush1.bf16.msra.mxu0 %v7063_v47  ;;  %4432 = vmatpush1.bf16.msra.mxu1 %v7064_v45  ;;  %v7074_v47 = vld [vmem:[#allocation65_spill] sm:$0xff]  ;;  %v7075_v45 = vld [vmem:[#allocation66_spill] sm:$0xff] }
 0x54d   :  { %4370 = vmatprep.subr.bf16.mxu0 %v7065_v14  ;;  %4434 = vmatprep.subr.bf16.mxu1 %v7066_v6  ;;  %v7076_v14 = vld [vmem:[#allocation67_spill] sm:$0xff]  ;;  %v7077_v6 = vld [vmem:[#allocation68_spill] sm:$0xff] }
 0x550   :  { %4372 = vmatpush1.bf16.msra.mxu0 %v7067_v56  ;;  %4436 = vmatpush1.bf16.msra.mxu1 %v7068_v48  ;;  %v7078_v56 = vld [vmem:[#allocation69_spill] sm:$0xff]  ;;  %v7079_v48 = vld [vmem:[#allocation70_spill] sm:$0xff] }
 0x551   :  { %4374 = vmatprep.subr.bf16.mxu0 %v7069_v32  ;;  %4438 = vmatprep.subr.bf16.mxu1 %v7070_v0  ;;  %v7080_v32 = vld [vmem:[#allocation71_spill] sm:$0xff]  ;;  %v7081_v0 = vld [vmem:[#allocation16_spill] sm:$0xff] }
 0x554   :  { %4376 = vmatpush1.bf16.msra.mxu0 %v7071_v62  ;;  %4440 = vmatpush1.bf16.msra.mxu1 %v7072_v5  ;;  %v7082_v62 = vld [vmem:[#allocation17_spill] sm:$0xff] }
 0x555   :  { %4378 = vmatprep.subr.bf16.mxu0 %v7073_v46  ;;  %4442 = vmatprep.subr.bf16.mxu1 %v7074_v47 }
 0x558   :  { %4380 = vmatpush1.bf16.msra.mxu0 %v7075_v45  ;;  %4444 = vmatpush1.bf16.msra.mxu1 %v7076_v14 }
 0x559   :  { %4382 = vmatprep.subr.bf16.mxu0 %v7077_v6  ;;  %4446 = vmatprep.subr.bf16.mxu1 %v7078_v56  ;;  %v7084_v56 = vld [vmem:[#allocation72_spill] sm:$0xff] }
 0x55c   :  { %4384 = vmatpush1.bf16.msra.mxu0 %v7079_v48  ;;  %4448 = vmatpush1.bf16.msra.mxu1 %v7080_v32  ;;  %v7085_v32 = vld [vmem:[#allocation73_spill] sm:$0xff] }
 0x55d   :  { %4450 = vmatprep.subr.bf16.mxu0 %v7081_v0  ;;  %4482 = vmatprep.subr.bf16.mxu1 %v7082_v62 }
 0x5d2   :  { %v1677_v5 = vpop.f32.mrb[14].mxu0  ;;  %v1748_v46 = vpop.f32.mrb[14].mxu1 }
 0x5d3   :  { %v1678_v47 = vadd.f32 %v1677_v5, %v7083_v23  ;;  %v1679_v49 = vpop.f32.mrb[15].mxu0  ;;  %v1750_v45 = vpop.f32.mrb[15].mxu1  ;;  %v1749_v59 = vadd.f32 %v1748_v46, %v7085_v32 }
 0x5d4   :  { %v1680_v14 = vadd.f32 %v1679_v49, %v5954_v4  ;;  %v1751_v48 = vadd.f32 %v1750_v45, %v7084_v56 }
 0x5d5   :  { %v3409_v58 = vmul.f32 -1.442695, %v1678_v47 }
 0x5d6   :  { %v3410_v6 = vmul.f32 -1.442695, %v1680_v14  ;;  %v3411_v33 = vmul.f32 -1.442695, %v1751_v48 }
 0x5d7   :  { %5174 = vpow2.f32 %v3409_v58 }
 0x5d8   :  { %5176 = vpow2.f32 %v3410_v6 }
 0x5d9   :  { %5178 = vpow2.f32 %v3411_v33 }
 0x5da   :  { %5180 = vtanh.f32 %v1749_v59 }
 0x5e1   :  { %v5175_v0 = vpop.eup %5174 }
 0x5e2   :  { %v5177_v41 = vpop.eup %5176  ;;  %v1756_v62 = vadd.f32 1.0, %v5175_v0 }
 0x5e3   :  { %v1762_v3 = vadd.f32 1.0, %v5177_v41  ;;  %v5179_v5 = vpop.eup %5178 }
 0x5e4   :  { %5182 = vrcp.f32 %v1756_v62  ;;  %v5181_v23 = vpop.eup %5180  ;;  %v1769_v58 = vadd.f32 1.0, %v5179_v5 }
 0x5e5   :  { %5184 = vrcp.f32 %v1762_v3 }
 0x5e6   :  { %5186 = vrcp.f32 %v1769_v58 }
 0x5ee   :  { %v5183_v49 = vpop.eup %5182 }
 0x5ef   :  { %v5185_v47 = vpop.eup %5184  ;;  %v1773_v14 = vmul.f32 %v5183_v49, %v5181_v23  ;;  %v1779_v23 = vld [vmem:[#allocation3 + $0x4] ss:$8 sm:$0xf] }
 0x5f0   :  { %v1772_v6 = vmul.f32 %v5185_v47, %v6192_v8  ;;  %v5187_v49 = vpop.eup %5186 }
 0x5f2   :  { %v1846_v45 = vpop.f32.mrb[16].mxu0  ;;  %v1917_v48 = vpop.f32.mrb[16].mxu1  ;;  %v6305_v56 = vadd.f32 %v1773_v14, %v1772_v6 }
 0x5f3   :  { %v1848_v46 = vpop.f32.mrb[17].mxu0  ;;  %v1919_v0 = vpop.f32.mrb[17].mxu1 }
 0x5f4   :  { %v1926_v33 = vcombine.low %v1846_v45, %v1848_v46  ;;  %v1927_v59 = vcombine.low %v1917_v48, %v1919_v0  ;;  %5188 = vtanh.f32 %v6305_v56 }
 0x5f6   :  { %v1934_v3 = vrot.slane %v1926_v33, %v5841_v24  ;;  %v1941_v41 = vrot.slane %v1927_v59, %v5841_v24 }
 0x5f8   :  { %v1942_v62 = vcombine.low %v1934_v3, %v1941_v41 }
 0x5fa   :  { %v1949_v5 = vrot.slane %v1942_v62, %v5841_v24 }
 0x5fc   :  { %v1951_v8 = vadd.f32 %v1949_v5, %v1779_v23 }
 0x5fe   :  { %v5189_v47 = vpop.eup %5188  ;;  %v3412_v14 = vmul.f32 -1.442695, %v1951_v8  ;;  %v1959_v6 = vrot.slane %v1951_v8, 1  ;;  %v1970_v45 = vrot.slane %v1951_v8, 3  ;;  %v1967_v0 = vrot.slane %v1951_v8, 2 }
 0x5ff   :  { %v1776_v58 = vmul.f32 %v5189_v47, %v5187_v49 }
 0x600   :  { %5190 = vpow2.f32 %v3412_v14  ;;  %v3413_v32 = vmul.f32 -1.442695, %v1959_v6  ;;  %v3414_v48 = vmul.f32 -1.442695, %v1970_v45  ;;  %v7087_v45 = vld [vmem:[#allocation20_spill] sm:$0xff] }
 0x601   :  { %1777 = vst [vmem:[#allocation2 + $0x3] sm:$0x1] %v1776_v58  ;;  %2047 = vmatprep.mubr.f32.mxu0 %v1776_v58  ;;  %2118 = vmatprep.mubr.f32.mxu1 %v1776_v58 }
 0x602   :  { %5192 = vpow2.f32 %v3413_v32 }
 0x603   :  { %5194 = vpow2.f32 %v3414_v48  ;;  %v7088_v48 = vld [vmem:[#allocation21_spill] sm:$0xff] }
 0x60a   :  { %v5191_v46 = vpop.eup %5190 }
 0x60b   :  { %v1955_v33 = vadd.f32 1.0, %v5191_v46  ;;  %v7089_v46 = vld [vmem:[#allocation22_spill] sm:$0xff] }
 0x60c   :  { %v5193_v59 = vpop.eup %5192 }
 0x60d   :  { %5196 = vrcp.f32 %v1955_v33  ;;  %v1964_v3 = vadd.f32 1.0, %v5193_v59  ;;  %v5195_v41 = vpop.eup %5194  ;;  %v7091_v33 = vld [vmem:[#allocation24_spill] sm:$0xff]  ;;  %v7092_v59 = vld [vmem:[#allocation25_spill] sm:$0xff] }
 0x60e   :  { %5198 = vtanh.f32 %v1967_v0  ;;  %v1975_v49 = vadd.f32 1.0, %v5195_v41  ;;  %v7090_v0 = vld [vmem:[#allocation23_spill] sm:$0xff] }
 0x60f   :  { %5200 = vrcp.f32 %v1964_v3  ;;  %v7093_v3 = vld [vmem:[#allocation26_spill] sm:$0xff]  ;;  %v7094_v41 = vld [vmem:[#allocation27_spill] sm:$0xff] }
 0x610   :  { %5202 = vrcp.f32 %v1975_v49  ;;  %v7098_v49 = vld [vmem:[#allocation31_spill] sm:$0xff] }
 0x617   :  { %v5197_v62 = vpop.eup %5196 }
 0x618   :  { %v5199_v23 = vpop.eup %5198 }
 0x619   :  { %v5201_v5 = vpop.eup %5200  ;;  %v1979_v14 = vmul.f32 %v5199_v23, %v5197_v62  ;;  %v7095_v62 = vld [vmem:[#allocation28_spill] sm:$0xff]  ;;  %v7096_v23 = vld [vmem:[#allocation29_spill] sm:$0xff] }
 0x61a   :  { %v1978_v47 = vmul.f32 %v5201_v5, %v6199_v61  ;;  %v5203_v8 = vpop.eup %5202  ;;  %v7086_v61 = vld [vmem:[#allocation19_spill] sm:$0xff]  ;;  %v7097_v5 = vld [vmem:[#allocation30_spill] sm:$0xff] }
 0x61c   :  { %v6312_v32 = vadd.f32 %v1979_v14, %v1978_v47  ;;  %v7099_v47 = vld [vmem:[#allocation32_spill] sm:$0xff]  ;;  %v7100_v14 = vld [vmem:[#allocation33_spill] sm:$0xff] }
 0x61e   :  { %5204 = vtanh.f32 %v6312_v32 }
 0x628   :  { %v5205_v6 = vpop.eup %5204 }
 0x629   :  { %v1982_v58 = vmul.f32 %v5205_v6, %v5203_v8  ;;  %v7101_v8 = vld [vmem:[#allocation34_spill] sm:$0xff]  ;;  %v7102_v6 = vld [vmem:[#allocation35_spill] sm:$0xff] }
 0x62b   :  { %2048 = vmatmul.mubr.f32.vlgmr.msra.gmra.mrb[18].mxu0 %v1982_v58  ;;  %2119 = vmatmul.mubr.f32.vlgmr.msra.gmra.mrb[18].mxu1 %v1982_v58 }
 0x62c   :  { %4452 = vmatpush1.bf16.msra.mxu0 %v5548_v9  ;;  %4484 = vmatpush1.bf16.msra.mxu1 %v5551_v13 }
 0x62d   :  { %4454 = vmatprep.subr.bf16.mxu0 %v5555_v17  ;;  %4486 = vmatprep.subr.bf16.mxu1 %v5557_v18 }
 0x62e   :  { %2216 = vmatprep.mubr.f32.mxu0 %v6856_v15  ;;  %2287 = vmatprep.mubr.f32.mxu1 %v6856_v15 }
 0x630   :  { %4456 = vmatpush1.bf16.msra.mxu0 %v5560_v22  ;;  %4488 = vmatpush1.bf16.msra.mxu1 %v5564_v26 }
 0x631   :  { %4458 = vmatprep.subr.bf16.mxu0 %v5566_v27  ;;  %4490 = vmatprep.subr.bf16.mxu1 %v5568_v31 }
 0x634   :  { %4460 = vmatpush1.bf16.msra.mxu0 %v5571_v35  ;;  %4492 = vmatpush1.bf16.msra.mxu1 %v5575_v39 }
 0x635   :  { %4462 = vmatprep.subr.bf16.mxu0 %v5577_v40  ;;  %4494 = vmatprep.subr.bf16.mxu1 %v5580_v44 }
 0x638   :  { %4464 = vmatpush1.bf16.msra.mxu0 %v5583_v51  ;;  %4496 = vmatpush1.bf16.msra.mxu1 %v5587_v52 }
 0x639   :  { %4466 = vmatprep.subr.bf16.mxu0 %v5589_v53  ;;  %4498 = vmatprep.subr.bf16.mxu1 %v5592_v57 }
 0x63c   :  { %4468 = vmatpush1.bf16.msra.mxu0 %v5595_v63  ;;  %4500 = vmatpush1.bf16.msra.mxu1 %v5599_v1 }
 0x63d   :  { %4470 = vmatprep.subr.bf16.mxu0 %v5601_v2  ;;  %4502 = vmatprep.subr.bf16.mxu1 %v5604_v7 }
 0x640   :  { %4472 = vmatpush1.bf16.msra.mxu0 %v5607_v16  ;;  %4504 = vmatpush1.bf16.msra.mxu1 %v5611_v19 }
 0x641   :  { %4474 = vmatprep.subr.bf16.mxu0 %v5613_v20  ;;  %4506 = vmatprep.subr.bf16.mxu1 %v5616_v25 }
 0x644   :  { %4476 = vmatpush1.bf16.msra.mxu0 %v5619_v34  ;;  %4508 = vmatpush1.bf16.msra.mxu1 %v5623_v36 }
 0x645   :  { %4478 = vmatprep.subr.bf16.mxu0 %v5625_v37  ;;  %4510 = vmatprep.subr.bf16.mxu1 %v5628_v43 }
 0x648   :  { %4480 = vmatpush1.bf16.msra.mxu0 %v5631_v50  ;;  %4512 = vmatpush1.bf16.msra.mxu1 %v5635_v54 }
 0x649   :  { %4514 = vmatprep.subr.bf16.mxu0 %v5637_v55  ;;  %4578 = vmatprep.subr.bf16.mxu1 %v5640_v60 }
 0x64b   :  { %2217 = vmatmul.mubr.f32.vlgmr.msra.gmra.mrb[20].mxu0 %v1982_v58  ;;  %2288 = vmatmul.mubr.f32.vlgmr.msra.gmra.mrb[20].mxu1 %v1982_v58  ;;  %v7103_v58 = vld [vmem:[#allocation36_spill] sm:$0xff] }
 0x64c   :  { %4516 = vmatpush1.bf16.msra.mxu0 %v5643_v10  ;;  %4580 = vmatpush1.bf16.msra.mxu1 %v5647_v11 }
 0x64d   :  { %4518 = vmatprep.subr.bf16.mxu0 %v5649_v12  ;;  %4582 = vmatprep.subr.bf16.mxu1 %v5652_v21 }
 0x650   :  { %4520 = vmatpush1.bf16.msra.mxu0 %v5657_v28  ;;  %4584 = vmatpush1.bf16.msra.mxu1 %v5661_v29 }
 0x651   :  { %4522 = vmatprep.subr.bf16.mxu0 %v5668_v38  ;;  %4586 = vmatprep.subr.bf16.mxu1 %v5670_v42 }
 0x654   :  { %4524 = vmatpush1.bf16.msra.mxu0 %v6857_v30  ;;  %4588 = vmatpush1.bf16.msra.mxu1 %v7086_v61 }
 0x655   :  { %4526 = vmatprep.subr.bf16.mxu0 %v7087_v45  ;;  %4590 = vmatprep.subr.bf16.mxu1 %v7088_v48 }
 0x658   :  { %4528 = vmatpush1.bf16.msra.mxu0 %v7089_v46  ;;  %4592 = vmatpush1.bf16.msra.mxu1 %v7090_v0 }
 0x659   :  { %4530 = vmatprep.subr.bf16.mxu0 %v7091_v33  ;;  %4594 = vmatprep.subr.bf16.mxu1 %v7092_v59  ;;  %v7141_v59 = vld [vmem:[#allocation18_spill] sm:$0xff] }
 0x65c   :  { %4532 = vmatpush1.bf16.msra.mxu0 %v7093_v3  ;;  %4596 = vmatpush1.bf16.msra.mxu1 %v7094_v41  ;;  %v7104_v3 = vld [vmem:[#allocation37_spill] sm:$0xff]  ;;  %v7105_v41 = vld [vmem:[#allocation38_spill] sm:$0xff] }
 0x65d   :  { %4534 = vmatprep.subr.bf16.mxu0 %v7095_v62  ;;  %4598 = vmatprep.subr.bf16.mxu1 %v7096_v23  ;;  %v7106_v62 = vld [vmem:[#allocation39_spill] sm:$0xff]  ;;  %v7107_v23 = vld [vmem:[#allocation40_spill] sm:$0xff] }
 0x660   :  { %4536 = vmatpush1.bf16.msra.mxu0 %v7097_v5  ;;  %4600 = vmatpush1.bf16.msra.mxu1 %v7098_v49  ;;  %v7108_v5 = vld [vmem:[#allocation41_spill] sm:$0xff]  ;;  %v7109_v49 = vld [vmem:[#allocation42_spill] sm:$0xff] }
 0x661   :  { %4538 = vmatprep.subr.bf16.mxu0 %v7099_v47  ;;  %4602 = vmatprep.subr.bf16.mxu1 %v7100_v14  ;;  %v7110_v47 = vld [vmem:[#allocation43_spill] sm:$0xff]  ;;  %v7111_v14 = vld [vmem:[#allocation44_spill] sm:$0xff] }
 0x664   :  { %4540 = vmatpush1.bf16.msra.mxu0 %v7101_v8  ;;  %4604 = vmatpush1.bf16.msra.mxu1 %v7102_v6  ;;  %v7112_v8 = vld [vmem:[#allocation45_spill] sm:$0xff]  ;;  %v7113_v6 = vld [vmem:[#allocation46_spill] sm:$0xff] }
 0x665   :  { %4542 = vmatprep.subr.bf16.mxu0 %v7103_v58  ;;  %4606 = vmatprep.subr.bf16.mxu1 %v7104_v3  ;;  %v7114_v58 = vld [vmem:[#allocation47_spill] sm:$0xff]  ;;  %v7115_v3 = vld [vmem:[#allocation48_spill] sm:$0xff] }
 0x668   :  { %4544 = vmatpush1.bf16.msra.mxu0 %v7105_v41  ;;  %4608 = vmatpush1.bf16.msra.mxu1 %v7106_v62  ;;  %v7116_v41 = vld [vmem:[#allocation49_spill] sm:$0xff]  ;;  %v7117_v62 = vld [vmem:[#allocation50_spill] sm:$0xff] }
 0x669   :  { %4546 = vmatprep.subr.bf16.mxu0 %v7107_v23  ;;  %4610 = vmatprep.subr.bf16.mxu1 %v7108_v5  ;;  %v7118_v23 = vld [vmem:[#allocation51_spill] sm:$0xff]  ;;  %v7119_v5 = vld [vmem:[#allocation52_spill] sm:$0xff] }
 0x66c   :  { %4548 = vmatpush1.bf16.msra.mxu0 %v7109_v49  ;;  %4612 = vmatpush1.bf16.msra.mxu1 %v7110_v47  ;;  %v7120_v49 = vld [vmem:[#allocation53_spill] sm:$0xff]  ;;  %v7121_v47 = vld [vmem:[#allocation54_spill] sm:$0xff] }
 0x66d   :  { %4550 = vmatprep.subr.bf16.mxu0 %v7111_v14  ;;  %4614 = vmatprep.subr.bf16.mxu1 %v7112_v8  ;;  %v7122_v14 = vld [vmem:[#allocation55_spill] sm:$0xff]  ;;  %v7123_v8 = vld [vmem:[#allocation56_spill] sm:$0xff] }
 0x670   :  { %4552 = vmatpush1.bf16.msra.mxu0 %v7113_v6  ;;  %4616 = vmatpush1.bf16.msra.mxu1 %v7114_v58  ;;  %v7124_v6 = vld [vmem:[#allocation57_spill] sm:$0xff]  ;;  %v7125_v58 = vld [vmem:[#allocation58_spill] sm:$0xff] }
 0x671   :  { %4554 = vmatprep.subr.bf16.mxu0 %v7115_v3  ;;  %4618 = vmatprep.subr.bf16.mxu1 %v7116_v41  ;;  %v7126_v3 = vld [vmem:[#allocation59_spill] sm:$0xff]  ;;  %v7127_v41 = vld [vmem:[#allocation60_spill] sm:$0xff] }
 0x674   :  { %4556 = vmatpush1.bf16.msra.mxu0 %v7117_v62  ;;  %4620 = vmatpush1.bf16.msra.mxu1 %v7118_v23  ;;  %v7128_v62 = vld [vmem:[#allocation61_spill] sm:$0xff]  ;;  %v7129_v23 = vld [vmem:[#allocation62_spill] sm:$0xff] }
 0x675   :  { %4558 = vmatprep.subr.bf16.mxu0 %v7119_v5  ;;  %4622 = vmatprep.subr.bf16.mxu1 %v7120_v49  ;;  %v7130_v5 = vld [vmem:[#allocation63_spill] sm:$0xff]  ;;  %v7131_v49 = vld [vmem:[#allocation64_spill] sm:$0xff] }
 0x678   :  { %4560 = vmatpush1.bf16.msra.mxu0 %v7121_v47  ;;  %4624 = vmatpush1.bf16.msra.mxu1 %v7122_v14  ;;  %v7132_v47 = vld [vmem:[#allocation65_spill] sm:$0xff]  ;;  %v7133_v14 = vld [vmem:[#allocation66_spill] sm:$0xff] }
 0x679   :  { %4562 = vmatprep.subr.bf16.mxu0 %v7123_v8  ;;  %4626 = vmatprep.subr.bf16.mxu1 %v7124_v6  ;;  %v7134_v8 = vld [vmem:[#allocation67_spill] sm:$0xff]  ;;  %v7135_v6 = vld [vmem:[#allocation68_spill] sm:$0xff] }
 0x67c   :  { %4564 = vmatpush1.bf16.msra.mxu0 %v7125_v58  ;;  %4628 = vmatpush1.bf16.msra.mxu1 %v7126_v3  ;;  %v7136_v58 = vld [vmem:[#allocation69_spill] sm:$0xff]  ;;  %v7137_v3 = vld [vmem:[#allocation70_spill] sm:$0xff] }
 0x67d   :  { %4566 = vmatprep.subr.bf16.mxu0 %v7127_v41  ;;  %4630 = vmatprep.subr.bf16.mxu1 %v7128_v62  ;;  %v7138_v41 = vld [vmem:[#allocation71_spill] sm:$0xff]  ;;  %v7139_v62 = vld [vmem:[#allocation16_spill] sm:$0xff] }
 0x680   :  { %4568 = vmatpush1.bf16.msra.mxu0 %v7129_v23  ;;  %4632 = vmatpush1.bf16.msra.mxu1 %v7130_v5  ;;  %v7140_v23 = vld [vmem:[#allocation17_spill] sm:$0xff] }
 0x681   :  { %4570 = vmatprep.subr.bf16.mxu0 %v7131_v49  ;;  %4634 = vmatprep.subr.bf16.mxu1 %v7132_v47 }
 0x684   :  { %4572 = vmatpush1.bf16.msra.mxu0 %v7133_v14  ;;  %4636 = vmatpush1.bf16.msra.mxu1 %v7134_v8 }
 0x685   :  { %4574 = vmatprep.subr.bf16.mxu0 %v7135_v6  ;;  %4638 = vmatprep.subr.bf16.mxu1 %v7136_v58  ;;  %v7142_v58 = vld [vmem:[#allocation72_spill] sm:$0xff] }
 0x688   :  { %4576 = vmatpush1.bf16.msra.mxu0 %v7137_v3  ;;  %4640 = vmatpush1.bf16.msra.mxu1 %v7138_v41  ;;  %v7143_v41 = vld [vmem:[#allocation73_spill] sm:$0xff] }
 0x689   :  { %4642 = vmatprep.subr.bf16.mxu0 %v7139_v62  ;;  %4674 = vmatprep.subr.bf16.mxu1 %v7140_v23 }
 0x6fe   :  { %v2049_v5 = vpop.f32.mrb[18].mxu0  ;;  %v2120_v49 = vpop.f32.mrb[18].mxu1 }
 0x6ff   :  { %v2050_v47 = vadd.f32 %v2049_v5, %v7141_v59  ;;  %v2051_v33 = vpop.f32.mrb[19].mxu0  ;;  %v2122_v14 = vpop.f32.mrb[19].mxu1  ;;  %v2121_v48 = vadd.f32 %v2120_v49, %v7143_v41 }
 0x700   :  { %v2052_v8 = vadd.f32 %v2051_v33, %v5954_v4  ;;  %v2123_v3 = vadd.f32 %v2122_v14, %v7142_v58 }
 0x701   :  { %v3415_v0 = vmul.f32 -1.442695, %v2050_v47 }
 0x702   :  { %v3416_v6 = vmul.f32 -1.442695, %v2052_v8  ;;  %v3417_v46 = vmul.f32 -1.442695, %v2123_v3 }
 0x703   :  { %5206 = vpow2.f32 %v3415_v0 }
 0x704   :  { %5208 = vpow2.f32 %v3416_v6 }
 0x705   :  { %5210 = vpow2.f32 %v3417_v46 }
 0x706   :  { %5212 = vtanh.f32 %v2121_v48 }
 0x70d   :  { %v5207_v62 = vpop.eup %5206 }
 0x70e   :  { %v5209_v45 = vpop.eup %5208  ;;  %v2128_v23 = vadd.f32 1.0, %v5207_v62 }
 0x70f   :  { %v2134_v61 = vadd.f32 1.0, %v5209_v45  ;;  %v5211_v5 = vpop.eup %5210 }
 0x710   :  { %5214 = vrcp.f32 %v2128_v23  ;;  %v5213_v59 = vpop.eup %5212  ;;  %v2141_v0 = vadd.f32 1.0, %v5211_v5 }
 0x711   :  { %5216 = vrcp.f32 %v2134_v61 }
 0x712   :  { %5218 = vrcp.f32 %v2141_v0 }
 0x71a   :  { %v5215_v33 = vpop.eup %5214 }
 0x71b   :  { %v5217_v47 = vpop.eup %5216  ;;  %v2145_v8 = vmul.f32 %v5215_v33, %v5213_v59  ;;  %v2151_v59 = vld [vmem:[#allocation3 + $0x5] ss:$8 sm:$0xf] }
 0x71c   :  { %v2144_v6 = vmul.f32 %v5217_v47, %v6305_v56  ;;  %v5219_v33 = vpop.eup %5218 }
 0x71e   :  { %v2218_v14 = vpop.f32.mrb[20].mxu0  ;;  %v2289_v3 = vpop.f32.mrb[20].mxu1  ;;  %v6418_v58 = vadd.f32 %v2145_v8, %v2144_v6 }
 0x71f   :  { %v2220_v49 = vpop.f32.mrb[21].mxu0  ;;  %v2291_v62 = vpop.f32.mrb[21].mxu1 }
 0x720   :  { %v2298_v46 = vcombine.low %v2218_v14, %v2220_v49  ;;  %v2299_v48 = vcombine.low %v2289_v3, %v2291_v62  ;;  %5220 = vtanh.f32 %v6418_v58 }
 0x722   :  { %v2306_v61 = vrot.slane %v2298_v46, %v5841_v24  ;;  %v2313_v45 = vrot.slane %v2299_v48, %v5841_v24 }
 0x724   :  { %v2314_v23 = vcombine.low %v2306_v61, %v2313_v45 }
 0x726   :  { %v2321_v5 = vrot.slane %v2314_v23, %v5841_v24 }
 0x728   :  { %v2323_v56 = vadd.f32 %v2321_v5, %v2151_v59 }
 0x72a   :  { %v5221_v47 = vpop.eup %5220  ;;  %v3418_v8 = vmul.f32 -1.442695, %v2323_v56  ;;  %v2331_v6 = vrot.slane %v2323_v56, 1  ;;  %v2342_v14 = vrot.slane %v2323_v56, 3  ;;  %v2339_v62 = vrot.slane %v2323_v56, 2 }
 0x72b   :  { %v2148_v0 = vmul.f32 %v5221_v47, %v5219_v33 }
 0x72c   :  { %5222 = vpow2.f32 %v3418_v8  ;;  %v3419_v41 = vmul.f32 -1.442695, %v2331_v6  ;;  %v3420_v3 = vmul.f32 -1.442695, %v2342_v14  ;;  %v7145_v14 = vld [vmem:[#allocation20_spill] sm:$0xff] }
 0x72d   :  { %2149 = vst [vmem:[#allocation2 + $0x4] sm:$0x1] %v2148_v0  ;;  %2419 = vmatprep.mubr.f32.mxu0 %v2148_v0  ;;  %2490 = vmatprep.mubr.f32.mxu1 %v2148_v0 }
 0x72e   :  { %5224 = vpow2.f32 %v3419_v41 }
 0x72f   :  { %5226 = vpow2.f32 %v3420_v3  ;;  %v7146_v3 = vld [vmem:[#allocation21_spill] sm:$0xff] }
 0x736   :  { %v5223_v49 = vpop.eup %5222 }
 0x737   :  { %v2327_v46 = vadd.f32 1.0, %v5223_v49  ;;  %v7147_v49 = vld [vmem:[#allocation22_spill] sm:$0xff] }
 0x738   :  { %v5225_v48 = vpop.eup %5224 }
 0x739   :  { %5228 = vrcp.f32 %v2327_v46  ;;  %v2336_v61 = vadd.f32 1.0, %v5225_v48  ;;  %v5227_v45 = vpop.eup %5226  ;;  %v7149_v46 = vld [vmem:[#allocation24_spill] sm:$0xff]  ;;  %v7150_v48 = vld [vmem:[#allocation25_spill] sm:$0xff] }
 0x73a   :  { %5230 = vtanh.f32 %v2339_v62  ;;  %v2347_v33 = vadd.f32 1.0, %v5227_v45  ;;  %v7148_v62 = vld [vmem:[#allocation23_spill] sm:$0xff] }
 0x73b   :  { %5232 = vrcp.f32 %v2336_v61  ;;  %v7151_v61 = vld [vmem:[#allocation26_spill] sm:$0xff]  ;;  %v7152_v45 = vld [vmem:[#allocation27_spill] sm:$0xff] }
 0x73c   :  { %5234 = vrcp.f32 %v2347_v33  ;;  %v7156_v33 = vld [vmem:[#allocation31_spill] sm:$0xff] }
 0x743   :  { %v5229_v23 = vpop.eup %5228 }
 0x744   :  { %v5231_v59 = vpop.eup %5230 }
 0x745   :  { %v5233_v5 = vpop.eup %5232  ;;  %v2351_v8 = vmul.f32 %v5231_v59, %v5229_v23  ;;  %v7153_v23 = vld [vmem:[#allocation28_spill] sm:$0xff]  ;;  %v7154_v59 = vld [vmem:[#allocation29_spill] sm:$0xff] }
 0x746   :  { %v2350_v47 = vmul.f32 %v5233_v5, %v6312_v32  ;;  %v5235_v56 = vpop.eup %5234  ;;  %v7144_v32 = vld [vmem:[#allocation19_spill] sm:$0xff]  ;;  %v7155_v5 = vld [vmem:[#allocation30_spill] sm:$0xff] }
 0x748   :  { %v6425_v41 = vadd.f32 %v2351_v8, %v2350_v47  ;;  %v7157_v47 = vld [vmem:[#allocation32_spill] sm:$0xff]  ;;  %v7158_v8 = vld [vmem:[#allocation33_spill] sm:$0xff] }
 0x74a   :  { %5236 = vtanh.f32 %v6425_v41 }
 0x754   :  { %v5237_v6 = vpop.eup %5236 }
 0x755   :  { %v2354_v0 = vmul.f32 %v5237_v6, %v5235_v56  ;;  %v7159_v56 = vld [vmem:[#allocation34_spill] sm:$0xff]  ;;  %v7160_v6 = vld [vmem:[#allocation35_spill] sm:$0xff] }
 0x757   :  { %2420 = vmatmul.mubr.f32.vlgmr.msra.gmra.mrb[22].mxu0 %v2354_v0  ;;  %2491 = vmatmul.mubr.f32.vlgmr.msra.gmra.mrb[22].mxu1 %v2354_v0 }
 0x758   :  { %4644 = vmatpush1.bf16.msra.mxu0 %v5548_v9  ;;  %4676 = vmatpush1.bf16.msra.mxu1 %v5551_v13 }
 0x759   :  { %4646 = vmatprep.subr.bf16.mxu0 %v5555_v17  ;;  %4678 = vmatprep.subr.bf16.mxu1 %v5557_v18 }
 0x75a   :  { %2588 = vmatprep.mubr.f32.mxu0 %v6856_v15  ;;  %2659 = vmatprep.mubr.f32.mxu1 %v6856_v15 }
 0x75c   :  { %4648 = vmatpush1.bf16.msra.mxu0 %v5560_v22  ;;  %4680 = vmatpush1.bf16.msra.mxu1 %v5564_v26 }
 0x75d   :  { %4650 = vmatprep.subr.bf16.mxu0 %v5566_v27  ;;  %4682 = vmatprep.subr.bf16.mxu1 %v5568_v31 }
 0x760   :  { %4652 = vmatpush1.bf16.msra.mxu0 %v5571_v35  ;;  %4684 = vmatpush1.bf16.msra.mxu1 %v5575_v39 }
 0x761   :  { %4654 = vmatprep.subr.bf16.mxu0 %v5577_v40  ;;  %4686 = vmatprep.subr.bf16.mxu1 %v5580_v44 }
 0x764   :  { %4656 = vmatpush1.bf16.msra.mxu0 %v5583_v51  ;;  %4688 = vmatpush1.bf16.msra.mxu1 %v5587_v52 }
 0x765   :  { %4658 = vmatprep.subr.bf16.mxu0 %v5589_v53  ;;  %4690 = vmatprep.subr.bf16.mxu1 %v5592_v57 }
 0x768   :  { %4660 = vmatpush1.bf16.msra.mxu0 %v5595_v63  ;;  %4692 = vmatpush1.bf16.msra.mxu1 %v5599_v1 }
 0x769   :  { %4662 = vmatprep.subr.bf16.mxu0 %v5601_v2  ;;  %4694 = vmatprep.subr.bf16.mxu1 %v5604_v7 }
 0x76c   :  { %4664 = vmatpush1.bf16.msra.mxu0 %v5607_v16  ;;  %4696 = vmatpush1.bf16.msra.mxu1 %v5611_v19 }
 0x76d   :  { %4666 = vmatprep.subr.bf16.mxu0 %v5613_v20  ;;  %4698 = vmatprep.subr.bf16.mxu1 %v5616_v25 }
 0x770   :  { %4668 = vmatpush1.bf16.msra.mxu0 %v5619_v34  ;;  %4700 = vmatpush1.bf16.msra.mxu1 %v5623_v36 }
 0x771   :  { %4670 = vmatprep.subr.bf16.mxu0 %v5625_v37  ;;  %4702 = vmatprep.subr.bf16.mxu1 %v5628_v43 }
 0x774   :  { %4672 = vmatpush1.bf16.msra.mxu0 %v5631_v50  ;;  %4704 = vmatpush1.bf16.msra.mxu1 %v5635_v54 }
 0x775   :  { %4706 = vmatprep.subr.bf16.mxu0 %v5637_v55  ;;  %4770 = vmatprep.subr.bf16.mxu1 %v5640_v60 }
 0x777   :  { %2589 = vmatmul.mubr.f32.vlgmr.msra.gmra.mrb[24].mxu0 %v2354_v0  ;;  %2660 = vmatmul.mubr.f32.vlgmr.msra.gmra.mrb[24].mxu1 %v2354_v0  ;;  %v7161_v0 = vld [vmem:[#allocation36_spill] sm:$0xff] }
 0x778   :  { %4708 = vmatpush1.bf16.msra.mxu0 %v5643_v10  ;;  %4772 = vmatpush1.bf16.msra.mxu1 %v5647_v11 }
 0x779   :  { %4710 = vmatprep.subr.bf16.mxu0 %v5649_v12  ;;  %4774 = vmatprep.subr.bf16.mxu1 %v5652_v21 }
 0x77c   :  { %4712 = vmatpush1.bf16.msra.mxu0 %v5657_v28  ;;  %4776 = vmatpush1.bf16.msra.mxu1 %v5661_v29 }
 0x77d   :  { %4714 = vmatprep.subr.bf16.mxu0 %v5668_v38  ;;  %4778 = vmatprep.subr.bf16.mxu1 %v5670_v42 }
 0x780   :  { %4716 = vmatpush1.bf16.msra.mxu0 %v6857_v30  ;;  %4780 = vmatpush1.bf16.msra.mxu1 %v7144_v32 }
 0x781   :  { %4718 = vmatprep.subr.bf16.mxu0 %v7145_v14  ;;  %4782 = vmatprep.subr.bf16.mxu1 %v7146_v3 }
 0x784   :  { %4720 = vmatpush1.bf16.msra.mxu0 %v7147_v49  ;;  %4784 = vmatpush1.bf16.msra.mxu1 %v7148_v62 }
 0x785   :  { %4722 = vmatprep.subr.bf16.mxu0 %v7149_v46  ;;  %4786 = vmatprep.subr.bf16.mxu1 %v7150_v48  ;;  %v7199_v48 = vld [vmem:[#allocation18_spill] sm:$0xff] }
 0x788   :  { %4724 = vmatpush1.bf16.msra.mxu0 %v7151_v61  ;;  %4788 = vmatpush1.bf16.msra.mxu1 %v7152_v45  ;;  %v7162_v61 = vld [vmem:[#allocation37_spill] sm:$0xff]  ;;  %v7163_v45 = vld [vmem:[#allocation38_spill] sm:$0xff] }
 0x789   :  { %4726 = vmatprep.subr.bf16.mxu0 %v7153_v23  ;;  %4790 = vmatprep.subr.bf16.mxu1 %v7154_v59  ;;  %v7164_v23 = vld [vmem:[#allocation39_spill] sm:$0xff]  ;;  %v7165_v59 = vld [vmem:[#allocation40_spill] sm:$0xff] }
 0x78c   :  { %4728 = vmatpush1.bf16.msra.mxu0 %v7155_v5  ;;  %4792 = vmatpush1.bf16.msra.mxu1 %v7156_v33  ;;  %v7166_v5 = vld [vmem:[#allocation41_spill] sm:$0xff]  ;;  %v7167_v33 = vld [vmem:[#allocation42_spill] sm:$0xff] }
 0x78d   :  { %4730 = vmatprep.subr.bf16.mxu0 %v7157_v47  ;;  %4794 = vmatprep.subr.bf16.mxu1 %v7158_v8  ;;  %v7168_v47 = vld [vmem:[#allocation43_spill] sm:$0xff]  ;;  %v7169_v8 = vld [vmem:[#allocation44_spill] sm:$0xff] }
 0x790   :  { %4732 = vmatpush1.bf16.msra.mxu0 %v7159_v56  ;;  %4796 = vmatpush1.bf16.msra.mxu1 %v7160_v6  ;;  %v7170_v56 = vld [vmem:[#allocation45_spill] sm:$0xff]  ;;  %v7171_v6 = vld [vmem:[#allocation46_spill] sm:$0xff] }
 0x791   :  { %4734 = vmatprep.subr.bf16.mxu0 %v7161_v0  ;;  %4798 = vmatprep.subr.bf16.mxu1 %v7162_v61  ;;  %v7172_v0 = vld [vmem:[#allocation47_spill] sm:$0xff]  ;;  %v7173_v61 = vld [vmem:[#allocation48_spill] sm:$0xff] }
 0x794   :  { %4736 = vmatpush1.bf16.msra.mxu0 %v7163_v45  ;;  %4800 = vmatpush1.bf16.msra.mxu1 %v7164_v23  ;;  %v7174_v45 = vld [vmem:[#allocation49_spill] sm:$0xff]  ;;  %v7175_v23 = vld [vmem:[#allocation50_spill] sm:$0xff] }
 0x795   :  { %4738 = vmatprep.subr.bf16.mxu0 %v7165_v59  ;;  %4802 = vmatprep.subr.bf16.mxu1 %v7166_v5  ;;  %v7176_v59 = vld [vmem:[#allocation51_spill] sm:$0xff]  ;;  %v7177_v5 = vld [vmem:[#allocation52_spill] sm:$0xff] }
 0x798   :  { %4740 = vmatpush1.bf16.msra.mxu0 %v7167_v33  ;;  %4804 = vmatpush1.bf16.msra.mxu1 %v7168_v47  ;;  %v7178_v33 = vld [vmem:[#allocation53_spill] sm:$0xff]  ;;  %v7179_v47 = vld [vmem:[#allocation54_spill] sm:$0xff] }
 0x799   :  { %4742 = vmatprep.subr.bf16.mxu0 %v7169_v8  ;;  %4806 = vmatprep.subr.bf16.mxu1 %v7170_v56  ;;  %v7180_v8 = vld [vmem:[#allocation55_spill] sm:$0xff]  ;;  %v7181_v56 = vld [vmem:[#allocation56_spill] sm:$0xff] }
 0x79c   :  { %4744 = vmatpush1.bf16.msra.mxu0 %v7171_v6  ;;  %4808 = vmatpush1.bf16.msra.mxu1 %v7172_v0  ;;  %v7182_v6 = vld [vmem:[#allocation57_spill] sm:$0xff]  ;;  %v7183_v0 = vld [vmem:[#allocation58_spill] sm:$0xff] }
 0x79d   :  { %4746 = vmatprep.subr.bf16.mxu0 %v7173_v61  ;;  %4810 = vmatprep.subr.bf16.mxu1 %v7174_v45  ;;  %v7184_v61 = vld [vmem:[#allocation59_spill] sm:$0xff]  ;;  %v7185_v45 = vld [vmem:[#allocation60_spill] sm:$0xff] }
 0x7a0   :  { %4748 = vmatpush1.bf16.msra.mxu0 %v7175_v23  ;;  %4812 = vmatpush1.bf16.msra.mxu1 %v7176_v59  ;;  %v7186_v23 = vld [vmem:[#allocation61_spill] sm:$0xff]  ;;  %v7187_v59 = vld [vmem:[#allocation62_spill] sm:$0xff] }
 0x7a1   :  { %4750 = vmatprep.subr.bf16.mxu0 %v7177_v5  ;;  %4814 = vmatprep.subr.bf16.mxu1 %v7178_v33  ;;  %v7188_v5 = vld [vmem:[#allocation63_spill] sm:$0xff]  ;;  %v7189_v33 = vld [vmem:[#allocation64_spill] sm:$0xff] }
 0x7a4   :  { %4752 = vmatpush1.bf16.msra.mxu0 %v7179_v47  ;;  %4816 = vmatpush1.bf16.msra.mxu1 %v7180_v8  ;;  %v7190_v47 = vld [vmem:[#allocation65_spill] sm:$0xff]  ;;  %v7191_v8 = vld [vmem:[#allocation66_spill] sm:$0xff] }
 0x7a5   :  { %4754 = vmatprep.subr.bf16.mxu0 %v7181_v56  ;;  %4818 = vmatprep.subr.bf16.mxu1 %v7182_v6  ;;  %v7192_v56 = vld [vmem:[#allocation67_spill] sm:$0xff]  ;;  %v7193_v6 = vld [vmem:[#allocation68_spill] sm:$0xff] }
 0x7a8   :  { %4756 = vmatpush1.bf16.msra.mxu0 %v7183_v0  ;;  %4820 = vmatpush1.bf16.msra.mxu1 %v7184_v61  ;;  %v7194_v0 = vld [vmem:[#allocation69_spill] sm:$0xff]  ;;  %v7195_v61 = vld [vmem:[#allocation70_spill] sm:$0xff] }
 0x7a9   :  { %4758 = vmatprep.subr.bf16.mxu0 %v7185_v45  ;;  %4822 = vmatprep.subr.bf16.mxu1 %v7186_v23  ;;  %v7196_v45 = vld [vmem:[#allocation71_spill] sm:$0xff]  ;;  %v7197_v23 = vld [vmem:[#allocation16_spill] sm:$0xff] }
 0x7ac   :  { %4760 = vmatpush1.bf16.msra.mxu0 %v7187_v59  ;;  %4824 = vmatpush1.bf16.msra.mxu1 %v7188_v5  ;;  %v7198_v59 = vld [vmem:[#allocation17_spill] sm:$0xff] }
 0x7ad   :  { %4762 = vmatprep.subr.bf16.mxu0 %v7189_v33  ;;  %4826 = vmatprep.subr.bf16.mxu1 %v7190_v47 }
 0x7b0   :  { %4764 = vmatpush1.bf16.msra.mxu0 %v7191_v8  ;;  %4828 = vmatpush1.bf16.msra.mxu1 %v7192_v56 }
 0x7b1   :  { %4766 = vmatprep.subr.bf16.mxu0 %v7193_v6  ;;  %4830 = vmatprep.subr.bf16.mxu1 %v7194_v0  ;;  %v7200_v0 = vld [vmem:[#allocation72_spill] sm:$0xff] }
 0x7b4   :  { %4768 = vmatpush1.bf16.msra.mxu0 %v7195_v61  ;;  %4832 = vmatpush1.bf16.msra.mxu1 %v7196_v45  ;;  %v7201_v45 = vld [vmem:[#allocation73_spill] sm:$0xff] }
 0x7b5   :  { %4834 = vmatprep.subr.bf16.mxu0 %v7197_v23  ;;  %4866 = vmatprep.subr.bf16.mxu1 %v7198_v59 }
 0x82a   :  { %v2421_v5 = vpop.f32.mrb[22].mxu0  ;;  %v2492_v33 = vpop.f32.mrb[22].mxu1 }
 0x82b   :  { %v2422_v47 = vadd.f32 %v2421_v5, %v7199_v48  ;;  %v2423_v46 = vpop.f32.mrb[23].mxu0  ;;  %v2494_v8 = vpop.f32.mrb[23].mxu1  ;;  %v2493_v3 = vadd.f32 %v2492_v33, %v7201_v45 }
 0x82c   :  { %v2424_v56 = vadd.f32 %v2423_v46, %v5954_v4  ;;  %v2495_v61 = vadd.f32 %v2494_v8, %v7200_v0 }
 0x82d   :  { %v3421_v62 = vmul.f32 -1.442695, %v2422_v47 }
 0x82e   :  { %v3422_v6 = vmul.f32 -1.442695, %v2424_v56  ;;  %v3423_v49 = vmul.f32 -1.442695, %v2495_v61 }
 0x82f   :  { %5238 = vpow2.f32 %v3421_v62 }
 0x830   :  { %5240 = vpow2.f32 %v3422_v6 }
 0x831   :  { %5242 = vpow2.f32 %v3423_v49 }
 0x832   :  { %5244 = vtanh.f32 %v2493_v3 }
 0x839   :  { %v5239_v23 = vpop.eup %5238 }
 0x83a   :  { %v5241_v14 = vpop.eup %5240  ;;  %v2500_v59 = vadd.f32 1.0, %v5239_v23 }
 0x83b   :  { %v2506_v32 = vadd.f32 1.0, %v5241_v14  ;;  %v5243_v5 = vpop.eup %5242 }
 0x83c   :  { %5246 = vrcp.f32 %v2500_v59  ;;  %v5245_v48 = vpop.eup %5244  ;;  %v2513_v62 = vadd.f32 1.0, %v5243_v5 }
 0x83d   :  { %5248 = vrcp.f32 %v2506_v32 }
 0x83e   :  { %5250 = vrcp.f32 %v2513_v62 }
 0x846   :  { %v5247_v46 = vpop.eup %5246 }
 0x847   :  { %v5249_v47 = vpop.eup %5248  ;;  %v2517_v56 = vmul.f32 %v5247_v46, %v5245_v48  ;;  %v2523_v48 = vld [vmem:[#allocation3 + $0x6] ss:$8 sm:$0xf] }
 0x848   :  { %v2516_v6 = vmul.f32 %v5249_v47, %v6418_v58  ;;  %v5251_v46 = vpop.eup %5250 }
 0x84a   :  { %v2590_v8 = vpop.f32.mrb[24].mxu0  ;;  %v2661_v61 = vpop.f32.mrb[24].mxu1  ;;  %v6531_v0 = vadd.f32 %v2517_v56, %v2516_v6 }
 0x84b   :  { %v2592_v33 = vpop.f32.mrb[25].mxu0  ;;  %v2663_v23 = vpop.f32.mrb[25].mxu1 }
 0x84c   :  { %v2670_v49 = vcombine.low %v2590_v8, %v2592_v33  ;;  %v2671_v3 = vcombine.low %v2661_v61, %v2663_v23  ;;  %5252 = vtanh.f32 %v6531_v0 }
 0x84e   :  { %v2678_v32 = vrot.slane %v2670_v49, %v5841_v24  ;;  %v2685_v14 = vrot.slane %v2671_v3, %v5841_v24 }
 0x850   :  { %v2686_v59 = vcombine.low %v2678_v32, %v2685_v14 }
 0x852   :  { %v2693_v5 = vrot.slane %v2686_v59, %v5841_v24 }
 0x854   :  { %v2695_v58 = vadd.f32 %v2693_v5, %v2523_v48 }
 0x856   :  { %v5253_v47 = vpop.eup %5252  ;;  %v3424_v56 = vmul.f32 -1.442695, %v2695_v58  ;;  %v2703_v6 = vrot.slane %v2695_v58, 1  ;;  %v2714_v8 = vrot.slane %v2695_v58, 3  ;;  %v2711_v23 = vrot.slane %v2695_v58, 2 }
 0x857   :  { %v2520_v62 = vmul.f32 %v5253_v47, %v5251_v46 }
 0x858   :  { %5254 = vpow2.f32 %v3424_v56  ;;  %v3425_v45 = vmul.f32 -1.442695, %v2703_v6  ;;  %v3426_v61 = vmul.f32 -1.442695, %v2714_v8  ;;  %v7244_v8 = vld [vmem:[#allocation61_spill] sm:$0xff] }
 0x859   :  { %2521 = vst [vmem:[#allocation2 + $0x5] sm:$0x1] %v2520_v62  ;;  %2791 = vmatprep.mubr.f32.mxu0 %v2520_v62  ;;  %2862 = vmatprep.mubr.f32.mxu1 %v2520_v62 }
 0x85a   :  { %5256 = vpow2.f32 %v3425_v45 }
 0x85b   :  { %5258 = vpow2.f32 %v3426_v61  ;;  %v7245_v61 = vld [vmem:[#allocation62_spill] sm:$0xff] }
 0x862   :  { %v5255_v33 = vpop.eup %5254 }
 0x863   :  { %v2699_v49 = vadd.f32 1.0, %v5255_v33  ;;  %v7246_v33 = vld [vmem:[#allocation63_spill] sm:$0xff] }
 0x864   :  { %v5257_v3 = vpop.eup %5256 }
 0x865   :  { %5260 = vrcp.f32 %v2699_v49  ;;  %v2708_v32 = vadd.f32 1.0, %v5257_v3  ;;  %v5259_v14 = vpop.eup %5258  ;;  %v7248_v49 = vld [vmem:[#allocation65_spill] sm:$0xff]  ;;  %v7249_v3 = vld [vmem:[#allocation66_spill] sm:$0xff] }
 0x866   :  { %5262 = vtanh.f32 %v2711_v23  ;;  %v2719_v46 = vadd.f32 1.0, %v5259_v14  ;;  %v7247_v23 = vld [vmem:[#allocation64_spill] sm:$0xff] }
 0x867   :  { %5264 = vrcp.f32 %v2708_v32  ;;  %v7250_v32 = vld [vmem:[#allocation67_spill] sm:$0xff]  ;;  %v7251_v14 = vld [vmem:[#allocation68_spill] sm:$0xff] }
 0x868   :  { %5266 = vrcp.f32 %v2719_v46 }
 0x86f   :  { %v5261_v59 = vpop.eup %5260 }
 0x870   :  { %v5263_v48 = vpop.eup %5262 }
 0x871   :  { %v5265_v5 = vpop.eup %5264  ;;  %v2723_v56 = vmul.f32 %v5263_v48, %v5261_v59  ;;  %v7252_v59 = vld [vmem:[#allocation69_spill] sm:$0xff]  ;;  %v7253_v48 = vld [vmem:[#allocation70_spill] sm:$0xff] }
 0x872   :  { %v2722_v47 = vmul.f32 %v5265_v5, %v6425_v41  ;;  %v5267_v58 = vpop.eup %5266  ;;  %v7243_v41 = vld [vmem:[#allocation60_spill] sm:$0xff]  ;;  %v7254_v5 = vld [vmem:[#allocation71_spill] sm:$0xff] }
 0x874   :  { %v6538_v45 = vadd.f32 %v2723_v56, %v2722_v47  ;;  %v7255_v56 = vld [vmem:[#allocation18_spill] sm:$0xff] }
 0x876   :  { %5268 = vtanh.f32 %v6538_v45 }
 0x880   :  { %v5269_v6 = vpop.eup %5268 }
 0x881   :  { %v2726_v62 = vmul.f32 %v5269_v6, %v5267_v58 }
 0x883   :  { %2792 = vmatmul.mubr.f32.vlgmr.msra.gmra.mrb[26].mxu0 %v2726_v62  ;;  %2863 = vmatmul.mubr.f32.vlgmr.msra.gmra.mrb[26].mxu1 %v2726_v62 }
 0x884   :  { %4836 = vmatpush1.bf16.msra.mxu0 %v5548_v9  ;;  %4868 = vmatpush1.bf16.msra.mxu1 %v5551_v13  ;;  %v7202_v9 = vld [vmem:[#allocation19_spill] sm:$0xff]  ;;  %v7203_v13 = vld [vmem:[#allocation20_spill] sm:$0xff] }
 0x885   :  { %4838 = vmatprep.subr.bf16.mxu0 %v5555_v17  ;;  %4870 = vmatprep.subr.bf16.mxu1 %v5557_v18  ;;  %v7204_v17 = vld [vmem:[#allocation21_spill] sm:$0xff]  ;;  %v7205_v18 = vld [vmem:[#allocation22_spill] sm:$0xff] }
 0x886   :  { %2960 = vmatprep.mubr.f32.mxu0 %v6856_v15  ;;  %3031 = vmatprep.mubr.f32.mxu1 %v6856_v15 }
 0x888   :  { %4840 = vmatpush1.bf16.msra.mxu0 %v5560_v22  ;;  %4872 = vmatpush1.bf16.msra.mxu1 %v5564_v26  ;;  %v7206_v22 = vld [vmem:[#allocation23_spill] sm:$0xff]  ;;  %v7207_v26 = vld [vmem:[#allocation24_spill] sm:$0xff] }
 0x889   :  { %4842 = vmatprep.subr.bf16.mxu0 %v5566_v27  ;;  %4874 = vmatprep.subr.bf16.mxu1 %v5568_v31  ;;  %v7208_v27 = vld [vmem:[#allocation25_spill] sm:$0xff]  ;;  %v7209_v31 = vld [vmem:[#allocation26_spill] sm:$0xff] }
 0x88c   :  { %4844 = vmatpush1.bf16.msra.mxu0 %v5571_v35  ;;  %4876 = vmatpush1.bf16.msra.mxu1 %v5575_v39  ;;  %v7210_v35 = vld [vmem:[#allocation27_spill] sm:$0xff]  ;;  %v7211_v39 = vld [vmem:[#allocation28_spill] sm:$0xff] }
 0x88d   :  { %4846 = vmatprep.subr.bf16.mxu0 %v5577_v40  ;;  %4878 = vmatprep.subr.bf16.mxu1 %v5580_v44  ;;  %v7212_v40 = vld [vmem:[#allocation29_spill] sm:$0xff]  ;;  %v7213_v44 = vld [vmem:[#allocation30_spill] sm:$0xff] }
 0x890   :  { %4848 = vmatpush1.bf16.msra.mxu0 %v5583_v51  ;;  %4880 = vmatpush1.bf16.msra.mxu1 %v5587_v52  ;;  %v7214_v51 = vld [vmem:[#allocation31_spill] sm:$0xff]  ;;  %v7215_v52 = vld [vmem:[#allocation32_spill] sm:$0xff] }
 0x891   :  { %4850 = vmatprep.subr.bf16.mxu0 %v5589_v53  ;;  %4882 = vmatprep.subr.bf16.mxu1 %v5592_v57  ;;  %v7216_v53 = vld [vmem:[#allocation33_spill] sm:$0xff]  ;;  %v7217_v57 = vld [vmem:[#allocation34_spill] sm:$0xff] }
 0x894   :  { %4852 = vmatpush1.bf16.msra.mxu0 %v5595_v63  ;;  %4884 = vmatpush1.bf16.msra.mxu1 %v5599_v1  ;;  %v7218_v63 = vld [vmem:[#allocation35_spill] sm:$0xff]  ;;  %v7219_v1 = vld [vmem:[#allocation36_spill] sm:$0xff] }
 0x895   :  { %4854 = vmatprep.subr.bf16.mxu0 %v5601_v2  ;;  %4886 = vmatprep.subr.bf16.mxu1 %v5604_v7  ;;  %v7220_v2 = vld [vmem:[#allocation37_spill] sm:$0xff]  ;;  %v7221_v7 = vld [vmem:[#allocation38_spill] sm:$0xff] }
 0x898   :  { %4856 = vmatpush1.bf16.msra.mxu0 %v5607_v16  ;;  %4888 = vmatpush1.bf16.msra.mxu1 %v5611_v19  ;;  %v7222_v16 = vld [vmem:[#allocation39_spill] sm:$0xff]  ;;  %v7223_v19 = vld [vmem:[#allocation40_spill] sm:$0xff] }
 0x899   :  { %4858 = vmatprep.subr.bf16.mxu0 %v5613_v20  ;;  %4890 = vmatprep.subr.bf16.mxu1 %v5616_v25  ;;  %v7224_v20 = vld [vmem:[#allocation41_spill] sm:$0xff]  ;;  %v7225_v25 = vld [vmem:[#allocation42_spill] sm:$0xff] }
 0x89c   :  { %4860 = vmatpush1.bf16.msra.mxu0 %v5619_v34  ;;  %4892 = vmatpush1.bf16.msra.mxu1 %v5623_v36  ;;  %v7226_v34 = vld [vmem:[#allocation43_spill] sm:$0xff]  ;;  %v7227_v36 = vld [vmem:[#allocation44_spill] sm:$0xff] }
 0x89d   :  { %4862 = vmatprep.subr.bf16.mxu0 %v5625_v37  ;;  %4894 = vmatprep.subr.bf16.mxu1 %v5628_v43  ;;  %v7228_v37 = vld [vmem:[#allocation45_spill] sm:$0xff]  ;;  %v7229_v43 = vld [vmem:[#allocation46_spill] sm:$0xff] }
 0x8a0   :  { %4864 = vmatpush1.bf16.msra.mxu0 %v5631_v50  ;;  %4896 = vmatpush1.bf16.msra.mxu1 %v5635_v54  ;;  %v7230_v50 = vld [vmem:[#allocation47_spill] sm:$0xff]  ;;  %v7231_v54 = vld [vmem:[#allocation48_spill] sm:$0xff] }
 0x8a1   :  { %4898 = vmatprep.subr.bf16.mxu0 %v5637_v55  ;;  %4962 = vmatprep.subr.bf16.mxu1 %v5640_v60  ;;  %v7232_v55 = vld [vmem:[#allocation49_spill] sm:$0xff]  ;;  %v7233_v60 = vld [vmem:[#allocation50_spill] sm:$0xff] }
 0x8a3   :  { %2961 = vmatmul.mubr.f32.vlgmr.msra.gmra.mrb[28].mxu0 %v2726_v62  ;;  %3032 = vmatmul.mubr.f32.vlgmr.msra.gmra.mrb[28].mxu1 %v2726_v62 }
 0x8a4   :  { %4900 = vmatpush1.bf16.msra.mxu0 %v5643_v10  ;;  %4964 = vmatpush1.bf16.msra.mxu1 %v5647_v11  ;;  %v7234_v10 = vld [vmem:[#allocation51_spill] sm:$0xff]  ;;  %v7235_v11 = vld [vmem:[#allocation52_spill] sm:$0xff] }
 0x8a5   :  { %4902 = vmatprep.subr.bf16.mxu0 %v5649_v12  ;;  %4966 = vmatprep.subr.bf16.mxu1 %v5652_v21  ;;  %v7236_v12 = vld [vmem:[#allocation53_spill] sm:$0xff]  ;;  %v7237_v21 = vld [vmem:[#allocation54_spill] sm:$0xff] }
 0x8a8   :  { %4904 = vmatpush1.bf16.msra.mxu0 %v5657_v28  ;;  %4968 = vmatpush1.bf16.msra.mxu1 %v5661_v29  ;;  %v7238_v28 = vld [vmem:[#allocation55_spill] sm:$0xff]  ;;  %v7239_v29 = vld [vmem:[#allocation56_spill] sm:$0xff] }
 0x8a9   :  { %4906 = vmatprep.subr.bf16.mxu0 %v5668_v38  ;;  %4970 = vmatprep.subr.bf16.mxu1 %v5670_v42  ;;  %v7240_v38 = vld [vmem:[#allocation57_spill] sm:$0xff]  ;;  %v7241_v42 = vld [vmem:[#allocation58_spill] sm:$0xff] }
 0x8ac   :  { %4908 = vmatpush1.bf16.msra.mxu0 %v6857_v30  ;;  %4972 = vmatpush1.bf16.msra.mxu1 %v7202_v9  ;;  %v7242_v30 = vld [vmem:[#allocation59_spill] sm:$0xff] }
 0x8ad   :  { %4910 = vmatprep.subr.bf16.mxu0 %v7203_v13  ;;  %4974 = vmatprep.subr.bf16.mxu1 %v7204_v17 }
 0x8b0   :  { %4912 = vmatpush1.bf16.msra.mxu0 %v7205_v18  ;;  %4976 = vmatpush1.bf16.msra.mxu1 %v7206_v22  ;;  %v7256_v18 = vld [vmem:[#allocation72_spill] sm:$0xff] }
 0x8b1   :  { %4914 = vmatprep.subr.bf16.mxu0 %v7207_v26  ;;  %4978 = vmatprep.subr.bf16.mxu1 %v7208_v27  ;;  %v7257_v27 = vld [vmem:[#allocation73_spill] sm:$0xff] }
 0x8b4   :  { %4916 = vmatpush1.bf16.msra.mxu0 %v7209_v31  ;;  %4980 = vmatpush1.bf16.msra.mxu1 %v7210_v35 }
 0x8b5   :  { %4918 = vmatprep.subr.bf16.mxu0 %v7211_v39  ;;  %4982 = vmatprep.subr.bf16.mxu1 %v7212_v40 }
 0x8b8   :  { %4920 = vmatpush1.bf16.msra.mxu0 %v7213_v44  ;;  %4984 = vmatpush1.bf16.msra.mxu1 %v7214_v51 }
 0x8b9   :  { %4922 = vmatprep.subr.bf16.mxu0 %v7215_v52  ;;  %4986 = vmatprep.subr.bf16.mxu1 %v7216_v53 }
 0x8bc   :  { %4924 = vmatpush1.bf16.msra.mxu0 %v7217_v57  ;;  %4988 = vmatpush1.bf16.msra.mxu1 %v7218_v63 }
 0x8bd   :  { %4926 = vmatprep.subr.bf16.mxu0 %v7219_v1  ;;  %4990 = vmatprep.subr.bf16.mxu1 %v7220_v2 }
 0x8c0   :  { %4928 = vmatpush1.bf16.msra.mxu0 %v7221_v7  ;;  %4992 = vmatpush1.bf16.msra.mxu1 %v7222_v16 }
 0x8c1   :  { %4930 = vmatprep.subr.bf16.mxu0 %v7223_v19  ;;  %4994 = vmatprep.subr.bf16.mxu1 %v7224_v20 }
 0x8c4   :  { %4932 = vmatpush1.bf16.msra.mxu0 %v7225_v25  ;;  %4996 = vmatpush1.bf16.msra.mxu1 %v7226_v34 }
 0x8c5   :  { %4934 = vmatprep.subr.bf16.mxu0 %v7227_v36  ;;  %4998 = vmatprep.subr.bf16.mxu1 %v7228_v37 }
 0x8c8   :  { %4936 = vmatpush1.bf16.msra.mxu0 %v7229_v43  ;;  %5000 = vmatpush1.bf16.msra.mxu1 %v7230_v50 }
 0x8c9   :  { %4938 = vmatprep.subr.bf16.mxu0 %v7231_v54  ;;  %5002 = vmatprep.subr.bf16.mxu1 %v7232_v55  ;;  %v2895_v54 = vld [vmem:[#allocation3 + $0x7] ss:$8 sm:$0xf] }
 0x8cc   :  { %4940 = vmatpush1.bf16.msra.mxu0 %v7233_v60  ;;  %5004 = vmatpush1.bf16.msra.mxu1 %v7234_v10 }
 0x8cd   :  { %4942 = vmatprep.subr.bf16.mxu0 %v7235_v11  ;;  %5006 = vmatprep.subr.bf16.mxu1 %v7236_v12 }
 0x8d0   :  { %4944 = vmatpush1.bf16.msra.mxu0 %v7237_v21  ;;  %5008 = vmatpush1.bf16.msra.mxu1 %v7238_v28 }
 0x8d1   :  { %4946 = vmatprep.subr.bf16.mxu0 %v7239_v29  ;;  %5010 = vmatprep.subr.bf16.mxu1 %v7240_v38 }
 0x8d4   :  { %4948 = vmatpush1.bf16.msra.mxu0 %v7241_v42  ;;  %5012 = vmatpush1.bf16.msra.mxu1 %v7242_v30 }
 0x8d5   :  { %4950 = vmatprep.subr.bf16.mxu0 %v7243_v41  ;;  %5014 = vmatprep.subr.bf16.mxu1 %v7244_v8 }
 0x8d8   :  { %4952 = vmatpush1.bf16.msra.mxu0 %v7245_v61  ;;  %5016 = vmatpush1.bf16.msra.mxu1 %v7246_v33 }
 0x8d9   :  { %4954 = vmatprep.subr.bf16.mxu0 %v7247_v23  ;;  %5018 = vmatprep.subr.bf16.mxu1 %v7248_v49 }
 0x8dc   :  { %4956 = vmatpush1.bf16.msra.mxu0 %v7249_v3  ;;  %5020 = vmatpush1.bf16.msra.mxu1 %v7250_v32 }
 0x8dd   :  { %4958 = vmatprep.subr.bf16.mxu0 %v7251_v14  ;;  %5022 = vmatprep.subr.bf16.mxu1 %v7252_v59 }
 0x8e0   :  { %4960 = vmatpush1.bf16.msra.mxu0 %v7253_v48  ;;  %5024 = vmatpush1.bf16.msra.mxu1 %v7254_v5 }
 0x956   :  { %v2793_v46 = vpop.f32.mrb[26].mxu0  ;;  %v2864_v47 = vpop.f32.mrb[26].mxu1 }
 0x957   :  { %v2794_v58 = vadd.f32 %v2793_v46, %v7255_v56  ;;  %v2795_v6 = vpop.f32.mrb[27].mxu0  ;;  %v2866_v62 = vpop.f32.mrb[27].mxu1  ;;  %v2865_v31 = vadd.f32 %v2864_v47, %v7257_v27  ;;  %v3267_v47 = vld [vmem:[#allocation9] sm:$0xff] }
 0x958   :  { %v2796_v9 = vadd.f32 %v2795_v6, %v5954_v4  ;;  %v2867_v22 = vadd.f32 %v2866_v62, %v7256_v18  ;;  %v5450_v62 = vmov 0.0|0.0  }
 0x959   :  { %v3427_v13 = vmul.f32 -1.442695, %v2794_v58  ;;  %v3268_v58 = vld [vmem:[#allocation9 + $0x8] sm:$0xff]  ;;  %5025 = vmatprep.subr.bf16.mxu0 %v5450_v62 }
 0x95a   :  { %v3428_v17 = vmul.f32 -1.442695, %v2796_v9  ;;  %v3429_v26 = vmul.f32 -1.442695, %v2867_v22  ;;  %v5026_v6 = vpack.c.bf16 %v3268_v58, %v3267_v47  ;;  %v3269_v9 = vld [vmem:[#allocation9 + $0x10] sm:$0xff]  ;;  %v3272_v22 = vld [vmem:[#allocation9 + $0x28] sm:$0xff] }
 0x95b   :  { %5270 = vpow2.f32 %v3427_v13  ;;  %v3270_v13 = vld [vmem:[#allocation9 + $0x18] sm:$0xff] }
 0x95c   :  { %5272 = vpow2.f32 %v3428_v17  ;;  %v5029_v17 = vpack.c.bf16 %v3270_v13, %v3269_v9 }
 0x95d   :  { %5274 = vpow2.f32 %v3429_v26 }
 0x95e   :  { %5276 = vtanh.f32 %v2865_v31  ;;  %v3273_v31 = vld [vmem:[#allocation9 + $0x30] sm:$0xff] }
 0x965   :  { %v5271_v35 = vpop.eup %5270 }
 0x966   :  { %v5273_v39 = vpop.eup %5272  ;;  %v2872_v40 = vadd.f32 1.0, %v5271_v35  ;;  %v3274_v35 = vld [vmem:[#allocation9 + $0x38] sm:$0xff] }
 0x967   :  { %v2878_v44 = vadd.f32 1.0, %v5273_v39  ;;  %v5275_v51 = vpop.eup %5274  ;;  %v5035_v39 = vpack.c.bf16 %v3274_v35, %v3273_v31 }
 0x968   :  { %5278 = vrcp.f32 %v2872_v40  ;;  %v5277_v52 = vpop.eup %5276  ;;  %v2885_v1 = vadd.f32 1.0, %v5275_v51  ;;  %v3275_v40 = vld [vmem:[#allocation9 + $0x40] sm:$0xff] }
 0x969   :  { %5280 = vrcp.f32 %v2878_v44  ;;  %v3276_v44 = vld [vmem:[#allocation9 + $0x48] sm:$0xff] }
 0x96a   :  { %5282 = vrcp.f32 %v2885_v1  ;;  %v5038_v51 = vpack.c.bf16 %v3276_v44, %v3275_v40  ;;  %v3280_v1 = vld [vmem:[#allocation9 + $0x68] sm:$0xff] }
 0x972   :  { %v5279_v53 = vpop.eup %5278 }
 0x973   :  { %v5281_v57 = vpop.eup %5280  ;;  %v2889_v63 = vmul.f32 %v5279_v53, %v5277_v52  ;;  %v3277_v52 = vld [vmem:[#allocation9 + $0x50] sm:$0xff]  ;;  %v3278_v53 = vld [vmem:[#allocation9 + $0x58] sm:$0xff] }
 0x974   :  { %v2888_v2 = vmul.f32 %v5281_v57, %v6531_v0  ;;  %v5283_v60 = vpop.eup %5282  ;;  %v5041_v57 = vpack.c.bf16 %v3278_v53, %v3277_v52 }
 0x976   :  { %v2962_v7 = vpop.f32.mrb[28].mxu0  ;;  %v3033_v16 = vpop.f32.mrb[28].mxu1  ;;  %v6642_v19 = vadd.f32 %v2889_v63, %v2888_v2  ;;  %v3279_v63 = vld [vmem:[#allocation9 + $0x60] sm:$0xff] }
 0x977   :  { %v2964_v20 = vpop.f32.mrb[29].mxu0  ;;  %v3035_v25 = vpop.f32.mrb[29].mxu1  ;;  %v5044_v2 = vpack.c.bf16 %v3280_v1, %v3279_v63 }
 0x978   :  { %v3042_v34 = vcombine.low %v2962_v7, %v2964_v20  ;;  %v3043_v36 = vcombine.low %v3033_v16, %v3035_v25  ;;  %5284 = vtanh.f32 %v6642_v19  ;;  %v3281_v7 = vld [vmem:[#allocation9 + $0x70] sm:$0xff]  ;;  %v3282_v16 = vld [vmem:[#allocation9 + $0x78] sm:$0xff] }
 0x979   :  { %v5047_v20 = vpack.c.bf16 %v3282_v16, %v3281_v7 }
 0x97a   :  { %v3050_v37 = vrot.slane %v3042_v34, %v5841_v24  ;;  %v3057_v43 = vrot.slane %v3043_v36, %v5841_v24 }
 0x97c   :  { %v3058_v50 = vcombine.low %v3050_v37, %v3057_v43 }
 0x97e   :  { %v3065_v55 = vrot.slane %v3058_v50, %v5841_v24 }
 0x980   :  { %v3067_v0 = vadd.f32 %v3065_v55, %v2895_v54 }
 0x982   :  { %v5285_v10 = vpop.eup %5284  ;;  %v3430_v11 = vmul.f32 -1.442695, %v3067_v0  ;;  %v3075_v12 = vrot.slane %v3067_v0, 1  ;;  %v3086_v29 = vrot.slane %v3067_v0, 3  ;;  %v3083_v30 = vrot.slane %v3067_v0, 2 }
 0x983   :  { %v2892_v21 = vmul.f32 %v5285_v10, %v5283_v60 }
 0x984   :  { %5286 = vpow2.f32 %v3430_v11  ;;  %v3431_v28 = vmul.f32 -1.442695, %v3075_v12  ;;  %v3432_v38 = vmul.f32 -1.442695, %v3086_v29 }
 0x985   :  { %2893 = vst [vmem:[#allocation2 + $0x6] sm:$0x1] %v2892_v21  ;;  %3163 = vmatprep.mubr.f32.mxu0 %v2892_v21  ;;  %3234 = vmatprep.mubr.f32.mxu1 %v2892_v21 }
 0x986   :  { %5288 = vpow2.f32 %v3431_v28 }
 0x987   :  { %5290 = vpow2.f32 %v3432_v38 }
 0x98e   :  { %v5287_v42 = vpop.eup %5286 }
 0x98f   :  { %v3071_v41 = vadd.f32 1.0, %v5287_v42 }
 0x990   :  { %v5289_v8 = vpop.eup %5288 }
 0x991   :  { %5292 = vrcp.f32 %v3071_v41  ;;  %v3080_v24 = vadd.f32 1.0, %v5289_v8  ;;  %v5291_v61 = vpop.eup %5290 }
 0x992   :  { %5294 = vtanh.f32 %v3083_v30  ;;  %v3091_v3 = vadd.f32 1.0, %v5291_v61  ;;  %v3436_v61 = vld [vmem:[%s6675_s5] ss:$0 sm:$0xff]  ;;  %s5410_s5 = scalar_lea.vmem %s3378_s24, 128 }
 0x993   :  { %5296 = vrcp.f32 %v3080_v24  ;;  %p5411_p4 = scmp.ne.s32.totalorder %s3378_s24, %s5410_s5  ;;  %p5416_p6 = scmp.lt.s32.totalorder %s5410_s5, %s5410_s5 }
 0x994   :  { %5298 = vrcp.f32 %v3091_v3 }
 0x995   :  { %p5417_p7 = por %p5416_p6, %p5415_p5 }
 0x997   :  { %p5418_p8 = pnand %p5417_p7, %p5411_p4 }
 0x99b   :  { %v5293_v33 = vpop.eup %5292 }
 0x99c   :  { %v5295_v23 = vpop.eup %5294 }
 0x99d   :  { %v5297_v49 = vpop.eup %5296  ;;  %v3095_v14 = vmul.f32 %v5295_v23, %v5293_v33 }
 0x99e   :  { %v3094_v32 = vmul.f32 %v5297_v49, %v6538_v45  ;;  %v5299_v48 = vpop.eup %5298  ;;  %v3271_v45 = vld [vmem:[#allocation9 + $0x20] sm:$0xff] }
 0x99f   :  { %v5032_v26 = vpack.c.bf16 %v3272_v22, %v3271_v45 }
 0x9a0   :  { %v3096_v59 = vadd.f32 %v3095_v14, %v3094_v32 }
 0x9a2   :  { %5300 = vtanh.f32 %v3096_v59 }
 0x9ac   :  { %v5301_v5 = vpop.eup %5300 }
 0x9ad   :  { %v3098_v46 = vmul.f32 %v5301_v5, %v5299_v48 }
 0x9af   :  { %3164 = vmatmul.mubr.f32.vlgmr.msra.gmra.mrb[30].mxu0 %v3098_v46  ;;  %3235 = vmatmul.mubr.f32.vlgmr.msra.gmra.mrb[30].mxu1 %v3098_v46 }
 0x9b0   :  { %5027 = vmatpush3.bf16.msra.mxu0 %v5026_v6  ;;  %3486 = vmatprep.mubr.msk.f32.mxu0 %vm5451_vm0, %v6856_v15 }
 0x9b1   :  { %5028 = vmatprep.subr.bf16.mxu0 %v5450_v62 }
 0x9b4   :  { %5030 = vmatpush3.bf16.msra.mxu0 %v5029_v17 }
 0x9b5   :  { %5031 = vmatprep.subr.bf16.mxu0 %v5450_v62 }
 0x9b8   :  { %5033 = vmatpush3.bf16.msra.mxu0 %v5032_v26 }
 0x9b9   :  { %5034 = vmatprep.subr.bf16.mxu0 %v5450_v62 }
 0x9bc   :  { %5036 = vmatpush3.bf16.msra.mxu0 %v5035_v39 }
 0x9bd   :  { %5037 = vmatprep.subr.bf16.mxu0 %v5450_v62 }
 0x9c0   :  { %5039 = vmatpush3.bf16.msra.mxu0 %v5038_v51 }
 0x9c1   :  { %5040 = vmatprep.subr.bf16.mxu0 %v5450_v62 }
 0x9c4   :  { %5042 = vmatpush3.bf16.msra.mxu0 %v5041_v57 }
 0x9c5   :  { %5043 = vmatprep.subr.bf16.mxu0 %v5450_v62 }
 0x9c8   :  { %5045 = vmatpush3.bf16.msra.mxu0 %v5044_v2 }
 0x9c9   :  { %5046 = vmatprep.subr.bf16.mxu0 %v5450_v62 }
 0x9cc   :  { %5048 = vmatpush3.bf16.msra.mxu0 %v5047_v20 }
 0xa82   :  { %v3165_v25 = vpop.f32.mrb[30].mxu0  ;;  %v3236_v34 = vpop.f32.mrb[30].mxu1 }
 0xa83   :  { %v3166_v36 = vadd.f32 %v3165_v25, %v7255_v56  ;;  %v3167_v37 = vpop.f32.mrb[31].mxu0  ;;  %v3238_v43 = vpop.f32.mrb[31].mxu1  ;;  %v3237_v15 = vadd.f32 %v3236_v34, %v7257_v27 }
 0xa84   :  { %v3168_v50 = vadd.f32 %v3167_v37, %v5954_v4  ;;  %v3239_v0 = vadd.f32 %v3238_v43, %v7256_v18 }
 0xa85   :  { %v3433_v54 = vmul.f32 -1.442695, %v3166_v36 }
 0xa86   :  { %v3434_v55 = vmul.f32 -1.442695, %v3168_v50  ;;  %v3435_v60 = vmul.f32 -1.442695, %v3239_v0 }
 0xa87   :  { %5302 = vpow2.f32 %v3433_v54 }
 0xa88   :  { %5304 = vpow2.f32 %v3434_v55 }
 0xa89   :  { %5306 = vpow2.f32 %v3435_v60 }
 0xa8a   :  { %5308 = vtanh.f32 %v3237_v15 }
 0xa91   :  { %v5303_v10 = vpop.eup %5302 }
 0xa92   :  { %v5305_v11 = vpop.eup %5304  ;;  %v3244_v12 = vadd.f32 1.0, %v5303_v10 }
 0xa93   :  { %v3250_v21 = vadd.f32 1.0, %v5305_v11  ;;  %v5307_v56 = vpop.eup %5306 }
 0xa94   :  { %5310 = vrcp.f32 %v3244_v12  ;;  %v5309_v28 = vpop.eup %5308  ;;  %v3257_v42 = vadd.f32 1.0, %v5307_v56 }
 0xa95   :  { %5312 = vrcp.f32 %v3250_v21 }
 0xa96   :  { %5314 = vrcp.f32 %v3257_v42 }
 0xa9e   :  { %v5311_v4 = vpop.eup %5310 }
 0xa9f   :  { %v5313_v29 = vpop.eup %5312  ;;  %v3261_v38 = vmul.f32 %v5311_v4, %v5309_v28 }
 0xaa0   :  { %v3260_v30 = vmul.f32 %v5313_v29, %v6642_v19  ;;  %v5315_v27 = vpop.eup %5314 }
 0xaa2   :  { %v3262_v18 = vadd.f32 %v3261_v38, %v3260_v30 }
 0xaa4   :  { %5316 = vtanh.f32 %v3262_v18 }
 0xaae   :  { %v5317_v41 = vpop.eup %5316 }
 0xaaf   :  { %v3264_v8 = vmul.f32 %v5317_v41, %v5315_v27 }
 0xab1   :  { %3265 = vst [vmem:[#allocation2 + $0x7] sm:$0x1] %v3264_v8 }
 0xab8   :  { %v3266_v24 = vld [vmem:[#allocation2] sm:$0xff] }
 0xab9   :  { %3487 = vmatmul.mubr.f32.vlgmr.msra.gmra.mrb[32].mxu0 %v3266_v24 }
 0xb8c   :  { %v3356_v33 = vpop.f32.mrb[32].mxu0 }
 0xb8d   :  { %v3357_v23 = vadd.f32 %v3436_v61, %v3356_v33  ;;  %v3488_v49 = vpop.f32.mrb[33].mxu0 }
 0xb8f   :  { %3360 = vmax.xlane.f32.xlu0 %v3357_v23 }
 0xc1c   :  { %v3361_v3 = vpop.xlane.xlu0 %3360 }
 0xc1d   :  { %v3362_v32 = vsub.f32 %v3357_v23, %v3361_v3 }
 0xc1f   :  { %v3363_v19 = vmul.f32 1.442695, %v3362_v32 }
 0xc21   :  { %5318 = vpow2.f32 %v3363_v19 }
 0xc2b   :  { %v5319_v14 = vpop.eup %5318 }
 0xc2c   :  { %3365 = vadd.xlane.f32.xlu0 %v5319_v14 }
 0xcb9   :  { %v3366_v59 = vpop.xlane.xlu0 %3365 }
 0xcba   :  { %5320 = vlog2.f32 %v3366_v59 }
 0xcc4   :  { %v5321_v48 = vpop.eup %5320 }
 0xcc5   :  { %v3368_v5 = vmul.f32 0.6931472, %v5321_v48 }
 0xcc7   :  { %v3369_v46 = vsub.f32 %v3362_v32, %v3368_v5 }
 0xcc9   :  { %3370 = vst [vmem:[#allocation11] sm:$0xff] %v3369_v46 }
 0xcca   :  { %5421 = shalt.err (!%p5418_p8)
}
 0xccb   :  { %s5422_s27 = scalar_lea.hbm %s6676_s6, 128 }
 0xccc   :  { %p5423_p9 = scmp.ne.s32.totalorder %s6676_s6, %s5422_s27  ;;  %p5426_p10 = scmp.lt.u32.totalorder %s5422_s27, %s6676_s6 }
 0xcce   :  { %p5428_p11 = pnand %p5426_p10, %p5423_p9 }
 0xcd0   :  { %5431 = shalt.err (!%p5428_p11)
}
 0xcd1   :  { %3380 = dma.vmem_to_hbm [thread:$0]  %s3378_s24, 128, %s6676_s6, [#allocation5]  }
 0xcd2   :  { %5438 = dma.done.wait [#allocation5], 128  }
 0xcd3   :  { %5439 = vsyncadd [#allocation5], 4294967168 }
 0xcd4   :  { %3384 = vsyncpa [#allocation4], 1 }
 0xcd5   :  { %3385 = vsyncpa [#allocation7], 1 }
 0xcd6   :  { %3386 = vsyncpa [#allocation10], 1 }
 0xcd7   :  { %3387 = vsyncpa [#allocation5], 1 }

</bundles_post_ra>
